<compile_context>
chip_gen: v5e
topology: v5e:2x2
jax: 0.10.0
libtpu: 0.0.40
codegen_flags: <defaults>
</compile_context>

<pallas_src>
import functools
import math

import jax
import jax.numpy as jnp
from jax import lax
from jax.experimental import pallas as pl
from jax.experimental.pallas import tpu as pltpu

PAD_ID = 1
_VMEM_LIMIT = 48 * 1024 * 1024   # < 64 MiB physical on v7x, plenty of headroom on v5e/v6e


# ------------------------------- helpers ------------------------------------

def _round_up(x, m):
    return (x + m - 1) // m * m


def _choose_tile(dim, pref, align):
    """Largest multiple of `align` that divides `dim` and is <= max(pref, align)."""
    if dim <= pref:
        return dim
    t = max((pref // align) * align, align)
    while dim % t != 0:
        t -= align
    return t


def _pad2(x, rows, cols):
    r, c = x.shape
    if r == rows and c == cols:
        return x
    return jnp.pad(x, ((0, rows - r), (0, cols - c)))


def _cparams(sem):
    return pltpu.CompilerParams(dimension_semantics=sem,
                                vmem_limit_bytes=_VMEM_LIMIT)


# ------------------------- tiled linear (bias + act) -------------------------

def _linear_kernel(x_ref, w_ref, b_ref, o_ref, acc_ref, *, act):
    k = pl.program_id(2)

    @pl.when(k == 0)
    def _():
        acc_ref[...] = jnp.zeros_like(acc_ref)

    acc_ref[...] += lax.dot_general(
        x_ref[...], w_ref[...],
        dimension_numbers=(((1,), (1,)), ((), ())),
        preferred_element_type=jnp.float32)

    @pl.when(k == pl.num_programs(2) - 1)
    def _():
        y = acc_ref[...] + b_ref[...]
        if act == "gelu":
            y = jax.nn.gelu(y)
        elif act == "relu":
            y = jnp.maximum(y, 0.0)
        elif act == "tanh":
            y = jnp.tanh(y)
        o_ref[...] = y.astype(o_ref.dtype)


def linear(x, w, b=None, act="none", out_dtype=jnp.bfloat16):
    """y = act(x @ w.T + b).  x:[M,K], w:[N,K] (PyTorch Linear layout), b:[N] or None."""
    M, K = x.shape
    N = w.shape[0]
    Mp, Np, Kp = _round_up(M, 16), _round_up(N, 128), _round_up(K, 128)
    tm = _choose_tile(Mp, 512, 16)
    tn = _choose_tile(Np, 512, 128)
    tk = _choose_tile(Kp, 1024, 128)

    xb = _pad2(x.astype(jnp.bfloat16), Mp, Kp)
    wb = _pad2(w.astype(jnp.bfloat16), Np, Kp)
    bb = jnp.zeros((1, Np), jnp.float32)
    if b is not None:
        bb = bb.at[0, :N].set(b.astype(jnp.float32))

    flops = 2 * Mp * Np * Kp
    transc = Mp * Np if act in ("gelu", "tanh") else 0
    bytes_accessed = (Mp * Kp * 2 * (Np // tn) + Np * Kp * 2 * (Mp // tm)
                      + Mp * Np * jnp.dtype(out_dtype).itemsize)

    out = pl.pallas_call(
        functools.partial(_linear_kernel, act=act),
        out_shape=jax.ShapeDtypeStruct((Mp, Np), out_dtype),
        grid=(Mp // tm, Np // tn, Kp // tk),
        in_specs=[pl.BlockSpec((tm, tk), lambda i, j, k: (i, k)),
                  pl.BlockSpec((tn, tk), lambda i, j, k: (j, k)),
                  pl.BlockSpec((1, tn), lambda i, j, k: (0, j))],
        out_specs=pl.BlockSpec((tm, tn), lambda i, j, k: (i, j)),
        scratch_shapes=[pltpu.VMEM((tm, tn), jnp.float32)],
        compiler_params=_cparams(("parallel", "parallel", "arbitrary")),
        cost_estimate=pl.CostEstimate(flops=flops, transcendentals=transc,
                                      bytes_accessed=bytes_accessed),
    )(xb, wb, bb)
    return out[:M, :N]


# ------------- tiled linear + bias + residual + LayerNorm (fused) ------------

def _linear_res_ln_kernel(x_ref, w_ref, b_ref, r_ref, g_ref, be_ref,
                          o_ref, acc_ref, *, eps):
    k = pl.program_id(1)

    @pl.when(k == 0)
    def _():
        acc_ref[...] = jnp.zeros_like(acc_ref)

    acc_ref[...] += lax.dot_general(
        x_ref[...], w_ref[...],
        dimension_numbers=(((1,), (1,)), ((), ())),
        preferred_element_type=jnp.float32)

    @pl.when(k == pl.num_programs(1) - 1)
    def _():
        y = acc_ref[...] + b_ref[...] + r_ref[...].astype(jnp.float32)
        mu = jnp.mean(y, axis=-1, keepdims=True)
        yc = y - mu
        var = jnp.mean(yc * yc, axis=-1, keepdims=True)
        o_ref[...] = (yc * lax.rsqrt(var + eps) * g_ref[...]
                      + be_ref[...]).astype(o_ref.dtype)


def linear_res_ln(x, w, b, res, gamma, beta, eps=1e-5, out_dtype=jnp.bfloat16):
    """LayerNorm(res + x @ w.T + b): matmul with residual + LN fused in the epilogue.
    x:[M,K], w:[H,K], res:[M,H].  N = H stays one lane-dense block."""
    M, K = x.shape
    H = w.shape[0]
    Mp, Kp = _round_up(M, 16), _round_up(K, 128)
    tm = _choose_tile(Mp, 512, 16)
    tk = _choose_tile(Kp, 1024, 128)

    xb = _pad2(x.astype(jnp.bfloat16), Mp, Kp)
    wb = _pad2(w.astype(jnp.bfloat16), H, Kp)
    rb = _pad2(res.astype(jnp.bfloat16), Mp, H)
    b2 = b.reshape(1, H).astype(jnp.float32)
    g2 = gamma.reshape(1, H).astype(jnp.float32)
    e2 = beta.reshape(1, H).astype(jnp.float32)

    flops = 2 * Mp * H * Kp + 10 * Mp * H
    bytes_accessed = Mp * Kp * 2 + H * Kp * 2 * (Mp // tm) + 2 * Mp * H * 2

    out = pl.pallas_call(
        functools.partial(_linear_res_ln_kernel, eps=eps),
        out_shape=jax.ShapeDtypeStruct((Mp, H), out_dtype),
        grid=(Mp // tm, Kp // tk),
        in_specs=[pl.BlockSpec((tm, tk), lambda i, k: (i, k)),
                  pl.BlockSpec((H, tk), lambda i, k: (0, k)),
                  pl.BlockSpec((1, H), lambda i, k: (0, 0)),
                  pl.BlockSpec((tm, H), lambda i, k: (i, 0)),
                  pl.BlockSpec((1, H), lambda i, k: (0, 0)),
                  pl.BlockSpec((1, H), lambda i, k: (0, 0))],
        out_specs=pl.BlockSpec((tm, H), lambda i, k: (i, 0)),
        scratch_shapes=[pltpu.VMEM((tm, H), jnp.float32)],
        compiler_params=_cparams(("parallel", "arbitrary")),
        cost_estimate=pl.CostEstimate(flops=flops, transcendentals=0,
                                      bytes_accessed=bytes_accessed),
    )(xb, wb, b2, rb, g2, e2)
    return out[:M]


# --------------------------- standalone LayerNorm ----------------------------

def _layernorm_kernel(x_ref, g_ref, b_ref, o_ref, *, eps):
    x = x_ref[...].astype(jnp.float32)
    mu = jnp.mean(x, axis=-1, keepdims=True)
    xc = x - mu
    var = jnp.mean(xc * xc, axis=-1, keepdims=True)
    o_ref[...] = (xc * lax.rsqrt(var + eps) * g_ref[...] + b_ref[...]).astype(o_ref.dtype)


def layernorm(x, gamma, beta, eps=1e-5, out_dtype=jnp.bfloat16):
    M, H = x.shape
    Mp = _round_up(M, 16)
    tm = _choose_tile(Mp, 1024, 16)
    xb = _pad2(x, Mp, H)
    out = pl.pallas_call(
        functools.partial(_layernorm_kernel, eps=eps),
        out_shape=jax.ShapeDtypeStruct((Mp, H), out_dtype),
        grid=(Mp // tm,),
        in_specs=[pl.BlockSpec((tm, H), lambda i: (i, 0)),
                  pl.BlockSpec((1, H), lambda i: (0, 0)),
                  pl.BlockSpec((1, H), lambda i: (0, 0))],
        out_specs=pl.BlockSpec((tm, H), lambda i: (i, 0)),
        compiler_params=_cparams(("parallel",)),
    )(xb, gamma.reshape(1, H).astype(jnp.float32),
      beta.reshape(1, H).astype(jnp.float32))
    return out[:M]


# ------------------- multi-head attention (in-kernel masks) ------------------
# The fused [B, L, 3H] QKV tensor is fed directly; lane-offset BlockSpecs (block index 0/1/2 on the
# last axis) select the Q / K / V thirds without any HBM slicing or concatenation.

def _seq_tile(L, pref=256):
    return L if (L <= pref or L % 16 != 0) else _choose_tile(L, pref, 16)


def _mha_self_kernel(q_ref, k_ref, v_ref, valid_ref, o_ref, *, nh, scale):
    tq = q_ref.shape[1]
    Tk = k_ref.shape[1]
    H = q_ref.shape[2]
    d = H // nh

    key_ok = jnp.broadcast_to(valid_ref[0] != 0, (tq, Tk))          # key-padding mask

    for h in range(nh):                                             # static unroll over heads
        sl = slice(h * d, (h + 1) * d)
        qh = q_ref[0, :, sl]
        s = lax.dot_general(qh, k_ref[0, :, sl], (((1,), (1,)), ((), ())),
                            preferred_element_type=jnp.float32) * scale
        s = jnp.where(key_ok, s, jnp.float32(-1e30))
        m = jnp.max(s, axis=-1, keepdims=True)
        p = jnp.exp(s - m)
        denom = jnp.sum(p, axis=-1, keepdims=True)
        o = jnp.dot(p.astype(v_ref.dtype), v_ref[0, :, sl],
                    preferred_element_type=jnp.float32)
        # per-head bf16 store into its lane slice; final HBM writeback is one lane-dense [tq,H] block
        o_ref[0, :, sl] = (o * pl.reciprocal(denom, approx=True)).astype(o_ref.dtype)


def mha_self(qkv, key_valid, nh):
    """Encoder self-attention.  qkv:[B,L,3H] fused projections, key_valid:[B,L] (1 = attendable)."""
    B, L, H3 = qkv.shape
    H = H3 // 3
    scale = 1.0 / math.sqrt(H // nh)
    tq = _seq_tile(L)
    valid = key_valid.astype(jnp.int32).reshape(B, 1, L)
    return pl.pallas_call(
        functools.partial(_mha_self_kernel, nh=nh, scale=scale),
        out_shape=jax.ShapeDtypeStruct((B, L, H), jnp.bfloat16),
        grid=(B, L // tq),
        in_specs=[pl.BlockSpec((1, tq, H), lambda b, qi: (b, qi, 0)),   # Q tile  (lane block 0)
                  pl.BlockSpec((1, L, H), lambda b, qi: (b, 0, 1)),     # K full  (lane block 1)
                  pl.BlockSpec((1, L, H), lambda b, qi: (b, 0, 2)),     # V full  (lane block 2)
                  pl.BlockSpec((1, 1, L), lambda b, qi: (b, 0, 0))],
        out_specs=pl.BlockSpec((1, tq, H), lambda b, qi: (b, qi, 0)),
        compiler_params=_cparams(("parallel", "parallel")),
    )(qkv, qkv, qkv, valid)


def _mha_prefix_kernel(q_ref, ks_ref, vs_ref, kt_ref, vt_ref, sv_ref, tvld_ref,
                       o_ref, *, nh, scale):
    tq = q_ref.shape[1]
    S = ks_ref.shape[1]
    T = kt_ref.shape[1]
    H = q_ref.shape[2]
    d = H // nh
    qi = pl.program_id(1)

    # masks built once per grid step from tiny validity vectors (never materialized in HBM)
    src_ok = jnp.broadcast_to(sv_ref[0] != 0, (tq, S))               # source keys: pad mask only
    qpos = lax.broadcasted_iota(jnp.int32, (tq, T), 0) + qi * tq
    kpos = lax.broadcasted_iota(jnp.int32, (tq, T), 1)
    tgt_ok = jnp.broadcast_to(tvld_ref[0] != 0, (tq, T)) & (kpos <= qpos)   # causal within target

    for h in range(nh):
        sl = slice(h * d, (h + 1) * d)
        qh = q_ref[0, :, sl]
        ss = lax.dot_general(qh, ks_ref[0, :, sl], (((1,), (1,)), ((), ())),
                             preferred_element_type=jnp.float32) * scale
        st = lax.dot_general(qh, kt_ref[0, :, sl], (((1,), (1,)), ((), ())),
                             preferred_element_type=jnp.float32) * scale
        ss = jnp.where(src_ok, ss, jnp.float32(-1e30))
        st = jnp.where(tgt_ok, st, jnp.float32(-1e30))
        m = jnp.maximum(jnp.max(ss, axis=-1, keepdims=True),
                        jnp.max(st, axis=-1, keepdims=True))
        ps = jnp.exp(ss - m)
        pt = jnp.exp(st - m)
        denom = (jnp.sum(ps, axis=-1, keepdims=True)
                 + jnp.sum(pt, axis=-1, keepdims=True))
        o = (jnp.dot(ps.astype(vs_ref.dtype), vs_ref[0, :, sl],
                     preferred_element_type=jnp.float32)
             + jnp.dot(pt.astype(vt_ref.dtype), vt_ref[0, :, sl],
                       preferred_element_type=jnp.float32))
        o_ref[0, :, sl] = (o * pl.reciprocal(denom, approx=True)).astype(o_ref.dtype)


def mha_prefix(qkv_tgt, qkv_src, tgt_valid, src_valid, nh):
    """Decoder prefix-LM attention.  Queries from qkv_tgt[:, :, :H]; keys/values from the cached
    source QKV tensor (lanes H:3H) AND the target QKV tensor — no K/V concat in HBM."""
    B, T, H3 = qkv_tgt.shape
    S = qkv_src.shape[1]
    H = H3 // 3
    scale = 1.0 / math.sqrt(H // nh)
    tq = _seq_tile(T)
    svld = src_valid.astype(jnp.int32).reshape(B, 1, S)
    tvld = tgt_valid.astype(jnp.int32).reshape(B, 1, T)
    return pl.pallas_call(
        functools.partial(_mha_prefix_kernel, nh=nh, scale=scale),
        out_shape=jax.ShapeDtypeStruct((B, T, H), jnp.bfloat16),
        grid=(B, T // tq),
        in_specs=[pl.BlockSpec((1, tq, H), lambda b, qi: (b, qi, 0)),   # target Q tile
                  pl.BlockSpec((1, S, H), lambda b, qi: (b, 0, 1)),     # cached source K
                  pl.BlockSpec((1, S, H), lambda b, qi: (b, 0, 2)),     # cached source V
                  pl.BlockSpec((1, T, H), lambda b, qi: (b, 0, 1)),     # target K
                  pl.BlockSpec((1, T, H), lambda b, qi: (b, 0, 2)),     # target V
                  pl.BlockSpec((1, 1, S), lambda b, qi: (b, 0, 0)),
                  pl.BlockSpec((1, 1, T), lambda b, qi: (b, 0, 0))],
        out_specs=pl.BlockSpec((1, tq, H), lambda b, qi: (b, qi, 0)),
        compiler_params=_cparams(("parallel", "parallel")),
    )(qkv_tgt, qkv_src, qkv_src, qkv_tgt, qkv_tgt, svld, tvld)


# ------------- fused tied lm_head + token cross-entropy (streaming) ----------

def _lmhead_ce_kernel(h_ref, w_ref, g_ref, vb_ref, loss_ref, m_ref, l_ref, pick_ref):
    j = pl.program_id(1)

    @pl.when(j == 0)
    def _():
        m_ref[...] = jnp.full_like(m_ref, -1e30)
        l_ref[...] = jnp.zeros_like(l_ref)
        # picked logit <h, word_emb[label]> computed once per row tile from the gathered embedding
        # rows -> no per-step iota/compare/select in the hot vocab-streaming loop.
        pick_ref[...] = jnp.sum(h_ref[...].astype(jnp.float32) * g_ref[...].astype(jnp.float32),
                                axis=-1, keepdims=True)

    z = lax.dot_general(h_ref[...], w_ref[...],
                        dimension_numbers=(((1,), (1,)), ((), ())),
                        preferred_element_type=jnp.float32) + vb_ref[...]   # +(-1e30) on vocab pad
    m_new = jnp.maximum(m_ref[...], jnp.max(z, axis=-1, keepdims=True))
    l_ref[...] = (l_ref[...] * jnp.exp(m_ref[...] - m_new)
                  + jnp.sum(jnp.exp(z - m_new), axis=-1, keepdims=True))
    m_ref[...] = m_new

    @pl.when(j == pl.num_programs(1) - 1)
    def _():
        loss_ref[...] = m_ref[...] + jnp.log(l_ref[...]) - pick_ref[...]


def lm_head_cross_entropy(hidden, word_emb, labels):
    """Per-token CE of logits = hidden @ word_emb.T (tied lm_head, no bias).
    hidden:[N,H], word_emb:[V,H], labels:[N] -> [N] f32.  The [N,V] logits never touch HBM."""
    N, H = hidden.shape
    V = word_emb.shape[0]
    Hp = _round_up(H, 128)
    Np = _round_up(N, 16) if N <= 1024 else _round_up(N, 1024)
    Vp = _round_up(V, 128) if V <= 2048 else _round_up(V, 2048)
    tm = Np if Np <= 2048 else _choose_tile(Np, 2048, 1024)     # cover all rows when they fit
    tv = Vp if Vp <= 2048 else _choose_tile(Vp, 2048, 2048)     # large vocab tiles

    hb = _pad2(hidden.astype(jnp.bfloat16), Np, Hp)
    wb = _pad2(word_emb.astype(jnp.bfloat16), Vp, Hp)
    gath = jnp.take(word_emb, labels.astype(jnp.int32), axis=0)            # [N, H] label rows
    gb = _pad2(gath.astype(jnp.bfloat16), Np, Hp)
    vbias = jnp.zeros((1, Vp), jnp.float32)
    if Vp > V:
        vbias = vbias.at[0, V:].set(-1e30)

    flops = 2 * Np * Vp * Hp
    bytes_accessed = (2 * Np * Hp * 2 + Vp * Hp * 2 * (Np // tm) + Np * 4 + Vp * 4)

    out = pl.pallas_call(
        _lmhead_ce_kernel,
        out_shape=jax.ShapeDtypeStruct((Np, 1), jnp.float32),
        grid=(Np // tm, Vp // tv),
        in_specs=[pl.BlockSpec((tm, Hp), lambda i, j: (i, 0)),
                  pl.BlockSpec((tv, Hp), lambda i, j: (j, 0)),
                  pl.BlockSpec((tm, Hp), lambda i, j: (i, 0)),
                  pl.BlockSpec((1, tv), lambda i, j: (0, j))],
        out_specs=pl.BlockSpec((tm, 1), lambda i, j: (i, 0)),
        scratch_shapes=[pltpu.VMEM((tm, 1), jnp.float32),
                        pltpu.VMEM((tm, 1), jnp.float32),
                        pltpu.VMEM((tm, 1), jnp.float32)],
        compiler_params=_cparams(("parallel", "arbitrary")),
        cost_estimate=pl.CostEstimate(flops=flops, transcendentals=Np * Vp,
                                      bytes_accessed=bytes_accessed),
    )(hb, wb, gb, vbias)
    return out[:N, 0]


# ------------------------------ model pieces ---------------------------------

def embed(params, ids, pos_offset):
    """word + position embedding + LayerNorm (positions offset by past length)."""
    B, L = ids.shape
    H = params["word_emb"].shape[1]
    tok = jnp.take(params["word_emb"], ids, axis=0).astype(jnp.float32)
    pos = params["pos_emb"][pos_offset:pos_offset + L]
    e = tok + pos[None, :, :]
    return layernorm(e.reshape(B * L, H), params["emb_ln_g"],
                     params["emb_ln_b"]).reshape(B, L, H)


def transformer_layer(lp, x, nh, *, src_qkv, src_valid, self_valid):
    """One RoBERTa layer (post-LN, gelu FFN), shared by encoder and decoder passes.
    Returns (output [B,L,H], this layer's fused QKV tensor [B,L,3H] == its self K/V cache)."""
    B, L, H = x.shape
    qkv = linear(x.reshape(B * L, H), lp["Wqkv"], lp["bqkv"]).reshape(B, L, 3 * H)
    if src_qkv is None:
        a = mha_self(qkv, self_valid, nh)                               # encoder: bidirectional
    else:
        a = mha_prefix(qkv, src_qkv, self_valid, src_valid, nh)         # decoder: prefix-LM
    x2d = x.reshape(B * L, H)
    x1 = linear_res_ln(a.reshape(B * L, H), lp["Wo"], lp["bo"],
                       x2d, lp["ln1_g"], lp["ln1_b"])
    f = linear(x1, lp["W1"], lp["b1"], act="gelu")
    x2 = linear_res_ln(f, lp["W2"], lp["b2"], x1, lp["ln2_g"], lp["ln2_b"])
    return x2.reshape(B, L, H), qkv


def seq2seq_unixcoder_forward(params, source_ids, target_ids, nh):
    """Training branch of Seq2Seq_unixcoder.forward -> (loss, loss*active_sum, active_sum)."""
    B, S = source_ids.shape
    T = target_ids.shape[1]
    H = params["word_emb"].shape[1]

    src_valid = (source_ids != PAD_ID).astype(jnp.int32)                # [B, S]
    tgt_valid = (target_ids != PAD_ID).astype(jnp.int32)                # [B, T]

    # encoder pass: bidirectional over source, collect per-layer QKV (K/V cache, use_cache=True)
    x = embed(params, source_ids, 0)
    caches = []
    for lp in params["layers"]:
        x, qkv = transformer_layer(lp, x, nh, src_qkv=None, src_valid=None,
                                   self_valid=src_valid)
        caches.append(qkv)

    # decoder pass: target attends over [cached source ; target] with prefix-causal mask
    y = embed(params, target_ids, S)                                    # positions offset by S
    for lp, src_qkv in zip(params["layers"], caches):
        y, _ = transformer_layer(lp, y, nh, src_qkv=src_qkv, src_valid=src_valid,
                                 self_valid=tgt_valid)

    # tied lm_head + shifted token cross-entropy (fused, streaming over vocab tiles)
    hidden = y[:, :-1, :].reshape(B * (T - 1), H)
    shift_labels = target_ids[:, 1:].reshape(-1)
    tok_loss = lm_head_cross_entropy(hidden, params["word_emb"], shift_labels)

    active = (shift_labels != PAD_ID).astype(jnp.float32)
    n_active = jnp.sum(active)
    loss = jnp.sum(tok_loss * active) / n_active
    return loss, loss * n_active, n_active


# ------------------------------ parameter init -------------------------------

def init_params(key, V, H, I, max_pos, n_layers):
    keys = iter(jax.random.split(key, 8 + 8 * n_layers))

    def w(shape, scale=0.02, dtype=jnp.bfloat16):
        return (scale * jax.random.normal(next(keys), shape)).astype(dtype)

    zeros = lambda s: jnp.zeros(s, jnp.float32)
    ones = lambda s: jnp.ones(s, jnp.float32)

    layers = []
    for _ in range(n_layers):
        layers.append({
            "Wqkv": w((3 * H, H)), "bqkv": zeros((3 * H,)),
            "Wo": w((H, H)), "bo": zeros((H,)),
            "ln1_g": ones((H,)), "ln1_b": zeros((H,)),
            "W1": w((I, H)), "b1": zeros((I,)),
            "W2": w((H, I)), "b2": zeros((H,)),
            "ln2_g": ones((H,)), "ln2_b": zeros((H,)),
        })
    return {
        "word_emb": w((V, H)),                     # == lm_head.weight (tied)
        "pos_emb": w((max_pos, H), dtype=jnp.float32),
        "emb_ln_g": ones((H,)), "emb_ln_b": zeros((H,)),
        "layers": layers,
    }


# ----------------------------------- main ------------------------------------

if __name__ == "__main__":
    V, H, I, NH, MAX_POS, LAYERS = 512, 128, 256, 4, 128, 2
    B, S, T = 2, 16, 16

    params = init_params(jax.random.PRNGKey(0), V, H, I, MAX_POS, LAYERS)

    k1, k2 = jax.random.split(jax.random.PRNGKey(0))
    source_ids = jax.random.randint(k1, (B, S), 2, V, dtype=jnp.int32)
    source_ids = source_ids.at[:, -2:].set(PAD_ID)      # last 2 source tokens are pad (id == 1)
    target_ids = jax.random.randint(k2, (B, T), 2, V, dtype=jnp.int32)
    target_ids = target_ids.at[:, -3:].set(PAD_ID)      # last 3 target tokens are pad

    fwd = jax.jit(functools.partial(seq2seq_unixcoder_forward, nh=NH))
    loss, loss_scaled, n_active = fwd(params, source_ids, target_ids)
    jax.block_until_ready((loss, loss_scaled, n_active))
    assert bool(jnp.isfinite(loss))
    print("KERNEL_OK")
</pallas_src>

<mosaic_0001>
module attributes {stable_mosaic.version = 11 : i64} {
  func.func @_linear_kernel(%arg0: i32, %arg1: i32, %arg2: i32, %arg3: memref<32x128xbf16, #tpu.memory_space<vmem>>, %arg4: memref<384x128xbf16, #tpu.memory_space<vmem>>, %arg5: memref<1x384xf32, #tpu.memory_space<vmem>>, %arg6: memref<32x384xbf16, #tpu.memory_space<vmem>>, %arg7: memref<32x384xf32, #tpu.memory_space<vmem>>) attributes {dimension_semantics = [#tpu.dimension_semantics<parallel>, #tpu.dimension_semantics<parallel>, #tpu.dimension_semantics<arbitrary>], iteration_bounds = array<i64: 1, 1, 1>, scalar_prefetch = 0 : i64, scratch_operands = 1 : i64, tpu.core_type = #tpu.core_type<tc>, window_params = [{transform_indices = @transform_0, window_bounds = array<i64: 32, 128>}, {transform_indices = @transform_1, window_bounds = array<i64: 384, 128>}, {transform_indices = @transform_2, window_bounds = array<i64: 1, 384>}, {transform_indices = @transform_3, window_bounds = array<i64: 32, 384>}]} {
    %c0_i32 = arith.constant 0 : i32
    %0 = arith.cmpi eq, %arg2, %c0_i32 : i32
    %1 = arith.extui %0 : i1 to i32
    %c0_i32_0 = arith.constant 0 : i32
    %2 = arith.cmpi ne, %1, %c0_i32_0 : i32
    scf.if %2 {
      %cst_10 = arith.constant 0.000000e+00 : f32
      %12 = vector.broadcast %cst_10 : f32 to vector<32x384xf32>
      %c0_11 = arith.constant 0 : index
      %c0_12 = arith.constant 0 : index
      %13 = vector.load %arg7[%c0_11, %c0_12] : memref<32x384xf32, #tpu.memory_space<vmem>>, vector<32x384xf32>
      tpu.vector_store %arg7[%c0_11, %c0_12], %12 {strides = array<i32>} : memref<32x384xf32, #tpu.memory_space<vmem>>, vector<32x384xf32>,
    } else {
    }
    %c0 = arith.constant 0 : index
    %c0_1 = arith.constant 0 : index
    %3 = vector.load %arg7[%c0, %c0_1] : memref<32x384xf32, #tpu.memory_space<vmem>>, vector<32x384xf32>
    %c0_2 = arith.constant 0 : index
    %c0_3 = arith.constant 0 : index
    %4 = vector.load %arg3[%c0_2, %c0_3] : memref<32x128xbf16, #tpu.memory_space<vmem>>, vector<32x128xbf16>
    %c0_4 = arith.constant 0 : index
    %c0_5 = arith.constant 0 : index
    %5 = vector.load %arg4[%c0_4, %c0_5] : memref<384x128xbf16, #tpu.memory_space<vmem>>, vector<384x128xbf16>
    %cst = arith.constant dense<0.000000e+00> : vector<32x384xf32>
    %6 = tpu.matmul %4, %5, %cst {dimension_numbers = #tpu.dot_dimension_numbers<[1], [1], [0], [0], [0, 0, 1, 0], [], []>} : vector<32x128xbf16>, vector<384x128xbf16>, vector<32x384xf32> -> vector<32x384xf32>
    %7 = arith.addf %3, %6 : vector<32x384xf32>
    %c0_6 = arith.constant 0 : index
    %c0_7 = arith.constant 0 : index
    %8 = vector.load %arg7[%c0_6, %c0_7] : memref<32x384xf32, #tpu.memory_space<vmem>>, vector<32x384xf32>
    tpu.vector_store %arg7[%c0_6, %c0_7], %7 {strides = array<i32>} : memref<32x384xf32, #tpu.memory_space<vmem>>, vector<32x384xf32>,
    %c0_i32_8 = arith.constant 0 : i32
    %9 = arith.cmpi eq, %arg2, %c0_i32_8 : i32
    %10 = arith.extui %9 : i1 to i32
    %c0_i32_9 = arith.constant 0 : i32
    %11 = arith.cmpi ne, %10, %c0_i32_9 : i32
    scf.if %11 {
      %c0_10 = arith.constant 0 : index
      %c0_11 = arith.constant 0 : index
      %12 = vector.load %arg7[%c0_10, %c0_11] : memref<32x384xf32, #tpu.memory_space<vmem>>, vector<32x384xf32>
      %c0_12 = arith.constant 0 : index
      %c0_13 = arith.constant 0 : index
      %13 = vector.load %arg5[%c0_12, %c0_13] : memref<1x384xf32, #tpu.memory_space<vmem>>, vector<1x384xf32>
      %14 = vector.broadcast %13 : vector<1x384xf32> to vector<32x384xf32>
      %15 = arith.addf %12, %14 : vector<32x384xf32>
      %16 = arith.truncf %15 : vector<32x384xf32> to vector<32x384xbf16>
      %c0_14 = arith.constant 0 : index
      %c0_15 = arith.constant 0 : index
      %17 = vector.load %arg6[%c0_14, %c0_15] : memref<32x384xbf16, #tpu.memory_space<vmem>>, vector<32x384xbf16>
      tpu.vector_store %arg6[%c0_14, %c0_15], %16 {strides = array<i32>} : memref<32x384xbf16, #tpu.memory_space<vmem>>, vector<32x384xbf16>,
    } else {
    }
    return
  }
  func.func @transform_0(%arg0: i32, %arg1: i32, %arg2: i32) -> (i32, i32) {
    %c0_i32 = arith.constant 0 : i32
    return %arg0, %arg2 : i32, i32
  }
  func.func @transform_1(%arg0: i32, %arg1: i32, %arg2: i32) -> (i32, i32) {
    %c0_i32 = arith.constant 0 : i32
    return %arg1, %arg2 : i32, i32
  }
  func.func @transform_2(%arg0: i32, %arg1: i32, %arg2: i32) -> (i32, i32) {
    %c0_i32 = arith.constant 0 : i32
    %c0_i32_0 = arith.constant 0 : i32
    return %c0_i32, %arg1 : i32, i32
  }
  func.func @transform_3(%arg0: i32, %arg1: i32, %arg2: i32) -> (i32, i32) {
    %c0_i32 = arith.constant 0 : i32
    return %arg0, %arg1 : i32, i32
  }
}

module attributes {stable_mosaic.version = 11 : i64} {
  func.func @_mha_prefix_kernel(%arg0: i32, %arg1: i32, %arg2: memref<1x16x128xbf16, #tpu.memory_space<vmem>>, %arg3: memref<1x16x128xbf16, #tpu.memory_space<vmem>>, %arg4: memref<1x16x128xbf16, #tpu.memory_space<vmem>>, %arg5: memref<1x16x128xbf16, #tpu.memory_space<vmem>>, %arg6: memref<1x16x128xbf16, #tpu.memory_space<vmem>>, %arg7: memref<1x1x16xi32, #tpu.memory_space<vmem>>, %arg8: memref<1x1x16xi32, #tpu.memory_space<vmem>>, %arg9: memref<1x16x128xbf16, #tpu.memory_space<vmem>>) attributes {dimension_semantics = [#tpu.dimension_semantics<parallel>, #tpu.dimension_semantics<parallel>], iteration_bounds = array<i64: 2, 1>, scalar_prefetch = 0 : i64, scratch_operands = 0 : i64, tpu.core_type = #tpu.core_type<tc>, window_params = [{transform_indices = @transform_0, window_bounds = array<i64: 1, 16, 128>}, {transform_indices = @transform_1, window_bounds = array<i64: 1, 16, 128>}, {transform_indices = @transform_2, window_bounds = array<i64: 1, 16, 128>}, {transform_indices = @transform_3, window_bounds = array<i64: 1, 16, 128>}, {transform_indices = @transform_4, window_bounds = array<i64: 1, 16, 128>}, {transform_indices = @transform_5, window_bounds = array<i64: 1, 1, 16>}, {transform_indices = @transform_6, window_bounds = array<i64: 1, 1, 16>}, {transform_indices = @transform_7, window_bounds = array<i64: 1, 16, 128>}]} {
    %c0 = arith.constant 0 : index
    %c0_0 = arith.constant 0 : index
    %c0_1 = arith.constant 0 : index
    %0 = vector.load %arg7[%c0, %c0_0, %c0_1] : memref<1x1x16xi32, #tpu.memory_space<vmem>>, vector<1x1x16xi32>
    %1 = vector.shape_cast %0 : vector<1x1x16xi32> to vector<1x16xi32>
    %c0_i32 = arith.constant 0 : i32
    %2 = vector.broadcast %c0_i32 : i32 to vector<1x16xi32>
    %3 = arith.cmpi ne, %1, %2 : vector<1x16xi32>
    %4 = vector.shape_cast %3 : vector<1x16xi1> to vector<1x16xi1>
    %5 = vector.broadcast %4 : vector<1x16xi1> to vector<16x16xi1>
    %6 = tpu.iota {dimensions = array<i32: 0>} : vector<16x16xi32>
    %c16_i32 = arith.constant 16 : i32
    %7 = arith.muli %arg1, %c16_i32 : i32
    %8 = vector.broadcast %7 : i32 to vector<16x16xi32>
    %9 = arith.addi %6, %8 : vector<16x16xi32>
    %10 = tpu.iota {dimensions = array<i32: 1>} : vector<16x16xi32>
    %c0_2 = arith.constant 0 : index
    %c0_3 = arith.constant 0 : index
    %c0_4 = arith.constant 0 : index
    %11 = vector.load %arg8[%c0_2, %c0_3, %c0_4] : memref<1x1x16xi32, #tpu.memory_space<vmem>>, vector<1x1x16xi32>
    %12 = vector.shape_cast %11 : vector<1x1x16xi32> to vector<1x16xi32>
    %c0_i32_5 = arith.constant 0 : i32
    %13 = vector.broadcast %c0_i32_5 : i32 to vector<1x16xi32>
    %14 = arith.cmpi ne, %12, %13 : vector<1x16xi32>
    %15 = vector.shape_cast %14 : vector<1x16xi1> to vector<1x16xi1>
    %16 = vector.broadcast %15 : vector<1x16xi1> to vector<16x16xi1>
    %17 = arith.cmpi sle, %10, %9 : vector<16x16xi32>
    %18 = arith.andi %16, %17 : vector<16x16xi1>
    %c0_6 = arith.constant 0 : index
    %c0_7 = arith.constant 0 : index
    %c0_8 = arith.constant 0 : index
    %19 = vector.load %arg2[%c0_6, %c0_7, %c0_8] : memref<1x16x128xbf16, #tpu.memory_space<vmem>>, vector<1x16x32xbf16>
    %20 = vector.shape_cast %19 : vector<1x16x32xbf16> to vector<16x32xbf16>
    %c0_9 = arith.constant 0 : index
    %c0_10 = arith.constant 0 : index
    %c0_11 = arith.constant 0 : index
    %21 = vector.load %arg3[%c0_9, %c0_10, %c0_11] : memref<1x16x128xbf16, #tpu.memory_space<vmem>>, vector<1x16x32xbf16>
    %22 = vector.shape_cast %21 : vector<1x16x32xbf16> to vector<16x32xbf16>
    %cst = arith.constant dense<0.000000e+00> : vector<16x16xf32>
    %23 = tpu.matmul %20, %22, %cst {dimension_numbers = #tpu.dot_dimension_numbers<[1], [1], [0], [0], [0, 0, 1, 0], [], []>} : vector<16x32xbf16>, vector<16x32xbf16>, vector<16x16xf32> -> vector<16x16xf32>
    %cst_12 = arith.constant 0.176776692 : f32
    %24 = vector.broadcast %cst_12 : f32 to vector<16x16xf32>
    %25 = arith.mulf %23, %24 : vector<16x16xf32>
    %c0_13 = arith.constant 0 : index
    %c0_14 = arith.constant 0 : index
    %c0_15 = arith.constant 0 : index
    %26 = vector.load %arg5[%c0_13, %c0_14, %c0_15] : memref<1x16x128xbf16, #tpu.memory_space<vmem>>, vector<1x16x32xbf16>
    %27 = vector.shape_cast %26 : vector<1x16x32xbf16> to vector<16x32xbf16>
    %cst_16 = arith.constant dense<0.000000e+00> : vector<16x16xf32>
    %28 = tpu.matmul %20, %27, %cst_16 {dimension_numbers = #tpu.dot_dimension_numbers<[1], [1], [0], [0], [0, 0, 1, 0], [], []>} : vector<16x32xbf16>, vector<16x32xbf16>, vector<16x16xf32> -> vector<16x16xf32>
    %cst_17 = arith.constant 0.176776692 : f32
    %29 = vector.broadcast %cst_17 : f32 to vector<16x16xf32>
    %30 = arith.mulf %28, %29 : vector<16x16xf32>
    %cst_18 = arith.constant -1.000000e+30 : f32
    %31 = vector.broadcast %cst_18 : f32 to vector<16x16xf32>
    %32 = arith.select %5, %25, %31 : vector<16x16xi1>, vector<16x16xf32>
    %cst_19 = arith.constant -1.000000e+30 : f32
    %33 = vector.broadcast %cst_19 : f32 to vector<16x16xf32>
    %34 = arith.select %18, %30, %33 : vector<16x16xi1>, vector<16x16xf32>
    %cst_20 = arith.constant dense<0xFF800000> : vector<16xf32>
    %35 = vector.multi_reduction <maximumf>, %32, %cst_20 [1] : vector<16x16xf32> to vector<16xf32>
    %36 = vector.shape_cast %35 : vector<16xf32> to vector<16x1xf32>
    %cst_21 = arith.constant dense<0xFF800000> : vector<16xf32>
    %37 = vector.multi_reduction <maximumf>, %34, %cst_21 [1] : vector<16x16xf32> to vector<16xf32>
    %38 = vector.shape_cast %37 : vector<16xf32> to vector<16x1xf32>
    %39 = arith.maximumf %36, %38 : vector<16x1xf32>
    %40 = vector.broadcast %39 : vector<16x1xf32> to vector<16x16xf32>
    %41 = arith.subf %32, %40 : vector<16x16xf32>
    %42 = math.exp %41 : vector<16x16xf32>
    %43 = vector.broadcast %39 : vector<16x1xf32> to vector<16x16xf32>
    %44 = arith.subf %34, %43 : vector<16x16xf32>
    %45 = math.exp %44 : vector<16x16xf32>
    %cst_22 = arith.constant dense<0.000000e+00> : vector<16xf32>
    %46 = vector.multi_reduction <add>, %42, %cst_22 [1] : vector<16x16xf32> to vector<16xf32>
    %47 = vector.shape_cast %46 : vector<16xf32> to vector<16x1xf32>
    %cst_23 = arith.constant dense<0.000000e+00> : vector<16xf32>
    %48 = vector.multi_reduction <add>, %45, %cst_23 [1] : vector<16x16xf32> to vector<16xf32>
    %49 = vector.shape_cast %48 : vector<16xf32> to vector<16x1xf32>
    %50 = arith.addf %47, %49 : vector<16x1xf32>
    %51 = arith.truncf %42 : vector<16x16xf32> to vector<16x16xbf16>
    %c0_24 = arith.constant 0 : index
    %c0_25 = arith.constant 0 : index
    %c0_26 = arith.constant 0 : index
    %52 = vector.load %arg4[%c0_24, %c0_25, %c0_26] : memref<1x16x128xbf16, #tpu.memory_space<vmem>>, vector<1x16x32xbf16>
    %53 = vector.shape_cast %52 : vector<1x16x32xbf16> to vector<16x32xbf16>
    %cst_27 = arith.constant dense<0.000000e+00> : vector<16x32xf32>
    %54 = tpu.matmul %51, %53, %cst_27 {dimension_numbers = #tpu.dot_dimension_numbers<[1], [0], [0], [1], [0, 0, 1, 1], [], []>} : vector<16x16xbf16>, vector<16x32xbf16>, vector<16x32xf32> -> vector<16x32xf32>
    %55 = arith.truncf %45 : vector<16x16xf32> to vector<16x16xbf16>
    %c0_28 = arith.constant 0 : index
    %c0_29 = arith.constant 0 : index
    %c0_30 = arith.constant 0 : index
    %56 = vector.load %arg6[%c0_28, %c0_29, %c0_30] : memref<1x16x128xbf16, #tpu.memory_space<vmem>>, vector<1x16x32xbf16>
    %57 = vector.shape_cast %56 : vector<1x16x32xbf16> to vector<16x32xbf16>
    %cst_31 = arith.constant dense<0.000000e+00> : vector<16x32xf32>
    %58 = tpu.matmul %55, %57, %cst_31 {dimension_numbers = #tpu.dot_dimension_numbers<[1], [0], [0], [1], [0, 0, 1, 1], [], []>} : vector<16x16xbf16>, vector<16x32xbf16>, vector<16x32xf32> -> vector<16x32xf32>
    %59 = arith.addf %54, %58 : vector<16x32xf32>
    %60 = tpu.reciprocal %50 {approx = true} : vector<16x1xf32> -> vector<16x1xf32>
    %61 = vector.broadcast %60 : vector<16x1xf32> to vector<16x32xf32>
    %62 = arith.mulf %59, %61 : vector<16x32xf32>
    %63 = arith.truncf %62 : vector<16x32xf32> to vector<16x32xbf16>
    %c0_32 = arith.constant 0 : index
    %c0_33 = arith.constant 0 : index
    %c0_34 = arith.constant 0 : index
    %64 = vector.load %arg9[%c0_32, %c0_33, %c0_34] : memref<1x16x128xbf16, #tpu.memory_space<vmem>>, vector<1x16x32xbf16>
    %65 = vector.shape_cast %64 : vector<1x16x32xbf16> to vector<16x32xbf16>
    %66 = vector.shape_cast %63 : vector<16x32xbf16> to vector<1x16x32xbf16>
    tpu.vector_store %arg9[%c0_32, %c0_33, %c0_34], %66 {strides = array<i32>} : memref<1x16x128xbf16, #tpu.memory_space<vmem>>, vector<1x16x32xbf16>,
    %c0_35 = arith.constant 0 : index
    %c0_36 = arith.constant 0 : index
    %c32 = arith.constant 32 : index
    %67 = vector.load %arg2[%c0_35, %c0_36, %c32] : memref<1x16x128xbf16, #tpu.memory_space<vmem>>, vector<1x16x32xbf16>
    %68 = vector.shape_cast %67 : vector<1x16x32xbf16> to vector<16x32xbf16>
    %c0_37 = arith.constant 0 : index
    %c0_38 = arith.constant 0 : index
    %c32_39 = arith.constant 32 : index
    %69 = vector.load %arg3[%c0_37, %c0_38, %c32_39] : memref<1x16x128xbf16, #tpu.memory_space<vmem>>, vector<1x16x32xbf16>
    %70 = vector.shape_cast %69 : vector<1x16x32xbf16> to vector<16x32xbf16>
    %cst_40 = arith.constant dense<0.000000e+00> : vector<16x16xf32>
    %71 = tpu.matmul %68, %70, %cst_40 {dimension_numbers = #tpu.dot_dimension_numbers<[1], [1], [0], [0], [0, 0, 1, 0], [], []>} : vector<16x32xbf16>, vector<16x32xbf16>, vector<16x16xf32> -> vector<16x16xf32>
    %cst_41 = arith.constant 0.176776692 : f32
    %72 = vector.broadcast %cst_41 : f32 to vector<16x16xf32>
    %73 = arith.mulf %71, %72 : vector<16x16xf32>
    %c0_42 = arith.constant 0 : index
    %c0_43 = arith.constant 0 : index
    %c32_44 = arith.constant 32 : index
    %74 = vector.load %arg5[%c0_42, %c0_43, %c32_44] : memref<1x16x128xbf16, #tpu.memory_space<vmem>>, vector<1x16x32xbf16>
    %75 = vector.shape_cast %74 : vector<1x16x32xbf16> to vector<16x32xbf16>
    %cst_45 = arith.constant dense<0.000000e+00> : vector<16x16xf32>
    %76 = tpu.matmul %68, %75, %cst_45 {dimension_numbers = #tpu.dot_dimension_numbers<[1], [1], [0], [0], [0, 0, 1, 0], [], []>} : vector<16x32xbf16>, vector<16x32xbf16>, vector<16x16xf32> -> vector<16x16xf32>
    %cst_46 = arith.constant 0.176776692 : f32
    %77 = vector.broadcast %cst_46 : f32 to vector<16x16xf32>
    %78 = arith.mulf %76, %77 : vector<16x16xf32>
    %cst_47 = arith.constant -1.000000e+30 : f32
    %79 = vector.broadcast %cst_47 : f32 to vector<16x16xf32>
    %80 = arith.select %5, %73, %79 : vector<16x16xi1>, vector<16x16xf32>
    %cst_48 = arith.constant -1.000000e+30 : f32
    %81 = vector.broadcast %cst_48 : f32 to vector<16x16xf32>
    %82 = arith.select %18, %78, %81 : vector<16x16xi1>, vector<16x16xf32>
    %cst_49 = arith.constant dense<0xFF800000> : vector<16xf32>
    %83 = vector.multi_reduction <maximumf>, %80, %cst_49 [1] : vector<16x16xf32> to vector<16xf32>
    %84 = vector.shape_cast %83 : vector<16xf32> to vector<16x1xf32>
    %cst_50 = arith.constant dense<0xFF800000> : vector<16xf32>
    %85 = vector.multi_reduction <maximumf>, %82, %cst_50 [1] : vector<16x16xf32> to vector<16xf32>
    %86 = vector.shape_cast %85 : vector<16xf32> to vector<16x1xf32>
    %87 = arith.maximumf %84, %86 : vector<16x1xf32>
    %88 = vector.broadcast %87 : vector<16x1xf32> to vector<16x16xf32>
    %89 = arith.subf %80, %88 : vector<16x16xf32>
    %90 = math.exp %89 : vector<16x16xf32>
    %91 = vector.broadcast %87 : vector<16x1xf32> to vector<16x16xf32>
    %92 = arith.subf %82, %91 : vector<16x16xf32>
    %93 = math.exp %92 : vector<16x16xf32>
    %cst_51 = arith.constant dense<0.000000e+00> : vector<16xf32>
    %94 = vector.multi_reduction <add>, %90, %cst_51 [1] : vector<16x16xf32> to vector<16xf32>
    %95 = vector.shape_cast %94 : vector<16xf32> to vector<16x1xf32>
    %cst_52 = arith.constant dense<0.000000e+00> : vector<16xf32>
    %96 = vector.multi_reduction <add>, %93, %cst_52 [1] : vector<16x16xf32> to vector<16xf32>
    %97 = vector.shape_cast %96 : vector<16xf32> to vector<16x1xf32>
    %98 = arith.addf %95, %97 : vector<16x1xf32>
    %99 = arith.truncf %90 : vector<16x16xf32> to vector<16x16xbf16>
    %c0_53 = arith.constant 0 : index
    %c0_54 = arith.constant 0 : index
    %c32_55 = arith.constant 32 : index
    %100 = vector.load %arg4[%c0_53, %c0_54, %c32_55] : memref<1x16x128xbf16, #tpu.memory_space<vmem>>, vector<1x16x32xbf16>
    %101 = vector.shape_cast %100 : vector<1x16x32xbf16> to vector<16x32xbf16>
    %cst_56 = arith.constant dense<0.000000e+00> : vector<16x32xf32>
    %102 = tpu.matmul %99, %101, %cst_56 {dimension_numbers = #tpu.dot_dimension_numbers<[1], [0], [0], [1], [0, 0, 1, 1], [], []>} : vector<16x16xbf16>, vector<16x32xbf16>, vector<16x32xf32> -> vector<16x32xf32>
    %103 = arith.truncf %93 : vector<16x16xf32> to vector<16x16xbf16>
    %c0_57 = arith.constant 0 : index
    %c0_58 = arith.constant 0 : index
    %c32_59 = arith.constant 32 : index
    %104 = vector.load %arg6[%c0_57, %c0_58, %c32_59] : memref<1x16x128xbf16, #tpu.memory_space<vmem>>, vector<1x16x32xbf16>
    %105 = vector.shape_cast %104 : vector<1x16x32xbf16> to vector<16x32xbf16>
    %cst_60 = arith.constant dense<0.000000e+00> : vector<16x32xf32>
    %106 = tpu.matmul %103, %105, %cst_60 {dimension_numbers = #tpu.dot_dimension_numbers<[1], [0], [0], [1], [0, 0, 1, 1], [], []>} : vector<16x16xbf16>, vector<16x32xbf16>, vector<16x32xf32> -> vector<16x32xf32>
    %107 = arith.addf %102, %106 : vector<16x32xf32>
    %108 = tpu.reciprocal %98 {approx = true} : vector<16x1xf32> -> vector<16x1xf32>
    %109 = vector.broadcast %108 : vector<16x1xf32> to vector<16x32xf32>
    %110 = arith.mulf %107, %109 : vector<16x32xf32>
    %111 = arith.truncf %110 : vector<16x32xf32> to vector<16x32xbf16>
    %c0_61 = arith.constant 0 : index
    %c0_62 = arith.constant 0 : index
    %c32_63 = arith.constant 32 : index
    %112 = vector.load %arg9[%c0_61, %c0_62, %c32_63] : memref<1x16x128xbf16, #tpu.memory_space<vmem>>, vector<1x16x32xbf16>
    %113 = vector.shape_cast %112 : vector<1x16x32xbf16> to vector<16x32xbf16>
    %114 = vector.shape_cast %111 : vector<16x32xbf16> to vector<1x16x32xbf16>
    tpu.vector_store %arg9[%c0_61, %c0_62, %c32_63], %114 {strides = array<i32>} : memref<1x16x128xbf16, #tpu.memory_space<vmem>>, vector<1x16x32xbf16>,
    %c0_64 = arith.constant 0 : index
    %c0_65 = arith.constant 0 : index
    %c64 = arith.constant 64 : index
    %115 = vector.load %arg2[%c0_64, %c0_65, %c64] : memref<1x16x128xbf16, #tpu.memory_space<vmem>>, vector<1x16x32xbf16>
    %116 = vector.shape_cast %115 : vector<1x16x32xbf16> to vector<16x32xbf16>
    %c0_66 = arith.constant 0 : index
    %c0_67 = arith.constant 0 : index
    %c64_68 = arith.constant 64 : index
    %117 = vector.load %arg3[%c0_66, %c0_67, %c64_68] : memref<1x16x128xbf16, #tpu.memory_space<vmem>>, vector<1x16x32xbf16>
    %118 = vector.shape_cast %117 : vector<1x16x32xbf16> to vector<16x32xbf16>
    %cst_69 = arith.constant dense<0.000000e+00> : vector<16x16xf32>
    %119 = tpu.matmul %116, %118, %cst_69 {dimension_numbers = #tpu.dot_dimension_numbers<[1], [1], [0], [0], [0, 0, 1, 0], [], []>} : vector<16x32xbf16>, vector<16x32xbf16>, vector<16x16xf32> -> vector<16x16xf32>
    %cst_70 = arith.constant 0.176776692 : f32
    %120 = vector.broadcast %cst_70 : f32 to vector<16x16xf32>
    %121 = arith.mulf %119, %120 : vector<16x16xf32>
    %c0_71 = arith.constant 0 : index
    %c0_72 = arith.constant 0 : index
    %c64_73 = arith.constant 64 : index
    %122 = vector.load %arg5[%c0_71, %c0_72, %c64_73] : memref<1x16x128xbf16, #tpu.memory_space<vmem>>, vector<1x16x32xbf16>
    %123 = vector.shape_cast %122 : vector<1x16x32xbf16> to vector<16x32xbf16>
    %cst_74 = arith.constant dense<0.000000e+00> : vector<16x16xf32>
    %124 = tpu.matmul %116, %123, %cst_74 {dimension_numbers = #tpu.dot_dimension_numbers<[1], [1], [0], [0], [0, 0, 1, 0], [], []>} : vector<16x32xbf16>, vector<16x32xbf16>, vector<16x16xf32> -> vector<16x16xf32>
    %cst_75 = arith.constant 0.176776692 : f32
    %125 = vector.broadcast %cst_75 : f32 to vector<16x16xf32>
    %126 = arith.mulf %124, %125 : vector<16x16xf32>
    %cst_76 = arith.constant -1.000000e+30 : f32
    %127 = vector.broadcast %cst_76 : f32 to vector<16x16xf32>
    %128 = arith.select %5, %121, %127 : vector<16x16xi1>, vector<16x16xf32>
    %cst_77 = arith.constant -1.000000e+30 : f32
    %129 = vector.broadcast %cst_77 : f32 to vector<16x16xf32>
    %130 = arith.select %18, %126, %129 : vector<16x16xi1>, vector<16x16xf32>
    %cst_78 = arith.constant dense<0xFF800000> : vector<16xf32>
    %131 = vector.multi_reduction <maximumf>, %128, %cst_78 [1] : vector<16x16xf32> to vector<16xf32>
    %132 = vector.shape_cast %131 : vector<16xf32> to vector<16x1xf32>
    %cst_79 = arith.constant dense<0xFF800000> : vector<16xf32>
    %133 = vector.multi_reduction <maximumf>, %130, %cst_79 [1] : vector<16x16xf32> to vector<16xf32>
    %134 = vector.shape_cast %133 : vector<16xf32> to vector<16x1xf32>
    %135 = arith.maximumf %132, %134 : vector<16x1xf32>
    %136 = vector.broadcast %135 : vector<16x1xf32> to vector<16x16xf32>
    %137 = arith.subf %128, %136 : vector<16x16xf32>
    %138 = math.exp %137 : vector<16x16xf32>
    %139 = vector.broadcast %135 : vector<16x1xf32> to vector<16x16xf32>
    %140 = arith.subf %130, %139 : vector<16x16xf32>
    %141 = math.exp %140 : vector<16x16xf32>
    %cst_80 = arith.constant dense<0.000000e+00> : vector<16xf32>
    %142 = vector.multi_reduction <add>, %138, %cst_80 [1] : vector<16x16xf32> to vector<16xf32>
    %143 = vector.shape_cast %142 : vector<16xf32> to vector<16x1xf32>
    %cst_81 = arith.constant dense<0.000000e+00> : vector<16xf32>
    %144 = vector.multi_reduction <add>, %141, %cst_81 [1] : vector<16x16xf32> to vector<16xf32>
    %145 = vector.shape_cast %144 : vector<16xf32> to vector<16x1xf32>
    %146 = arith.addf %143, %145 : vector<16x1xf32>
    %147 = arith.truncf %138 : vector<16x16xf32> to vector<16x16xbf16>
    %c0_82 = arith.constant 0 : index
    %c0_83 = arith.constant 0 : index
    %c64_84 = arith.constant 64 : index
    %148 = vector.load %arg4[%c0_82, %c0_83, %c64_84] : memref<1x16x128xbf16, #tpu.memory_space<vmem>>, vector<1x16x32xbf16>
    %149 = vector.shape_cast %148 : vector<1x16x32xbf16> to vector<16x32xbf16>
    %cst_85 = arith.constant dense<0.000000e+00> : vector<16x32xf32>
    %150 = tpu.matmul %147, %149, %cst_85 {dimension_numbers = #tpu.dot_dimension_numbers<[1], [0], [0], [1], [0, 0, 1, 1], [], []>} : vector<16x16xbf16>, vector<16x32xbf16>, vector<16x32xf32> -> vector<16x32xf32>
    %151 = arith.truncf %141 : vector<16x16xf32> to vector<16x16xbf16>
    %c0_86 = arith.constant 0 : index
    %c0_87 = arith.constant 0 : index
    %c64_88 = arith.constant 64 : index
    %152 = vector.load %arg6[%c0_86, %c0_87, %c64_88] : memref<1x16x128xbf16, #tpu.memory_space<vmem>>, vector<1x16x32xbf16>
    %153 = vector.shape_cast %152 : vector<1x16x32xbf16> to vector<16x32xbf16>
    %cst_89 = arith.constant dense<0.000000e+00> : vector<16x32xf32>
    %154 = tpu.matmul %151, %153, %cst_89 {dimension_numbers = #tpu.dot_dimension_numbers<[1], [0], [0], [1], [0, 0, 1, 1], [], []>} : vector<16x16xbf16>, vector<16x32xbf16>, vector<16x32xf32> -> vector<16x32xf32>
    %155 = arith.addf %150, %154 : vector<16x32xf32>
    %156 = tpu.reciprocal %146 {approx = true} : vector<16x1xf32> -> vector<16x1xf32>
    %157 = vector.broadcast %156 : vector<16x1xf32> to vector<16x32xf32>
    %158 = arith.mulf %155, %157 : vector<16x32xf32>
    %159 = arith.truncf %158 : vector<16x32xf32> to vector<16x32xbf16>
    %c0_90 = arith.constant 0 : index
    %c0_91 = arith.constant 0 : index
    %c64_92 = arith.constant 64 : index
    %160 = vector.load %arg9[%c0_90, %c0_91, %c64_92] : memref<1x16x128xbf16, #tpu.memory_space<vmem>>, vector<1x16x32xbf16>
    %161 = vector.shape_cast %160 : vector<1x16x32xbf16> to vector<16x32xbf16>
    %162 = vector.shape_cast %159 : vector<16x32xbf16> to vector<1x16x32xbf16>
    tpu.vector_store %arg9[%c0_90, %c0_91, %c64_92], %162 {strides = array<i32>} : memref<1x16x128xbf16, #tpu.memory_space<vmem>>, vector<1x16x32xbf16>,
    %c0_93 = arith.constant 0 : index
    %c0_94 = arith.constant 0 : index
    %c96 = arith.constant 96 : index
    %163 = vector.load %arg2[%c0_93, %c0_94, %c96] : memref<1x16x128xbf16, #tpu.memory_space<vmem>>, vector<1x16x32xbf16>
    %164 = vector.shape_cast %163 : vector<1x16x32xbf16> to vector<16x32xbf16>
    %c0_95 = arith.constant 0 : index
    %c0_96 = arith.constant 0 : index
    %c96_97 = arith.constant 96 : index
    %165 = vector.load %arg3[%c0_95, %c0_96, %c96_97] : memref<1x16x128xbf16, #tpu.memory_space<vmem>>, vector<1x16x32xbf16>
    %166 = vector.shape_cast %165 : vector<1x16x32xbf16> to vector<16x32xbf16>
    %cst_98 = arith.constant dense<0.000000e+00> : vector<16x16xf32>
    %167 = tpu.matmul %164, %166, %cst_98 {dimension_numbers = #tpu.dot_dimension_numbers<[1], [1], [0], [0], [0, 0, 1, 0], [], []>} : vector<16x32xbf16>, vector<16x32xbf16>, vector<16x16xf32> -> vector<16x16xf32>
    %cst_99 = arith.constant 0.176776692 : f32
    %168 = vector.broadcast %cst_99 : f32 to vector<16x16xf32>
    %169 = arith.mulf %167, %168 : vector<16x16xf32>
    %c0_100 = arith.constant 0 : index
    %c0_101 = arith.constant 0 : index
    %c96_102 = arith.constant 96 : index
    %170 = vector.load %arg5[%c0_100, %c0_101, %c96_102] : memref<1x16x128xbf16, #tpu.memory_space<vmem>>, vector<1x16x32xbf16>
    %171 = vector.shape_cast %170 : vector<1x16x32xbf16> to vector<16x32xbf16>
    %cst_103 = arith.constant dense<0.000000e+00> : vector<16x16xf32>
    %172 = tpu.matmul %164, %171, %cst_103 {dimension_numbers = #tpu.dot_dimension_numbers<[1], [1], [0], [0], [0, 0, 1, 0], [], []>} : vector<16x32xbf16>, vector<16x32xbf16>, vector<16x16xf32> -> vector<16x16xf32>
    %cst_104 = arith.constant 0.176776692 : f32
    %173 = vector.broadcast %cst_104 : f32 to vector<16x16xf32>
    %174 = arith.mulf %172, %173 : vector<16x16xf32>
    %cst_105 = arith.constant -1.000000e+30 : f32
    %175 = vector.broadcast %cst_105 : f32 to vector<16x16xf32>
    %176 = arith.select %5, %169, %175 : vector<16x16xi1>, vector<16x16xf32>
    %cst_106 = arith.constant -1.000000e+30 : f32
    %177 = vector.broadcast %cst_106 : f32 to vector<16x16xf32>
    %178 = arith.select %18, %174, %177 : vector<16x16xi1>, vector<16x16xf32>
    %cst_107 = arith.constant dense<0xFF800000> : vector<16xf32>
    %179 = vector.multi_reduction <maximumf>, %176, %cst_107 [1] : vector<16x16xf32> to vector<16xf32>
    %180 = vector.shape_cast %179 : vector<16xf32> to vector<16x1xf32>
    %cst_108 = arith.constant dense<0xFF800000> : vector<16xf32>
    %181 = vector.multi_reduction <maximumf>, %178, %cst_108 [1] : vector<16x16xf32> to vector<16xf32>
    %182 = vector.shape_cast %181 : vector<16xf32> to vector<16x1xf32>
    %183 = arith.maximumf %180, %182 : vector<16x1xf32>
    %184 = vector.broadcast %183 : vector<16x1xf32> to vector<16x16xf32>
    %185 = arith.subf %176, %184 : vector<16x16xf32>
    %186 = math.exp %185 : vector<16x16xf32>
    %187 = vector.broadcast %183 : vector<16x1xf32> to vector<16x16xf32>
    %188 = arith.subf %178, %187 : vector<16x16xf32>
    %189 = math.exp %188 : vector<16x16xf32>
    %cst_109 = arith.constant dense<0.000000e+00> : vector<16xf32>
    %190 = vector.multi_reduction <add>, %186, %cst_109 [1] : vector<16x16xf32> to vector<16xf32>
    %191 = vector.shape_cast %190 : vector<16xf32> to vector<16x1xf32>
    %cst_110 = arith.constant dense<0.000000e+00> : vector<16xf32>
    %192 = vector.multi_reduction <add>, %189, %cst_110 [1] : vector<16x16xf32> to vector<16xf32>
    %193 = vector.shape_cast %192 : vector<16xf32> to vector<16x1xf32>
    %194 = arith.addf %191, %193 : vector<16x1xf32>
    %195 = arith.truncf %186 : vector<16x16xf32> to vector<16x16xbf16>
    %c0_111 = arith.constant 0 : index
    %c0_112 = arith.constant 0 : index
    %c96_113 = arith.constant 96 : index
    %196 = vector.load %arg4[%c0_111, %c0_112, %c96_113] : memref<1x16x128xbf16, #tpu.memory_space<vmem>>, vector<1x16x32xbf16>
    %197 = vector.shape_cast %196 : vector<1x16x32xbf16> to vector<16x32xbf16>
    %cst_114 = arith.constant dense<0.000000e+00> : vector<16x32xf32>
    %198 = tpu.matmul %195, %197, %cst_114 {dimension_numbers = #tpu.dot_dimension_numbers<[1], [0], [0], [1], [0, 0, 1, 1], [], []>} : vector<16x16xbf16>, vector<16x32xbf16>, vector<16x32xf32> -> vector<16x32xf32>
    %199 = arith.truncf %189 : vector<16x16xf32> to vector<16x16xbf16>
    %c0_115 = arith.constant 0 : index
    %c0_116 = arith.constant 0 : index
    %c96_117 = arith.constant 96 : index
    %200 = vector.load %arg6[%c0_115, %c0_116, %c96_117] : memref<1x16x128xbf16, #tpu.memory_space<vmem>>, vector<1x16x32xbf16>
    %201 = vector.shape_cast %200 : vector<1x16x32xbf16> to vector<16x32xbf16>
    %cst_118 = arith.constant dense<0.000000e+00> : vector<16x32xf32>
    %202 = tpu.matmul %199, %201, %cst_118 {dimension_numbers = #tpu.dot_dimension_numbers<[1], [0], [0], [1], [0, 0, 1, 1], [], []>} : vector<16x16xbf16>, vector<16x32xbf16>, vector<16x32xf32> -> vector<16x32xf32>
    %203 = arith.addf %198, %202 : vector<16x32xf32>
    %204 = tpu.reciprocal %194 {approx = true} : vector<16x1xf32> -> vector<16x1xf32>
    %205 = vector.broadcast %204 : vector<16x1xf32> to vector<16x32xf32>
    %206 = arith.mulf %203, %205 : vector<16x32xf32>
    %207 = arith.truncf %206 : vector<16x32xf32> to vector<16x32xbf16>
    %c0_119 = arith.constant 0 : index
    %c0_120 = arith.constant 0 : index
    %c96_121 = arith.constant 96 : index
    %208 = vector.load %arg9[%c0_119, %c0_120, %c96_121] : memref<1x16x128xbf16, #tpu.memory_space<vmem>>, vector<1x16x32xbf16>
    %209 = vector.shape_cast %208 : vector<1x16x32xbf16> to vector<16x32xbf16>
    %210 = vector.shape_cast %207 : vector<16x32xbf16> to vector<1x16x32xbf16>
    tpu.vector_store %arg9[%c0_119, %c0_120, %c96_121], %210 {strides = array<i32>} : memref<1x16x128xbf16, #tpu.memory_space<vmem>>, vector<1x16x32xbf16>,
    return
  }
  func.func @transform_0(%arg0: i32, %arg1: i32) -> (i32, i32, i32) {
    %c0_i32 = arith.constant 0 : i32
    %c0_i32_0 = arith.constant 0 : i32
    return %arg0, %arg1, %c0_i32 : i32, i32, i32
  }
  func.func @transform_1(%arg0: i32, %arg1: i32) -> (i32, i32, i32) {
    %c0_i32 = arith.constant 0 : i32
    %c1_i32 = arith.constant 1 : i32
    %c0_i32_0 = arith.constant 0 : i32
    return %arg0, %c0_i32, %c1_i32 : i32, i32, i32
  }
  func.func @transform_2(%arg0: i32, %arg1: i32) -> (i32, i32, i32) {
    %c0_i32 = arith.constant 0 : i32
    %c2_i32 = arith.constant 2 : i32
    %c0_i32_0 = arith.constant 0 : i32
    return %arg0, %c0_i32, %c2_i32 : i32, i32, i32
  }
  func.func @transform_3(%arg0: i32, %arg1: i32) -> (i32, i32, i32) {
    %c0_i32 = arith.constant 0 : i32
    %c1_i32 = arith.constant 1 : i32
    %c0_i32_0 = arith.constant 0 : i32
    return %arg0, %c0_i32, %c1_i32 : i32, i32, i32
  }
  func.func @transform_4(%arg0: i32, %arg1: i32) -> (i32, i32, i32) {
    %c0_i32 = arith.constant 0 : i32
    %c2_i32 = arith.constant 2 : i32
    %c0_i32_0 = arith.constant 0 : i32
    return %arg0, %c0_i32, %c2_i32 : i32, i32, i32
  }
  func.func @transform_5(%arg0: i32, %arg1: i32) -> (i32, i32, i32) {
    %c0_i32 = arith.constant 0 : i32
    %c0_i32_0 = arith.constant 0 : i32
    %c0_i32_1 = arith.constant 0 : i32
    return %arg0, %c0_i32, %c0_i32_0 : i32, i32, i32
  }
  func.func @transform_6(%arg0: i32, %arg1: i32) -> (i32, i32, i32) {
    %c0_i32 = arith.constant 0 : i32
    %c0_i32_0 = arith.constant 0 : i32
    %c0_i32_1 = arith.constant 0 : i32
    return %arg0, %c0_i32, %c0_i32_0 : i32, i32, i32
  }
  func.func @transform_7(%arg0: i32, %arg1: i32) -> (i32, i32, i32) {
    %c0_i32 = arith.constant 0 : i32
    %c0_i32_0 = arith.constant 0 : i32
    return %arg0, %arg1, %c0_i32 : i32, i32, i32
  }
}

module attributes {stable_mosaic.version = 11 : i64} {
  func.func @_layernorm_kernel(%arg0: i32, %arg1: memref<32x128xf32, #tpu.memory_space<vmem>>, %arg2: memref<1x128xf32, #tpu.memory_space<vmem>>, %arg3: memref<1x128xf32, #tpu.memory_space<vmem>>, %arg4: memref<32x128xbf16, #tpu.memory_space<vmem>>) attributes {dimension_semantics = [#tpu.dimension_semantics<parallel>], iteration_bounds = array<i64: 1>, scalar_prefetch = 0 : i64, scratch_operands = 0 : i64, tpu.core_type = #tpu.core_type<tc>, window_params = [{transform_indices = @transform_0, window_bounds = array<i64: 32, 128>}, {pipeline_mode = #tpu.pipeline_mode<synchronous>, transform_indices = @transform_1, window_bounds = array<i64: 1, 128>}, {pipeline_mode = #tpu.pipeline_mode<synchronous>, transform_indices = @transform_2, window_bounds = array<i64: 1, 128>}, {transform_indices = @transform_3, window_bounds = array<i64: 32, 128>}]} {
    %c0 = arith.constant 0 : index
    %c0_0 = arith.constant 0 : index
    %0 = vector.load %arg1[%c0, %c0_0] : memref<32x128xf32, #tpu.memory_space<vmem>>, vector<32x128xf32>
    %cst = arith.constant dense<0.000000e+00> : vector<32xf32>
    %1 = vector.multi_reduction <add>, %0, %cst [1] : vector<32x128xf32> to vector<32xf32>
    %2 = vector.shape_cast %1 : vector<32xf32> to vector<32x1xf32>
    %cst_1 = arith.constant 1.280000e+02 : f32
    %3 = vector.broadcast %cst_1 : f32 to vector<32x1xf32>
    %4 = arith.divf %2, %3 : vector<32x1xf32>
    %5 = vector.broadcast %4 : vector<32x1xf32> to vector<32x128xf32>
    %6 = arith.subf %0, %5 : vector<32x128xf32>
    %7 = arith.mulf %6, %6 : vector<32x128xf32>
    %cst_2 = arith.constant dense<0.000000e+00> : vector<32xf32>
    %8 = vector.multi_reduction <add>, %7, %cst_2 [1] : vector<32x128xf32> to vector<32xf32>
    %9 = vector.shape_cast %8 : vector<32xf32> to vector<32x1xf32>
    %cst_3 = arith.constant 1.280000e+02 : f32
    %10 = vector.broadcast %cst_3 : f32 to vector<32x1xf32>
    %11 = arith.divf %9, %10 : vector<32x1xf32>
    %cst_4 = arith.constant 9.99999974E-6 : f32
    %12 = vector.broadcast %cst_4 : f32 to vector<32x1xf32>
    %13 = arith.addf %11, %12 : vector<32x1xf32>
    %14 = math.rsqrt %13 : vector<32x1xf32>
    %15 = vector.broadcast %14 : vector<32x1xf32> to vector<32x128xf32>
    %16 = arith.mulf %6, %15 : vector<32x128xf32>
    %c0_5 = arith.constant 0 : index
    %c0_6 = arith.constant 0 : index
    %17 = vector.load %arg2[%c0_5, %c0_6] : memref<1x128xf32, #tpu.memory_space<vmem>>, vector<1x128xf32>
    %18 = vector.broadcast %17 : vector<1x128xf32> to vector<32x128xf32>
    %19 = arith.mulf %16, %18 : vector<32x128xf32>
    %c0_7 = arith.constant 0 : index
    %c0_8 = arith.constant 0 : index
    %20 = vector.load %arg3[%c0_7, %c0_8] : memref<1x128xf32, #tpu.memory_space<vmem>>, vector<1x128xf32>
    %21 = vector.broadcast %20 : vector<1x128xf32> to vector<32x128xf32>
    %22 = arith.addf %19, %21 : vector<32x128xf32>
    %23 = arith.truncf %22 : vector<32x128xf32> to vector<32x128xbf16>
    %c0_9 = arith.constant 0 : index
    %c0_10 = arith.constant 0 : index
    %24 = vector.load %arg4[%c0_9, %c0_10] : memref<32x128xbf16, #tpu.memory_space<vmem>>, vector<32x128xbf16>
    tpu.vector_store %arg4[%c0_9, %c0_10], %23 {strides = array<i32>} : memref<32x128xbf16, #tpu.memory_space<vmem>>, vector<32x128xbf16>,
    return
  }
  func.func @transform_0(%arg0: i32) -> (i32, i32) {
    %c0_i32 = arith.constant 0 : i32
    %c0_i32_0 = arith.constant 0 : i32
    return %arg0, %c0_i32 : i32, i32
  }
  func.func @transform_1(%arg0: i32) -> (i32, i32) {
    %c0_i32 = arith.constant 0 : i32
    %c0_i32_0 = arith.constant 0 : i32
    %c0_i32_1 = arith.constant 0 : i32
    return %c0_i32, %c0_i32_0 : i32, i32
  }
  func.func @transform_2(%arg0: i32) -> (i32, i32) {
    %c0_i32 = arith.constant 0 : i32
    %c0_i32_0 = arith.constant 0 : i32
    %c0_i32_1 = arith.constant 0 : i32
    return %c0_i32, %c0_i32_0 : i32, i32
  }
  func.func @transform_3(%arg0: i32) -> (i32, i32) {
    %c0_i32 = arith.constant 0 : i32
    %c0_i32_0 = arith.constant 0 : i32
    return %arg0, %c0_i32 : i32, i32
  }
}

module attributes {stable_mosaic.version = 11 : i64} {
  func.func @_linear_res_ln_kernel(%arg0: i32, %arg1: i32, %arg2: memref<32x128xbf16, #tpu.memory_space<vmem>>, %arg3: memref<128x128xbf16, #tpu.memory_space<vmem>>, %arg4: memref<1x128xf32, #tpu.memory_space<vmem>>, %arg5: memref<32x128xbf16, #tpu.memory_space<vmem>>, %arg6: memref<1x128xf32, #tpu.memory_space<vmem>>, %arg7: memref<1x128xf32, #tpu.memory_space<vmem>>, %arg8: memref<32x128xbf16, #tpu.memory_space<vmem>>, %arg9: memref<32x128xf32, #tpu.memory_space<vmem>>) attributes {dimension_semantics = [#tpu.dimension_semantics<parallel>, #tpu.dimension_semantics<arbitrary>], iteration_bounds = array<i64: 1, 1>, scalar_prefetch = 0 : i64, scratch_operands = 1 : i64, tpu.core_type = #tpu.core_type<tc>, window_params = [{transform_indices = @transform_0, window_bounds = array<i64: 32, 128>}, {transform_indices = @transform_1, window_bounds = array<i64: 128, 128>}, {pipeline_mode = #tpu.pipeline_mode<synchronous>, transform_indices = @transform_2, window_bounds = array<i64: 1, 128>}, {transform_indices = @transform_3, window_bounds = array<i64: 32, 128>}, {pipeline_mode = #tpu.pipeline_mode<synchronous>, transform_indices = @transform_4, window_bounds = array<i64: 1, 128>}, {pipeline_mode = #tpu.pipeline_mode<synchronous>, transform_indices = @transform_5, window_bounds = array<i64: 1, 128>}, {transform_indices = @transform_6, window_bounds = array<i64: 32, 128>}]} {
    %c0_i32 = arith.constant 0 : i32
    %0 = arith.cmpi eq, %arg1, %c0_i32 : i32
    %1 = arith.extui %0 : i1 to i32
    %c0_i32_0 = arith.constant 0 : i32
    %2 = arith.cmpi ne, %1, %c0_i32_0 : i32
    scf.if %2 {
      %cst_10 = arith.constant 0.000000e+00 : f32
      %12 = vector.broadcast %cst_10 : f32 to vector<32x128xf32>
      %c0_11 = arith.constant 0 : index
      %c0_12 = arith.constant 0 : index
      %13 = vector.load %arg9[%c0_11, %c0_12] : memref<32x128xf32, #tpu.memory_space<vmem>>, vector<32x128xf32>
      tpu.vector_store %arg9[%c0_11, %c0_12], %12 {strides = array<i32>} : memref<32x128xf32, #tpu.memory_space<vmem>>, vector<32x128xf32>,
    } else {
    }
    %c0 = arith.constant 0 : index
    %c0_1 = arith.constant 0 : index
    %3 = vector.load %arg9[%c0, %c0_1] : memref<32x128xf32, #tpu.memory_space<vmem>>, vector<32x128xf32>
    %c0_2 = arith.constant 0 : index
    %c0_3 = arith.constant 0 : index
    %4 = vector.load %arg2[%c0_2, %c0_3] : memref<32x128xbf16, #tpu.memory_space<vmem>>, vector<32x128xbf16>
    %c0_4 = arith.constant 0 : index
    %c0_5 = arith.constant 0 : index
    %5 = vector.load %arg3[%c0_4, %c0_5] : memref<128x128xbf16, #tpu.memory_space<vmem>>, vector<128x128xbf16>
    %cst = arith.constant dense<0.000000e+00> : vector<32x128xf32>
    %6 = tpu.matmul %4, %5, %cst {dimension_numbers = #tpu.dot_dimension_numbers<[1], [1], [0], [0], [0, 0, 1, 0], [], []>} : vector<32x128xbf16>, vector<128x128xbf16>, vector<32x128xf32> -> vector<32x128xf32>
    %7 = arith.addf %3, %6 : vector<32x128xf32>
    %c0_6 = arith.constant 0 : index
    %c0_7 = arith.constant 0 : index
    %8 = vector.load %arg9[%c0_6, %c0_7] : memref<32x128xf32, #tpu.memory_space<vmem>>, vector<32x128xf32>
    tpu.vector_store %arg9[%c0_6, %c0_7], %7 {strides = array<i32>} : memref<32x128xf32, #tpu.memory_space<vmem>>, vector<32x128xf32>,
    %c0_i32_8 = arith.constant 0 : i32
    %9 = arith.cmpi eq, %arg1, %c0_i32_8 : i32
    %10 = arith.extui %9 : i1 to i32
    %c0_i32_9 = arith.constant 0 : i32
    %11 = arith.cmpi ne, %10, %c0_i32_9 : i32
    scf.if %11 {
      %c0_10 = arith.constant 0 : index
      %c0_11 = arith.constant 0 : index
      %12 = vector.load %arg9[%c0_10, %c0_11] : memref<32x128xf32, #tpu.memory_space<vmem>>, vector<32x128xf32>
      %c0_12 = arith.constant 0 : index
      %c0_13 = arith.constant 0 : index
      %13 = vector.load %arg4[%c0_12, %c0_13] : memref<1x128xf32, #tpu.memory_space<vmem>>, vector<1x128xf32>
      %14 = vector.broadcast %13 : vector<1x128xf32> to vector<32x128xf32>
      %15 = arith.addf %12, %14 : vector<32x128xf32>
      %c0_14 = arith.constant 0 : index
      %c0_15 = arith.constant 0 : index
      %16 = vector.load %arg5[%c0_14, %c0_15] : memref<32x128xbf16, #tpu.memory_space<vmem>>, vector<32x128xbf16>
      %17 = arith.extf %16 : vector<32x128xbf16> to vector<32x128xf32>
      %18 = arith.addf %15, %17 : vector<32x128xf32>
      %cst_16 = arith.constant dense<0.000000e+00> : vector<32xf32>
      %19 = vector.multi_reduction <add>, %18, %cst_16 [1] : vector<32x128xf32> to vector<32xf32>
      %20 = vector.shape_cast %19 : vector<32xf32> to vector<32x1xf32>
      %cst_17 = arith.constant 1.280000e+02 : f32
      %21 = vector.broadcast %cst_17 : f32 to vector<32x1xf32>
      %22 = arith.divf %20, %21 : vector<32x1xf32>
      %23 = vector.broadcast %22 : vector<32x1xf32> to vector<32x128xf32>
      %24 = arith.subf %18, %23 : vector<32x128xf32>
      %25 = arith.mulf %24, %24 : vector<32x128xf32>
      %cst_18 = arith.constant dense<0.000000e+00> : vector<32xf32>
      %26 = vector.multi_reduction <add>, %25, %cst_18 [1] : vector<32x128xf32> to vector<32xf32>
      %27 = vector.shape_cast %26 : vector<32xf32> to vector<32x1xf32>
      %cst_19 = arith.constant 1.280000e+02 : f32
      %28 = vector.broadcast %cst_19 : f32 to vector<32x1xf32>
      %29 = arith.divf %27, %28 : vector<32x1xf32>
      %cst_20 = arith.constant 9.99999974E-6 : f32
      %30 = vector.broadcast %cst_20 : f32 to vector<32x1xf32>
      %31 = arith.addf %29, %30 : vector<32x1xf32>
      %32 = math.rsqrt %31 : vector<32x1xf32>
      %33 = vector.broadcast %32 : vector<32x1xf32> to vector<32x128xf32>
      %34 = arith.mulf %24, %33 : vector<32x128xf32>
      %c0_21 = arith.constant 0 : index
      %c0_22 = arith.constant 0 : index
      %35 = vector.load %arg6[%c0_21, %c0_22] : memref<1x128xf32, #tpu.memory_space<vmem>>, vector<1x128xf32>
      %36 = vector.broadcast %35 : vector<1x128xf32> to vector<32x128xf32>
      %37 = arith.mulf %34, %36 : vector<32x128xf32>
      %c0_23 = arith.constant 0 : index
      %c0_24 = arith.constant 0 : index
      %38 = vector.load %arg7[%c0_23, %c0_24] : memref<1x128xf32, #tpu.memory_space<vmem>>, vector<1x128xf32>
      %39 = vector.broadcast %38 : vector<1x128xf32> to vector<32x128xf32>
      %40 = arith.addf %37, %39 : vector<32x128xf32>
      %41 = arith.truncf %40 : vector<32x128xf32> to vector<32x128xbf16>
      %c0_25 = arith.constant 0 : index
      %c0_26 = arith.constant 0 : index
      %42 = vector.load %arg8[%c0_25, %c0_26] : memref<32x128xbf16, #tpu.memory_space<vmem>>, vector<32x128xbf16>
      tpu.vector_store %arg8[%c0_25, %c0_26], %41 {strides = array<i32>} : memref<32x128xbf16, #tpu.memory_space<vmem>>, vector<32x128xbf16>,
    } else {
    }
    return
  }
  func.func @transform_0(%arg0: i32, %arg1: i32) -> (i32, i32) {
    %c0_i32 = arith.constant 0 : i32
    return %arg0, %arg1 : i32, i32
  }
  func.func @transform_1(%arg0: i32, %arg1: i32) -> (i32, i32) {
    %c0_i32 = arith.constant 0 : i32
    %c0_i32_0 = arith.constant 0 : i32
    return %c0_i32, %arg1 : i32, i32
  }
  func.func @transform_2(%arg0: i32, %arg1: i32) -> (i32, i32) {
    %c0_i32 = arith.constant 0 : i32
    %c0_i32_0 = arith.constant 0 : i32
    %c0_i32_1 = arith.constant 0 : i32
    return %c0_i32, %c0_i32_0 : i32, i32
  }
  func.func @transform_3(%arg0: i32, %arg1: i32) -> (i32, i32) {
    %c0_i32 = arith.constant 0 : i32
    %c0_i32_0 = arith.constant 0 : i32
    return %arg0, %c0_i32 : i32, i32
  }
  func.func @transform_4(%arg0: i32, %arg1: i32) -> (i32, i32) {
    %c0_i32 = arith.constant 0 : i32
    %c0_i32_0 = arith.constant 0 : i32
    %c0_i32_1 = arith.constant 0 : i32
    return %c0_i32, %c0_i32_0 : i32, i32
  }
  func.func @transform_5(%arg0: i32, %arg1: i32) -> (i32, i32) {
    %c0_i32 = arith.constant 0 : i32
    %c0_i32_0 = arith.constant 0 : i32
    %c0_i32_1 = arith.constant 0 : i32
    return %c0_i32, %c0_i32_0 : i32, i32
  }
  func.func @transform_6(%arg0: i32, %arg1: i32) -> (i32, i32) {
    %c0_i32 = arith.constant 0 : i32
    %c0_i32_0 = arith.constant 0 : i32
    return %arg0, %c0_i32 : i32, i32
  }
}

module attributes {stable_mosaic.version = 11 : i64} {
  func.func @_linear_kernel(%arg0: i32, %arg1: i32, %arg2: i32, %arg3: memref<32x128xbf16, #tpu.memory_space<vmem>>, %arg4: memref<256x128xbf16, #tpu.memory_space<vmem>>, %arg5: memref<1x256xf32, #tpu.memory_space<vmem>>, %arg6: memref<32x256xbf16, #tpu.memory_space<vmem>>, %arg7: memref<32x256xf32, #tpu.memory_space<vmem>>) attributes {dimension_semantics = [#tpu.dimension_semantics<parallel>, #tpu.dimension_semantics<parallel>, #tpu.dimension_semantics<arbitrary>], iteration_bounds = array<i64: 1, 1, 1>, scalar_prefetch = 0 : i64, scratch_operands = 1 : i64, tpu.core_type = #tpu.core_type<tc>, window_params = [{transform_indices = @transform_0, window_bounds = array<i64: 32, 128>}, {transform_indices = @transform_1, window_bounds = array<i64: 256, 128>}, {transform_indices = @transform_2, window_bounds = array<i64: 1, 256>}, {transform_indices = @transform_3, window_bounds = array<i64: 32, 256>}]} {
    %c0_i32 = arith.constant 0 : i32
    %0 = arith.cmpi eq, %arg2, %c0_i32 : i32
    %1 = arith.extui %0 : i1 to i32
    %c0_i32_0 = arith.constant 0 : i32
    %2 = arith.cmpi ne, %1, %c0_i32_0 : i32
    scf.if %2 {
      %cst_10 = arith.constant 0.000000e+00 : f32
      %12 = vector.broadcast %cst_10 : f32 to vector<32x256xf32>
      %c0_11 = arith.constant 0 : index
      %c0_12 = arith.constant 0 : index
      %13 = vector.load %arg7[%c0_11, %c0_12] : memref<32x256xf32, #tpu.memory_space<vmem>>, vector<32x256xf32>
      tpu.vector_store %arg7[%c0_11, %c0_12], %12 {strides = array<i32>} : memref<32x256xf32, #tpu.memory_space<vmem>>, vector<32x256xf32>,
    } else {
    }
    %c0 = arith.constant 0 : index
    %c0_1 = arith.constant 0 : index
    %3 = vector.load %arg7[%c0, %c0_1] : memref<32x256xf32, #tpu.memory_space<vmem>>, vector<32x256xf32>
    %c0_2 = arith.constant 0 : index
    %c0_3 = arith.constant 0 : index
    %4 = vector.load %arg3[%c0_2, %c0_3] : memref<32x128xbf16, #tpu.memory_space<vmem>>, vector<32x128xbf16>
    %c0_4 = arith.constant 0 : index
    %c0_5 = arith.constant 0 : index
    %5 = vector.load %arg4[%c0_4, %c0_5] : memref<256x128xbf16, #tpu.memory_space<vmem>>, vector<256x128xbf16>
    %cst = arith.constant dense<0.000000e+00> : vector<32x256xf32>
    %6 = tpu.matmul %4, %5, %cst {dimension_numbers = #tpu.dot_dimension_numbers<[1], [1], [0], [0], [0, 0, 1, 0], [], []>} : vector<32x128xbf16>, vector<256x128xbf16>, vector<32x256xf32> -> vector<32x256xf32>
    %7 = arith.addf %3, %6 : vector<32x256xf32>
    %c0_6 = arith.constant 0 : index
    %c0_7 = arith.constant 0 : index
    %8 = vector.load %arg7[%c0_6, %c0_7] : memref<32x256xf32, #tpu.memory_space<vmem>>, vector<32x256xf32>
    tpu.vector_store %arg7[%c0_6, %c0_7], %7 {strides = array<i32>} : memref<32x256xf32, #tpu.memory_space<vmem>>, vector<32x256xf32>,
    %c0_i32_8 = arith.constant 0 : i32
    %9 = arith.cmpi eq, %arg2, %c0_i32_8 : i32
    %10 = arith.extui %9 : i1 to i32
    %c0_i32_9 = arith.constant 0 : i32
    %11 = arith.cmpi ne, %10, %c0_i32_9 : i32
    scf.if %11 {
      %c0_10 = arith.constant 0 : index
      %c0_11 = arith.constant 0 : index
      %12 = vector.load %arg7[%c0_10, %c0_11] : memref<32x256xf32, #tpu.memory_space<vmem>>, vector<32x256xf32>
      %c0_12 = arith.constant 0 : index
      %c0_13 = arith.constant 0 : index
      %13 = vector.load %arg5[%c0_12, %c0_13] : memref<1x256xf32, #tpu.memory_space<vmem>>, vector<1x256xf32>
      %14 = vector.broadcast %13 : vector<1x256xf32> to vector<32x256xf32>
      %15 = arith.addf %12, %14 : vector<32x256xf32>
      %16 = arith.mulf %15, %15 : vector<32x256xf32>
      %17 = arith.mulf %15, %16 : vector<32x256xf32>
      %cst_14 = arith.constant 4.471500e-02 : f32
      %18 = vector.broadcast %cst_14 : f32 to vector<32x256xf32>
      %19 = arith.mulf %18, %17 : vector<32x256xf32>
      %20 = arith.addf %15, %19 : vector<32x256xf32>
      %cst_15 = arith.constant 0.797884583 : f32
      %21 = vector.broadcast %cst_15 : f32 to vector<32x256xf32>
      %22 = arith.mulf %21, %20 : vector<32x256xf32>
      %23 = math.tanh %22 : vector<32x256xf32>
      %cst_16 = arith.constant 1.000000e+00 : f32
      %24 = vector.broadcast %cst_16 : f32 to vector<32x256xf32>
      %25 = arith.addf %24, %23 : vector<32x256xf32>
      %cst_17 = arith.constant 5.000000e-01 : f32
      %26 = vector.broadcast %cst_17 : f32 to vector<32x256xf32>
      %27 = arith.mulf %26, %25 : vector<32x256xf32>
      %28 = arith.mulf %15, %27 : vector<32x256xf32>
      %29 = arith.truncf %28 : vector<32x256xf32> to vector<32x256xbf16>
      %c0_18 = arith.constant 0 : index
      %c0_19 = arith.constant 0 : index
      %30 = vector.load %arg6[%c0_18, %c0_19] : memref<32x256xbf16, #tpu.memory_space<vmem>>, vector<32x256xbf16>
      tpu.vector_store %arg6[%c0_18, %c0_19], %29 {strides = array<i32>} : memref<32x256xbf16, #tpu.memory_space<vmem>>, vector<32x256xbf16>,
    } else {
    }
    return
  }
  func.func @transform_0(%arg0: i32, %arg1: i32, %arg2: i32) -> (i32, i32) {
    %c0_i32 = arith.constant 0 : i32
    return %arg0, %arg2 : i32, i32
  }
  func.func @transform_1(%arg0: i32, %arg1: i32, %arg2: i32) -> (i32, i32) {
    %c0_i32 = arith.constant 0 : i32
    return %arg1, %arg2 : i32, i32
  }
  func.func @transform_2(%arg0: i32, %arg1: i32, %arg2: i32) -> (i32, i32) {
    %c0_i32 = arith.constant 0 : i32
    %c0_i32_0 = arith.constant 0 : i32
    return %c0_i32, %arg1 : i32, i32
  }
  func.func @transform_3(%arg0: i32, %arg1: i32, %arg2: i32) -> (i32, i32) {
    %c0_i32 = arith.constant 0 : i32
    return %arg0, %arg1 : i32, i32
  }
}

module attributes {stable_mosaic.version = 11 : i64} {
  func.func @_linear_res_ln_kernel(%arg0: i32, %arg1: i32, %arg2: memref<32x256xbf16, #tpu.memory_space<vmem>>, %arg3: memref<128x256xbf16, #tpu.memory_space<vmem>>, %arg4: memref<1x128xf32, #tpu.memory_space<vmem>>, %arg5: memref<32x128xbf16, #tpu.memory_space<vmem>>, %arg6: memref<1x128xf32, #tpu.memory_space<vmem>>, %arg7: memref<1x128xf32, #tpu.memory_space<vmem>>, %arg8: memref<32x128xbf16, #tpu.memory_space<vmem>>, %arg9: memref<32x128xf32, #tpu.memory_space<vmem>>) attributes {dimension_semantics = [#tpu.dimension_semantics<parallel>, #tpu.dimension_semantics<arbitrary>], iteration_bounds = array<i64: 1, 1>, scalar_prefetch = 0 : i64, scratch_operands = 1 : i64, tpu.core_type = #tpu.core_type<tc>, window_params = [{transform_indices = @transform_0, window_bounds = array<i64: 32, 256>}, {transform_indices = @transform_1, window_bounds = array<i64: 128, 256>}, {pipeline_mode = #tpu.pipeline_mode<synchronous>, transform_indices = @transform_2, window_bounds = array<i64: 1, 128>}, {transform_indices = @transform_3, window_bounds = array<i64: 32, 128>}, {pipeline_mode = #tpu.pipeline_mode<synchronous>, transform_indices = @transform_4, window_bounds = array<i64: 1, 128>}, {pipeline_mode = #tpu.pipeline_mode<synchronous>, transform_indices = @transform_5, window_bounds = array<i64: 1, 128>}, {transform_indices = @transform_6, window_bounds = array<i64: 32, 128>}]} {
    %c0_i32 = arith.constant 0 : i32
    %0 = arith.cmpi eq, %arg1, %c0_i32 : i32
    %1 = arith.extui %0 : i1 to i32
    %c0_i32_0 = arith.constant 0 : i32
    %2 = arith.cmpi ne, %1, %c0_i32_0 : i32
    scf.if %2 {
      %cst_10 = arith.constant 0.000000e+00 : f32
      %12 = vector.broadcast %cst_10 : f32 to vector<32x128xf32>
      %c0_11 = arith.constant 0 : index
      %c0_12 = arith.constant 0 : index
      %13 = vector.load %arg9[%c0_11, %c0_12] : memref<32x128xf32, #tpu.memory_space<vmem>>, vector<32x128xf32>
      tpu.vector_store %arg9[%c0_11, %c0_12], %12 {strides = array<i32>} : memref<32x128xf32, #tpu.memory_space<vmem>>, vector<32x128xf32>,
    } else {
    }
    %c0 = arith.constant 0 : index
    %c0_1 = arith.constant 0 : index
    %3 = vector.load %arg9[%c0, %c0_1] : memref<32x128xf32, #tpu.memory_space<vmem>>, vector<32x128xf32>
    %c0_2 = arith.constant 0 : index
    %c0_3 = arith.constant 0 : index
    %4 = vector.load %arg2[%c0_2, %c0_3] : memref<32x256xbf16, #tpu.memory_space<vmem>>, vector<32x256xbf16>
    %c0_4 = arith.constant 0 : index
    %c0_5 = arith.constant 0 : index
    %5 = vector.load %arg3[%c0_4, %c0_5] : memref<128x256xbf16, #tpu.memory_space<vmem>>, vector<128x256xbf16>
    %cst = arith.constant dense<0.000000e+00> : vector<32x128xf32>
    %6 = tpu.matmul %4, %5, %cst {dimension_numbers = #tpu.dot_dimension_numbers<[1], [1], [0], [0], [0, 0, 1, 0], [], []>} : vector<32x256xbf16>, vector<128x256xbf16>, vector<32x128xf32> -> vector<32x128xf32>
    %7 = arith.addf %3, %6 : vector<32x128xf32>
    %c0_6 = arith.constant 0 : index
    %c0_7 = arith.constant 0 : index
    %8 = vector.load %arg9[%c0_6, %c0_7] : memref<32x128xf32, #tpu.memory_space<vmem>>, vector<32x128xf32>
    tpu.vector_store %arg9[%c0_6, %c0_7], %7 {strides = array<i32>} : memref<32x128xf32, #tpu.memory_space<vmem>>, vector<32x128xf32>,
    %c0_i32_8 = arith.constant 0 : i32
    %9 = arith.cmpi eq, %arg1, %c0_i32_8 : i32
    %10 = arith.extui %9 : i1 to i32
    %c0_i32_9 = arith.constant 0 : i32
    %11 = arith.cmpi ne, %10, %c0_i32_9 : i32
    scf.if %11 {
      %c0_10 = arith.constant 0 : index
      %c0_11 = arith.constant 0 : index
      %12 = vector.load %arg9[%c0_10, %c0_11] : memref<32x128xf32, #tpu.memory_space<vmem>>, vector<32x128xf32>
      %c0_12 = arith.constant 0 : index
      %c0_13 = arith.constant 0 : index
      %13 = vector.load %arg4[%c0_12, %c0_13] : memref<1x128xf32, #tpu.memory_space<vmem>>, vector<1x128xf32>
      %14 = vector.broadcast %13 : vector<1x128xf32> to vector<32x128xf32>
      %15 = arith.addf %12, %14 : vector<32x128xf32>
      %c0_14 = arith.constant 0 : index
      %c0_15 = arith.constant 0 : index
      %16 = vector.load %arg5[%c0_14, %c0_15] : memref<32x128xbf16, #tpu.memory_space<vmem>>, vector<32x128xbf16>
      %17 = arith.extf %16 : vector<32x128xbf16> to vector<32x128xf32>
      %18 = arith.addf %15, %17 : vector<32x128xf32>
      %cst_16 = arith.constant dense<0.000000e+00> : vector<32xf32>
      %19 = vector.multi_reduction <add>, %18, %cst_16 [1] : vector<32x128xf32> to vector<32xf32>
      %20 = vector.shape_cast %19 : vector<32xf32> to vector<32x1xf32>
      %cst_17 = arith.constant 1.280000e+02 : f32
      %21 = vector.broadcast %cst_17 : f32 to vector<32x1xf32>
      %22 = arith.divf %20, %21 : vector<32x1xf32>
      %23 = vector.broadcast %22 : vector<32x1xf32> to vector<32x128xf32>
      %24 = arith.subf %18, %23 : vector<32x128xf32>
      %25 = arith.mulf %24, %24 : vector<32x128xf32>
      %cst_18 = arith.constant dense<0.000000e+00> : vector<32xf32>
      %26 = vector.multi_reduction <add>, %25, %cst_18 [1] : vector<32x128xf32> to vector<32xf32>
      %27 = vector.shape_cast %26 : vector<32xf32> to vector<32x1xf32>
      %cst_19 = arith.constant 1.280000e+02 : f32
      %28 = vector.broadcast %cst_19 : f32 to vector<32x1xf32>
      %29 = arith.divf %27, %28 : vector<32x1xf32>
      %cst_20 = arith.constant 9.99999974E-6 : f32
      %30 = vector.broadcast %cst_20 : f32 to vector<32x1xf32>
      %31 = arith.addf %29, %30 : vector<32x1xf32>
      %32 = math.rsqrt %31 : vector<32x1xf32>
      %33 = vector.broadcast %32 : vector<32x1xf32> to vector<32x128xf32>
      %34 = arith.mulf %24, %33 : vector<32x128xf32>
      %c0_21 = arith.constant 0 : index
      %c0_22 = arith.constant 0 : index
      %35 = vector.load %arg6[%c0_21, %c0_22] : memref<1x128xf32, #tpu.memory_space<vmem>>, vector<1x128xf32>
      %36 = vector.broadcast %35 : vector<1x128xf32> to vector<32x128xf32>
      %37 = arith.mulf %34, %36 : vector<32x128xf32>
      %c0_23 = arith.constant 0 : index
      %c0_24 = arith.constant 0 : index
      %38 = vector.load %arg7[%c0_23, %c0_24] : memref<1x128xf32, #tpu.memory_space<vmem>>, vector<1x128xf32>
      %39 = vector.broadcast %38 : vector<1x128xf32> to vector<32x128xf32>
      %40 = arith.addf %37, %39 : vector<32x128xf32>
      %41 = arith.truncf %40 : vector<32x128xf32> to vector<32x128xbf16>
      %c0_25 = arith.constant 0 : index
      %c0_26 = arith.constant 0 : index
      %42 = vector.load %arg8[%c0_25, %c0_26] : memref<32x128xbf16, #tpu.memory_space<vmem>>, vector<32x128xbf16>
      tpu.vector_store %arg8[%c0_25, %c0_26], %41 {strides = array<i32>} : memref<32x128xbf16, #tpu.memory_space<vmem>>, vector<32x128xbf16>,
    } else {
    }
    return
  }
  func.func @transform_0(%arg0: i32, %arg1: i32) -> (i32, i32) {
    %c0_i32 = arith.constant 0 : i32
    return %arg0, %arg1 : i32, i32
  }
  func.func @transform_1(%arg0: i32, %arg1: i32) -> (i32, i32) {
    %c0_i32 = arith.constant 0 : i32
    %c0_i32_0 = arith.constant 0 : i32
    return %c0_i32, %arg1 : i32, i32
  }
  func.func @transform_2(%arg0: i32, %arg1: i32) -> (i32, i32) {
    %c0_i32 = arith.constant 0 : i32
    %c0_i32_0 = arith.constant 0 : i32
    %c0_i32_1 = arith.constant 0 : i32
    return %c0_i32, %c0_i32_0 : i32, i32
  }
  func.func @transform_3(%arg0: i32, %arg1: i32) -> (i32, i32) {
    %c0_i32 = arith.constant 0 : i32
    %c0_i32_0 = arith.constant 0 : i32
    return %arg0, %c0_i32 : i32, i32
  }
  func.func @transform_4(%arg0: i32, %arg1: i32) -> (i32, i32) {
    %c0_i32 = arith.constant 0 : i32
    %c0_i32_0 = arith.constant 0 : i32
    %c0_i32_1 = arith.constant 0 : i32
    return %c0_i32, %c0_i32_0 : i32, i32
  }
  func.func @transform_5(%arg0: i32, %arg1: i32) -> (i32, i32) {
    %c0_i32 = arith.constant 0 : i32
    %c0_i32_0 = arith.constant 0 : i32
    %c0_i32_1 = arith.constant 0 : i32
    return %c0_i32, %c0_i32_0 : i32, i32
  }
  func.func @transform_6(%arg0: i32, %arg1: i32) -> (i32, i32) {
    %c0_i32 = arith.constant 0 : i32
    %c0_i32_0 = arith.constant 0 : i32
    return %arg0, %c0_i32 : i32, i32
  }
}

module attributes {stable_mosaic.version = 11 : i64} {
  func.func @_mha_self_kernel(%arg0: i32, %arg1: i32, %arg2: memref<1x16x128xbf16, #tpu.memory_space<vmem>>, %arg3: memref<1x16x128xbf16, #tpu.memory_space<vmem>>, %arg4: memref<1x16x128xbf16, #tpu.memory_space<vmem>>, %arg5: memref<1x1x16xi32, #tpu.memory_space<vmem>>, %arg6: memref<1x16x128xbf16, #tpu.memory_space<vmem>>) attributes {dimension_semantics = [#tpu.dimension_semantics<parallel>, #tpu.dimension_semantics<parallel>], iteration_bounds = array<i64: 2, 1>, scalar_prefetch = 0 : i64, scratch_operands = 0 : i64, tpu.core_type = #tpu.core_type<tc>, window_params = [{transform_indices = @transform_0, window_bounds = array<i64: 1, 16, 128>}, {transform_indices = @transform_1, window_bounds = array<i64: 1, 16, 128>}, {transform_indices = @transform_2, window_bounds = array<i64: 1, 16, 128>}, {transform_indices = @transform_3, window_bounds = array<i64: 1, 1, 16>}, {transform_indices = @transform_4, window_bounds = array<i64: 1, 16, 128>}]} {
    %c0 = arith.constant 0 : index
    %c0_0 = arith.constant 0 : index
    %c0_1 = arith.constant 0 : index
    %0 = vector.load %arg5[%c0, %c0_0, %c0_1] : memref<1x1x16xi32, #tpu.memory_space<vmem>>, vector<1x1x16xi32>
    %1 = vector.shape_cast %0 : vector<1x1x16xi32> to vector<1x16xi32>
    %c0_i32 = arith.constant 0 : i32
    %2 = vector.broadcast %c0_i32 : i32 to vector<1x16xi32>
    %3 = arith.cmpi ne, %1, %2 : vector<1x16xi32>
    %4 = vector.shape_cast %3 : vector<1x16xi1> to vector<1x16xi1>
    %5 = vector.broadcast %4 : vector<1x16xi1> to vector<16x16xi1>
    %c0_2 = arith.constant 0 : index
    %c0_3 = arith.constant 0 : index
    %c0_4 = arith.constant 0 : index
    %6 = vector.load %arg2[%c0_2, %c0_3, %c0_4] : memref<1x16x128xbf16, #tpu.memory_space<vmem>>, vector<1x16x32xbf16>
    %7 = vector.shape_cast %6 : vector<1x16x32xbf16> to vector<16x32xbf16>
    %c0_5 = arith.constant 0 : index
    %c0_6 = arith.constant 0 : index
    %c0_7 = arith.constant 0 : index
    %8 = vector.load %arg3[%c0_5, %c0_6, %c0_7] : memref<1x16x128xbf16, #tpu.memory_space<vmem>>, vector<1x16x32xbf16>
    %9 = vector.shape_cast %8 : vector<1x16x32xbf16> to vector<16x32xbf16>
    %cst = arith.constant dense<0.000000e+00> : vector<16x16xf32>
    %10 = tpu.matmul %7, %9, %cst {dimension_numbers = #tpu.dot_dimension_numbers<[1], [1], [0], [0], [0, 0, 1, 0], [], []>} : vector<16x32xbf16>, vector<16x32xbf16>, vector<16x16xf32> -> vector<16x16xf32>
    %cst_8 = arith.constant 0.176776692 : f32
    %11 = vector.broadcast %cst_8 : f32 to vector<16x16xf32>
    %12 = arith.mulf %10, %11 : vector<16x16xf32>
    %cst_9 = arith.constant -1.000000e+30 : f32
    %13 = vector.broadcast %cst_9 : f32 to vector<16x16xf32>
    %14 = arith.select %5, %12, %13 : vector<16x16xi1>, vector<16x16xf32>
    %cst_10 = arith.constant dense<0xFF800000> : vector<16xf32>
    %15 = vector.multi_reduction <maximumf>, %14, %cst_10 [1] : vector<16x16xf32> to vector<16xf32>
    %16 = vector.shape_cast %15 : vector<16xf32> to vector<16x1xf32>
    %17 = vector.broadcast %16 : vector<16x1xf32> to vector<16x16xf32>
    %18 = arith.subf %14, %17 : vector<16x16xf32>
    %19 = math.exp %18 : vector<16x16xf32>
    %cst_11 = arith.constant dense<0.000000e+00> : vector<16xf32>
    %20 = vector.multi_reduction <add>, %19, %cst_11 [1] : vector<16x16xf32> to vector<16xf32>
    %21 = vector.shape_cast %20 : vector<16xf32> to vector<16x1xf32>
    %22 = arith.truncf %19 : vector<16x16xf32> to vector<16x16xbf16>
    %c0_12 = arith.constant 0 : index
    %c0_13 = arith.constant 0 : index
    %c0_14 = arith.constant 0 : index
    %23 = vector.load %arg4[%c0_12, %c0_13, %c0_14] : memref<1x16x128xbf16, #tpu.memory_space<vmem>>, vector<1x16x32xbf16>
    %24 = vector.shape_cast %23 : vector<1x16x32xbf16> to vector<16x32xbf16>
    %cst_15 = arith.constant dense<0.000000e+00> : vector<16x32xf32>
    %25 = tpu.matmul %22, %24, %cst_15 {dimension_numbers = #tpu.dot_dimension_numbers<[1], [0], [0], [1], [0, 0, 1, 1], [], []>} : vector<16x16xbf16>, vector<16x32xbf16>, vector<16x32xf32> -> vector<16x32xf32>
    %26 = tpu.reciprocal %21 {approx = true} : vector<16x1xf32> -> vector<16x1xf32>
    %27 = vector.broadcast %26 : vector<16x1xf32> to vector<16x32xf32>
    %28 = arith.mulf %25, %27 : vector<16x32xf32>
    %29 = arith.truncf %28 : vector<16x32xf32> to vector<16x32xbf16>
    %c0_16 = arith.constant 0 : index
    %c0_17 = arith.constant 0 : index
    %c0_18 = arith.constant 0 : index
    %30 = vector.load %arg6[%c0_16, %c0_17, %c0_18] : memref<1x16x128xbf16, #tpu.memory_space<vmem>>, vector<1x16x32xbf16>
    %31 = vector.shape_cast %30 : vector<1x16x32xbf16> to vector<16x32xbf16>
    %32 = vector.shape_cast %29 : vector<16x32xbf16> to vector<1x16x32xbf16>
    tpu.vector_store %arg6[%c0_16, %c0_17, %c0_18], %32 {strides = array<i32>} : memref<1x16x128xbf16, #tpu.memory_space<vmem>>, vector<1x16x32xbf16>,
    %c0_19 = arith.constant 0 : index
    %c0_20 = arith.constant 0 : index
    %c32 = arith.constant 32 : index
    %33 = vector.load %arg2[%c0_19, %c0_20, %c32] : memref<1x16x128xbf16, #tpu.memory_space<vmem>>, vector<1x16x32xbf16>
    %34 = vector.shape_cast %33 : vector<1x16x32xbf16> to vector<16x32xbf16>
    %c0_21 = arith.constant 0 : index
    %c0_22 = arith.constant 0 : index
    %c32_23 = arith.constant 32 : index
    %35 = vector.load %arg3[%c0_21, %c0_22, %c32_23] : memref<1x16x128xbf16, #tpu.memory_space<vmem>>, vector<1x16x32xbf16>
    %36 = vector.shape_cast %35 : vector<1x16x32xbf16> to vector<16x32xbf16>
    %cst_24 = arith.constant dense<0.000000e+00> : vector<16x16xf32>
    %37 = tpu.matmul %34, %36, %cst_24 {dimension_numbers = #tpu.dot_dimension_numbers<[1], [1], [0], [0], [0, 0, 1, 0], [], []>} : vector<16x32xbf16>, vector<16x32xbf16>, vector<16x16xf32> -> vector<16x16xf32>
    %cst_25 = arith.constant 0.176776692 : f32
    %38 = vector.broadcast %cst_25 : f32 to vector<16x16xf32>
    %39 = arith.mulf %37, %38 : vector<16x16xf32>
    %cst_26 = arith.constant -1.000000e+30 : f32
    %40 = vector.broadcast %cst_26 : f32 to vector<16x16xf32>
    %41 = arith.select %5, %39, %40 : vector<16x16xi1>, vector<16x16xf32>
    %cst_27 = arith.constant dense<0xFF800000> : vector<16xf32>
    %42 = vector.multi_reduction <maximumf>, %41, %cst_27 [1] : vector<16x16xf32> to vector<16xf32>
    %43 = vector.shape_cast %42 : vector<16xf32> to vector<16x1xf32>
    %44 = vector.broadcast %43 : vector<16x1xf32> to vector<16x16xf32>
    %45 = arith.subf %41, %44 : vector<16x16xf32>
    %46 = math.exp %45 : vector<16x16xf32>
    %cst_28 = arith.constant dense<0.000000e+00> : vector<16xf32>
    %47 = vector.multi_reduction <add>, %46, %cst_28 [1] : vector<16x16xf32> to vector<16xf32>
    %48 = vector.shape_cast %47 : vector<16xf32> to vector<16x1xf32>
    %49 = arith.truncf %46 : vector<16x16xf32> to vector<16x16xbf16>
    %c0_29 = arith.constant 0 : index
    %c0_30 = arith.constant 0 : index
    %c32_31 = arith.constant 32 : index
    %50 = vector.load %arg4[%c0_29, %c0_30, %c32_31] : memref<1x16x128xbf16, #tpu.memory_space<vmem>>, vector<1x16x32xbf16>
    %51 = vector.shape_cast %50 : vector<1x16x32xbf16> to vector<16x32xbf16>
    %cst_32 = arith.constant dense<0.000000e+00> : vector<16x32xf32>
    %52 = tpu.matmul %49, %51, %cst_32 {dimension_numbers = #tpu.dot_dimension_numbers<[1], [0], [0], [1], [0, 0, 1, 1], [], []>} : vector<16x16xbf16>, vector<16x32xbf16>, vector<16x32xf32> -> vector<16x32xf32>
    %53 = tpu.reciprocal %48 {approx = true} : vector<16x1xf32> -> vector<16x1xf32>
    %54 = vector.broadcast %53 : vector<16x1xf32> to vector<16x32xf32>
    %55 = arith.mulf %52, %54 : vector<16x32xf32>
    %56 = arith.truncf %55 : vector<16x32xf32> to vector<16x32xbf16>
    %c0_33 = arith.constant 0 : index
    %c0_34 = arith.constant 0 : index
    %c32_35 = arith.constant 32 : index
    %57 = vector.load %arg6[%c0_33, %c0_34, %c32_35] : memref<1x16x128xbf16, #tpu.memory_space<vmem>>, vector<1x16x32xbf16>
    %58 = vector.shape_cast %57 : vector<1x16x32xbf16> to vector<16x32xbf16>
    %59 = vector.shape_cast %56 : vector<16x32xbf16> to vector<1x16x32xbf16>
    tpu.vector_store %arg6[%c0_33, %c0_34, %c32_35], %59 {strides = array<i32>} : memref<1x16x128xbf16, #tpu.memory_space<vmem>>, vector<1x16x32xbf16>,
    %c0_36 = arith.constant 0 : index
    %c0_37 = arith.constant 0 : index
    %c64 = arith.constant 64 : index
    %60 = vector.load %arg2[%c0_36, %c0_37, %c64] : memref<1x16x128xbf16, #tpu.memory_space<vmem>>, vector<1x16x32xbf16>
    %61 = vector.shape_cast %60 : vector<1x16x32xbf16> to vector<16x32xbf16>
    %c0_38 = arith.constant 0 : index
    %c0_39 = arith.constant 0 : index
    %c64_40 = arith.constant 64 : index
    %62 = vector.load %arg3[%c0_38, %c0_39, %c64_40] : memref<1x16x128xbf16, #tpu.memory_space<vmem>>, vector<1x16x32xbf16>
    %63 = vector.shape_cast %62 : vector<1x16x32xbf16> to vector<16x32xbf16>
    %cst_41 = arith.constant dense<0.000000e+00> : vector<16x16xf32>
    %64 = tpu.matmul %61, %63, %cst_41 {dimension_numbers = #tpu.dot_dimension_numbers<[1], [1], [0], [0], [0, 0, 1, 0], [], []>} : vector<16x32xbf16>, vector<16x32xbf16>, vector<16x16xf32> -> vector<16x16xf32>
    %cst_42 = arith.constant 0.176776692 : f32
    %65 = vector.broadcast %cst_42 : f32 to vector<16x16xf32>
    %66 = arith.mulf %64, %65 : vector<16x16xf32>
    %cst_43 = arith.constant -1.000000e+30 : f32
    %67 = vector.broadcast %cst_43 : f32 to vector<16x16xf32>
    %68 = arith.select %5, %66, %67 : vector<16x16xi1>, vector<16x16xf32>
    %cst_44 = arith.constant dense<0xFF800000> : vector<16xf32>
    %69 = vector.multi_reduction <maximumf>, %68, %cst_44 [1] : vector<16x16xf32> to vector<16xf32>
    %70 = vector.shape_cast %69 : vector<16xf32> to vector<16x1xf32>
    %71 = vector.broadcast %70 : vector<16x1xf32> to vector<16x16xf32>
    %72 = arith.subf %68, %71 : vector<16x16xf32>
    %73 = math.exp %72 : vector<16x16xf32>
    %cst_45 = arith.constant dense<0.000000e+00> : vector<16xf32>
    %74 = vector.multi_reduction <add>, %73, %cst_45 [1] : vector<16x16xf32> to vector<16xf32>
    %75 = vector.shape_cast %74 : vector<16xf32> to vector<16x1xf32>
    %76 = arith.truncf %73 : vector<16x16xf32> to vector<16x16xbf16>
    %c0_46 = arith.constant 0 : index
    %c0_47 = arith.constant 0 : index
    %c64_48 = arith.constant 64 : index
    %77 = vector.load %arg4[%c0_46, %c0_47, %c64_48] : memref<1x16x128xbf16, #tpu.memory_space<vmem>>, vector<1x16x32xbf16>
    %78 = vector.shape_cast %77 : vector<1x16x32xbf16> to vector<16x32xbf16>
    %cst_49 = arith.constant dense<0.000000e+00> : vector<16x32xf32>
    %79 = tpu.matmul %76, %78, %cst_49 {dimension_numbers = #tpu.dot_dimension_numbers<[1], [0], [0], [1], [0, 0, 1, 1], [], []>} : vector<16x16xbf16>, vector<16x32xbf16>, vector<16x32xf32> -> vector<16x32xf32>
    %80 = tpu.reciprocal %75 {approx = true} : vector<16x1xf32> -> vector<16x1xf32>
    %81 = vector.broadcast %80 : vector<16x1xf32> to vector<16x32xf32>
    %82 = arith.mulf %79, %81 : vector<16x32xf32>
    %83 = arith.truncf %82 : vector<16x32xf32> to vector<16x32xbf16>
    %c0_50 = arith.constant 0 : index
    %c0_51 = arith.constant 0 : index
    %c64_52 = arith.constant 64 : index
    %84 = vector.load %arg6[%c0_50, %c0_51, %c64_52] : memref<1x16x128xbf16, #tpu.memory_space<vmem>>, vector<1x16x32xbf16>
    %85 = vector.shape_cast %84 : vector<1x16x32xbf16> to vector<16x32xbf16>
    %86 = vector.shape_cast %83 : vector<16x32xbf16> to vector<1x16x32xbf16>
    tpu.vector_store %arg6[%c0_50, %c0_51, %c64_52], %86 {strides = array<i32>} : memref<1x16x128xbf16, #tpu.memory_space<vmem>>, vector<1x16x32xbf16>,
    %c0_53 = arith.constant 0 : index
    %c0_54 = arith.constant 0 : index
    %c96 = arith.constant 96 : index
    %87 = vector.load %arg2[%c0_53, %c0_54, %c96] : memref<1x16x128xbf16, #tpu.memory_space<vmem>>, vector<1x16x32xbf16>
    %88 = vector.shape_cast %87 : vector<1x16x32xbf16> to vector<16x32xbf16>
    %c0_55 = arith.constant 0 : index
    %c0_56 = arith.constant 0 : index
    %c96_57 = arith.constant 96 : index
    %89 = vector.load %arg3[%c0_55, %c0_56, %c96_57] : memref<1x16x128xbf16, #tpu.memory_space<vmem>>, vector<1x16x32xbf16>
    %90 = vector.shape_cast %89 : vector<1x16x32xbf16> to vector<16x32xbf16>
    %cst_58 = arith.constant dense<0.000000e+00> : vector<16x16xf32>
    %91 = tpu.matmul %88, %90, %cst_58 {dimension_numbers = #tpu.dot_dimension_numbers<[1], [1], [0], [0], [0, 0, 1, 0], [], []>} : vector<16x32xbf16>, vector<16x32xbf16>, vector<16x16xf32> -> vector<16x16xf32>
    %cst_59 = arith.constant 0.176776692 : f32
    %92 = vector.broadcast %cst_59 : f32 to vector<16x16xf32>
    %93 = arith.mulf %91, %92 : vector<16x16xf32>
    %cst_60 = arith.constant -1.000000e+30 : f32
    %94 = vector.broadcast %cst_60 : f32 to vector<16x16xf32>
    %95 = arith.select %5, %93, %94 : vector<16x16xi1>, vector<16x16xf32>
    %cst_61 = arith.constant dense<0xFF800000> : vector<16xf32>
    %96 = vector.multi_reduction <maximumf>, %95, %cst_61 [1] : vector<16x16xf32> to vector<16xf32>
    %97 = vector.shape_cast %96 : vector<16xf32> to vector<16x1xf32>
    %98 = vector.broadcast %97 : vector<16x1xf32> to vector<16x16xf32>
    %99 = arith.subf %95, %98 : vector<16x16xf32>
    %100 = math.exp %99 : vector<16x16xf32>
    %cst_62 = arith.constant dense<0.000000e+00> : vector<16xf32>
    %101 = vector.multi_reduction <add>, %100, %cst_62 [1] : vector<16x16xf32> to vector<16xf32>
    %102 = vector.shape_cast %101 : vector<16xf32> to vector<16x1xf32>
    %103 = arith.truncf %100 : vector<16x16xf32> to vector<16x16xbf16>
    %c0_63 = arith.constant 0 : index
    %c0_64 = arith.constant 0 : index
    %c96_65 = arith.constant 96 : index
    %104 = vector.load %arg4[%c0_63, %c0_64, %c96_65] : memref<1x16x128xbf16, #tpu.memory_space<vmem>>, vector<1x16x32xbf16>
    %105 = vector.shape_cast %104 : vector<1x16x32xbf16> to vector<16x32xbf16>
    %cst_66 = arith.constant dense<0.000000e+00> : vector<16x32xf32>
    %106 = tpu.matmul %103, %105, %cst_66 {dimension_numbers = #tpu.dot_dimension_numbers<[1], [0], [0], [1], [0, 0, 1, 1], [], []>} : vector<16x16xbf16>, vector<16x32xbf16>, vector<16x32xf32> -> vector<16x32xf32>
    %107 = tpu.reciprocal %102 {approx = true} : vector<16x1xf32> -> vector<16x1xf32>
    %108 = vector.broadcast %107 : vector<16x1xf32> to vector<16x32xf32>
    %109 = arith.mulf %106, %108 : vector<16x32xf32>
    %110 = arith.truncf %109 : vector<16x32xf32> to vector<16x32xbf16>
    %c0_67 = arith.constant 0 : index
    %c0_68 = arith.constant 0 : index
    %c96_69 = arith.constant 96 : index
    %111 = vector.load %arg6[%c0_67, %c0_68, %c96_69] : memref<1x16x128xbf16, #tpu.memory_space<vmem>>, vector<1x16x32xbf16>
    %112 = vector.shape_cast %111 : vector<1x16x32xbf16> to vector<16x32xbf16>
    %113 = vector.shape_cast %110 : vector<16x32xbf16> to vector<1x16x32xbf16>
    tpu.vector_store %arg6[%c0_67, %c0_68, %c96_69], %113 {strides = array<i32>} : memref<1x16x128xbf16, #tpu.memory_space<vmem>>, vector<1x16x32xbf16>,
    return
  }
  func.func @transform_0(%arg0: i32, %arg1: i32) -> (i32, i32, i32) {
    %c0_i32 = arith.constant 0 : i32
    %c0_i32_0 = arith.constant 0 : i32
    return %arg0, %arg1, %c0_i32 : i32, i32, i32
  }
  func.func @transform_1(%arg0: i32, %arg1: i32) -> (i32, i32, i32) {
    %c0_i32 = arith.constant 0 : i32
    %c1_i32 = arith.constant 1 : i32
    %c0_i32_0 = arith.constant 0 : i32
    return %arg0, %c0_i32, %c1_i32 : i32, i32, i32
  }
  func.func @transform_2(%arg0: i32, %arg1: i32) -> (i32, i32, i32) {
    %c0_i32 = arith.constant 0 : i32
    %c2_i32 = arith.constant 2 : i32
    %c0_i32_0 = arith.constant 0 : i32
    return %arg0, %c0_i32, %c2_i32 : i32, i32, i32
  }
  func.func @transform_3(%arg0: i32, %arg1: i32) -> (i32, i32, i32) {
    %c0_i32 = arith.constant 0 : i32
    %c0_i32_0 = arith.constant 0 : i32
    %c0_i32_1 = arith.constant 0 : i32
    return %arg0, %c0_i32, %c0_i32_0 : i32, i32, i32
  }
  func.func @transform_4(%arg0: i32, %arg1: i32) -> (i32, i32, i32) {
    %c0_i32 = arith.constant 0 : i32
    %c0_i32_0 = arith.constant 0 : i32
    return %arg0, %arg1, %c0_i32 : i32, i32, i32
  }
}

module attributes {stable_mosaic.version = 11 : i64} {
  func.func @_lmhead_ce_kernel(%arg0: i32, %arg1: i32, %arg2: memref<32x128xbf16, #tpu.memory_space<vmem>>, %arg3: memref<512x128xbf16, #tpu.memory_space<vmem>>, %arg4: memref<32x128xbf16, #tpu.memory_space<vmem>>, %arg5: memref<1x512xf32, #tpu.memory_space<vmem>>, %arg6: memref<32x1xf32, #tpu.memory_space<vmem>>, %arg7: memref<32x1xf32, #tpu.memory_space<vmem>>, %arg8: memref<32x1xf32, #tpu.memory_space<vmem>>, %arg9: memref<32x1xf32, #tpu.memory_space<vmem>>) attributes {dimension_semantics = [#tpu.dimension_semantics<parallel>, #tpu.dimension_semantics<arbitrary>], iteration_bounds = array<i64: 1, 1>, scalar_prefetch = 0 : i64, scratch_operands = 3 : i64, tpu.core_type = #tpu.core_type<tc>, window_params = [{transform_indices = @transform_0, window_bounds = array<i64: 32, 128>}, {transform_indices = @transform_1, window_bounds = array<i64: 512, 128>}, {transform_indices = @transform_2, window_bounds = array<i64: 32, 128>}, {transform_indices = @transform_3, window_bounds = array<i64: 1, 512>}, {transform_indices = @transform_4, window_bounds = array<i64: 32, 1>}]} {
    %c0_i32 = arith.constant 0 : i32
    %0 = arith.cmpi eq, %arg1, %c0_i32 : i32
    %1 = arith.extui %0 : i1 to i32
    %c0_i32_0 = arith.constant 0 : i32
    %2 = arith.cmpi ne, %1, %c0_i32_0 : i32
    scf.if %2 {
      %cst_20 = arith.constant -1.000000e+30 : f32
      %29 = vector.broadcast %cst_20 : f32 to vector<32x1xf32>
      %c0_21 = arith.constant 0 : index
      %c0_22 = arith.constant 0 : index
      %30 = vector.load %arg7[%c0_21, %c0_22] : memref<32x1xf32, #tpu.memory_space<vmem>>, vector<32x1xf32>
      tpu.vector_store %arg7[%c0_21, %c0_22], %29 {strides = array<i32>} : memref<32x1xf32, #tpu.memory_space<vmem>>, vector<32x1xf32>,
      %cst_23 = arith.constant 0.000000e+00 : f32
      %31 = vector.broadcast %cst_23 : f32 to vector<32x1xf32>
      %c0_24 = arith.constant 0 : index
      %c0_25 = arith.constant 0 : index
      %32 = vector.load %arg8[%c0_24, %c0_25] : memref<32x1xf32, #tpu.memory_space<vmem>>, vector<32x1xf32>
      tpu.vector_store %arg8[%c0_24, %c0_25], %31 {strides = array<i32>} : memref<32x1xf32, #tpu.memory_space<vmem>>, vector<32x1xf32>,
      %c0_26 = arith.constant 0 : index
      %c0_27 = arith.constant 0 : index
      %33 = vector.load %arg2[%c0_26, %c0_27] : memref<32x128xbf16, #tpu.memory_space<vmem>>, vector<32x128xbf16>
      %34 = arith.extf %33 : vector<32x128xbf16> to vector<32x128xf32>
      %c0_28 = arith.constant 0 : index
      %c0_29 = arith.constant 0 : index
      %35 = vector.load %arg4[%c0_28, %c0_29] : memref<32x128xbf16, #tpu.memory_space<vmem>>, vector<32x128xbf16>
      %36 = arith.extf %35 : vector<32x128xbf16> to vector<32x128xf32>
      %37 = arith.mulf %34, %36 : vector<32x128xf32>
      %cst_30 = arith.constant dense<0.000000e+00> : vector<32xf32>
      %38 = vector.multi_reduction <add>, %37, %cst_30 [1] : vector<32x128xf32> to vector<32xf32>
      %39 = vector.shape_cast %38 : vector<32xf32> to vector<32x1xf32>
      %c0_31 = arith.constant 0 : index
      %c0_32 = arith.constant 0 : index
      %40 = vector.load %arg9[%c0_31, %c0_32] : memref<32x1xf32, #tpu.memory_space<vmem>>, vector<32x1xf32>
      tpu.vector_store %arg9[%c0_31, %c0_32], %39 {strides = array<i32>} : memref<32x1xf32, #tpu.memory_space<vmem>>, vector<32x1xf32>,
    } else {
    }
    %c0 = arith.constant 0 : index
    %c0_1 = arith.constant 0 : index
    %3 = vector.load %arg2[%c0, %c0_1] : memref<32x128xbf16, #tpu.memory_space<vmem>>, vector<32x128xbf16>
    %c0_2 = arith.constant 0 : index
    %c0_3 = arith.constant 0 : index
    %4 = vector.load %arg3[%c0_2, %c0_3] : memref<512x128xbf16, #tpu.memory_space<vmem>>, vector<512x128xbf16>
    %cst = arith.constant dense<0.000000e+00> : vector<32x512xf32>
    %5 = tpu.matmul %3, %4, %cst {dimension_numbers = #tpu.dot_dimension_numbers<[1], [1], [0], [0], [0, 0, 1, 0], [], []>} : vector<32x128xbf16>, vector<512x128xbf16>, vector<32x512xf32> -> vector<32x512xf32>
    %c0_4 = arith.constant 0 : index
    %c0_5 = arith.constant 0 : index
    %6 = vector.load %arg5[%c0_4, %c0_5] : memref<1x512xf32, #tpu.memory_space<vmem>>, vector<1x512xf32>
    %7 = vector.broadcast %6 : vector<1x512xf32> to vector<32x512xf32>
    %8 = arith.addf %5, %7 : vector<32x512xf32>
    %c0_6 = arith.constant 0 : index
    %c0_7 = arith.constant 0 : index
    %9 = vector.load %arg7[%c0_6, %c0_7] : memref<32x1xf32, #tpu.memory_space<vmem>>, vector<32x1xf32>
    %cst_8 = arith.constant dense<0xFF800000> : vector<32xf32>
    %10 = vector.multi_reduction <maximumf>, %8, %cst_8 [1] : vector<32x512xf32> to vector<32xf32>
    %11 = vector.shape_cast %10 : vector<32xf32> to vector<32x1xf32>
    %12 = arith.maximumf %9, %11 : vector<32x1xf32>
    %c0_9 = arith.constant 0 : index
    %c0_10 = arith.constant 0 : index
    %13 = vector.load %arg8[%c0_9, %c0_10] : memref<32x1xf32, #tpu.memory_space<vmem>>, vector<32x1xf32>
    %c0_11 = arith.constant 0 : index
    %c0_12 = arith.constant 0 : index
    %14 = vector.load %arg7[%c0_11, %c0_12] : memref<32x1xf32, #tpu.memory_space<vmem>>, vector<32x1xf32>
    %15 = arith.subf %14, %12 : vector<32x1xf32>
    %16 = math.exp %15 : vector<32x1xf32>
    %17 = arith.mulf %13, %16 : vector<32x1xf32>
    %18 = vector.broadcast %12 : vector<32x1xf32> to vector<32x512xf32>
    %19 = arith.subf %8, %18 : vector<32x512xf32>
    %20 = math.exp %19 : vector<32x512xf32>
    %cst_13 = arith.constant dense<0.000000e+00> : vector<32xf32>
    %21 = vector.multi_reduction <add>, %20, %cst_13 [1] : vector<32x512xf32> to vector<32xf32>
    %22 = vector.shape_cast %21 : vector<32xf32> to vector<32x1xf32>
    %23 = arith.addf %17, %22 : vector<32x1xf32>
    %c0_14 = arith.constant 0 : index
    %c0_15 = arith.constant 0 : index
    %24 = vector.load %arg8[%c0_14, %c0_15] : memref<32x1xf32, #tpu.memory_space<vmem>>, vector<32x1xf32>
    tpu.vector_store %arg8[%c0_14, %c0_15], %23 {strides = array<i32>} : memref<32x1xf32, #tpu.memory_space<vmem>>, vector<32x1xf32>,
    %c0_16 = arith.constant 0 : index
    %c0_17 = arith.constant 0 : index
    %25 = vector.load %arg7[%c0_16, %c0_17] : memref<32x1xf32, #tpu.memory_space<vmem>>, vector<32x1xf32>
    tpu.vector_store %arg7[%c0_16, %c0_17], %12 {strides = array<i32>} : memref<32x1xf32, #tpu.memory_space<vmem>>, vector<32x1xf32>,
    %c0_i32_18 = arith.constant 0 : i32
    %26 = arith.cmpi eq, %arg1, %c0_i32_18 : i32
    %27 = arith.extui %26 : i1 to i32
    %c0_i32_19 = arith.constant 0 : i32
    %28 = arith.cmpi ne, %27, %c0_i32_19 : i32
    scf.if %28 {
      %c0_20 = arith.constant 0 : index
      %c0_21 = arith.constant 0 : index
      %29 = vector.load %arg7[%c0_20, %c0_21] : memref<32x1xf32, #tpu.memory_space<vmem>>, vector<32x1xf32>
      %c0_22 = arith.constant 0 : index
      %c0_23 = arith.constant 0 : index
      %30 = vector.load %arg8[%c0_22, %c0_23] : memref<32x1xf32, #tpu.memory_space<vmem>>, vector<32x1xf32>
      %31 = math.log %30 : vector<32x1xf32>
      %32 = arith.addf %29, %31 : vector<32x1xf32>
      %c0_24 = arith.constant 0 : index
      %c0_25 = arith.constant 0 : index
      %33 = vector.load %arg9[%c0_24, %c0_25] : memref<32x1xf32, #tpu.memory_space<vmem>>, vector<32x1xf32>
      %34 = arith.subf %32, %33 : vector<32x1xf32>
      %c0_26 = arith.constant 0 : index
      %c0_27 = arith.constant 0 : index
      %35 = vector.load %arg6[%c0_26, %c0_27] : memref<32x1xf32, #tpu.memory_space<vmem>>, vector<32x1xf32>
      tpu.vector_store %arg6[%c0_26, %c0_27], %34 {strides = array<i32>} : memref<32x1xf32, #tpu.memory_space<vmem>>, vector<32x1xf32>,
    } else {
    }
    return
  }
  func.func @transform_0(%arg0: i32, %arg1: i32) -> (i32, i32) {
    %c0_i32 = arith.constant 0 : i32
    %c0_i32_0 = arith.constant 0 : i32
    return %arg0, %c0_i32 : i32, i32
  }
  func.func @transform_1(%arg0: i32, %arg1: i32) -> (i32, i32) {
    %c0_i32 = arith.constant 0 : i32
    %c0_i32_0 = arith.constant 0 : i32
    return %arg1, %c0_i32 : i32, i32
  }
  func.func @transform_2(%arg0: i32, %arg1: i32) -> (i32, i32) {
    %c0_i32 = arith.constant 0 : i32
    %c0_i32_0 = arith.constant 0 : i32
    return %arg0, %c0_i32 : i32, i32
  }
  func.func @transform_3(%arg0: i32, %arg1: i32) -> (i32, i32) {
    %c0_i32 = arith.constant 0 : i32
    %c0_i32_0 = arith.constant 0 : i32
    return %c0_i32, %arg1 : i32, i32
  }
  func.func @transform_4(%arg0: i32, %arg1: i32) -> (i32, i32) {
    %c0_i32 = arith.constant 0 : i32
    %c0_i32_0 = arith.constant 0 : i32
    return %arg0, %c0_i32 : i32, i32
  }
}

</mosaic_0001>

<bundles_post_ra>
// kernel: seq2seq_unixcoder_forward.19
= control target key start
LH: loop header
LB: loop body
LE: loop exit
PB: predicated region body
PF: predicated region fallthrough
CT: control target
= control target key end

     0   :  { %v157_v4 = vmov 128.0   ;;  %s222_s0 = inlined_call_operand.vmem [shape: f32[32,128], index: 0, kind: input, shape index: {}]   ;;  %s223_s1 = inlined_call_operand.vmem [shape: f32[1,128], index: 1, kind: input, shape index: {}]   ;;  %s224_s2 = inlined_call_operand.vmem [shape: f32[1,128], index: 2, kind: input, shape index: {}]   ;;  %s225_s3 = inlined_call_operand.vmem [shape: bf16[32,128], index: 3, kind: output, shape index: {}]  }
   0x1   :  { %v16_v0 = vld [vmem:[%s222_s0 + $0x10] sm:$0xff]  ;;  %v14_v1 = vld [vmem:[%s222_s0] sm:$0xff]  ;;  %v17_v2 = vld [vmem:[%s222_s0 + $0x18] sm:$0xff]  ;;  %147 = vrcp.f32 %v157_v4 }
   0x2   :  { %22 = vadd.xlane.f32.xlu1 %v16_v0  ;;  %18 = vadd.xlane.f32.xlu0 %v14_v1  ;;  %v15_v3 = vld [vmem:[%s222_s0 + $0x8] sm:$0xff]  ;;  %v145_v62 = vld [vmem:[%s223_s1] ss:$0 sm:$0xff] }
   0x7   :  { %v148_v5 = vpop.eup %147 }
   0x8   :  { %v27_v6 = vmul.f32 128.0, %v148_v5  ;;  %vm31_vm0 = vweird.f32 %v148_v5 }
   0xa   :  { %24 = vadd.xlane.f32.xlu1 %v17_v2  ;;  %20 = vadd.xlane.f32.xlu0 %v15_v3  ;;  %v28_v7 = vsub.f32 1.0, %v27_v6 }
   0xc   :  { %v29_v8 = vmul.f32 %v148_v5, %v28_v7 }
   0xe   :  { %v30_v9 = vadd.f32 %v148_v5, %v29_v8 }
  0x10   :  { %v32_v10 = vsel %vm31_vm0, %v148_v5, %v30_v9  ;;  %v146_v5 = vld [vmem:[%s224_s2] ss:$0 sm:$0xff] }
  0x75   :  { %v23_v11 = vpop.xlane.xlu1 %22  ;;  %v19_v12 = vpop.xlane.xlu0 %18 }
  0x76   :  { %v35_v13 = vmul.f32 %v32_v10, %v23_v11  ;;  %v33_v14 = vmul.f32 %v32_v10, %v19_v12 }
  0x78   :  { %v190_v15 = vsub.f32 %v16_v0, %v35_v13  ;;  %v192_v16 = vsub.f32 %v14_v1, %v33_v14 }
  0x7a   :  { %v43_v17 = vmul.f32 %v190_v15, %v190_v15  ;;  %v41_v18 = vmul.f32 %v192_v16, %v192_v16 }
  0x7c   :  { %49 = vadd.xlane.f32.xlu0 %v43_v17  ;;  %45 = vadd.xlane.f32.xlu2 %v41_v18 }
  0x7d   :  { %v25_v19 = vpop.xlane.xlu1 %24  ;;  %v21_v20 = vpop.xlane.xlu0 %20 }
  0x7e   :  { %v36_v21 = vmul.f32 %v32_v10, %v25_v19  ;;  %v34_v22 = vmul.f32 %v32_v10, %v21_v20 }
  0x80   :  { %v198_v23 = vsub.f32 %v17_v2, %v36_v21  ;;  %v200_v24 = vsub.f32 %v15_v3, %v34_v22 }
  0x82   :  { %v44_v25 = vmul.f32 %v198_v23, %v198_v23  ;;  %v42_v26 = vmul.f32 %v200_v24, %v200_v24 }
  0x84   :  { %51 = vadd.xlane.f32.xlu1 %v44_v25  ;;  %47 = vadd.xlane.f32.xlu2 %v42_v26 }
  0xef   :  { %v46_v27 = vpop.xlane.xlu2 %45  ;;  %v50_v28 = vpop.xlane.xlu0 %49 }
  0xf0   :  { %v53_v29 = vmul.f32 %v46_v27, %v32_v10  ;;  %v55_v30 = vmul.f32 %v50_v28, %v32_v10 }
  0xf2   :  { %v57_v31 = vadd.f32 1e-05, %v53_v29  ;;  %v59_v32 = vadd.f32 1e-05, %v55_v30 }
  0xf4   :  { %149 = vrsqrt.f32 %v57_v31  ;;  %vm87_vm3 = vweird.f32 %v59_v32  ;;  %vm67_vm4 = vweird.f32 %v57_v31 }
  0xf5   :  { %151 = vrsqrt.f32 %v59_v32 }
  0xf7   :  { %v52_v33 = vpop.xlane.xlu1 %51  ;;  %v48_v34 = vpop.xlane.xlu2 %47 }
  0xf8   :  { %v56_v35 = vmul.f32 %v52_v33, %v32_v10  ;;  %v54_v36 = vmul.f32 %v48_v34, %v32_v10 }
  0xfa   :  { %v150_v37 = vpop.eup %149  ;;  %v60_v38 = vadd.f32 1e-05, %v56_v35  ;;  %v58_v39 = vadd.f32 1e-05, %v54_v36 }
  0xfb   :  { %v152_v40 = vpop.eup %151  ;;  %v62_v41 = vmul.f32 %v150_v37, %v57_v31  ;;  %vm68_vm2 = vweird.f32 %v150_v37 }
  0xfc   :  { %v82_v42 = vmul.f32 %v152_v40, %v59_v32  ;;  %153 = vrsqrt.f32 %v60_v38  ;;  %vm88_vm1 = vweird.f32 %v152_v40  ;;  %vm69_vm6 = vmor %vm67_vm4, %vm68_vm2  ;;  %vm97_vm9 = vweird.f32 %v60_v38 }
  0xfd   :  { %v63_v43 = vmul.f32 %v150_v37, %v62_v41  ;;  %155 = vrsqrt.f32 %v58_v39  ;;  %vm89_vm5 = vmor %vm87_vm3, %vm88_vm1  ;;  %vm77_vm11 = vweird.f32 %v58_v39 }
  0xfe   :  { %v83_v44 = vmul.f32 %v152_v40, %v82_v42 }
  0xff   :  { %v64_v45 = vmul.f32 0.5, %v63_v43 }
 0x100   :  { %v84_v46 = vmul.f32 0.5, %v83_v44 }
 0x101   :  { %v65_v47 = vsub.f32 1.5, %v64_v45 }
 0x102   :  { %v154_v48 = vpop.eup %153  ;;  %v85_v49 = vsub.f32 1.5, %v84_v46 }
 0x103   :  { %v156_v50 = vpop.eup %155  ;;  %v92_v51 = vmul.f32 %v154_v48, %v60_v38  ;;  %v66_v52 = vmul.f32 %v150_v37, %v65_v47  ;;  %vm98_vm7 = vweird.f32 %v154_v48 }
 0x104   :  { %v86_v53 = vmul.f32 %v152_v40, %v85_v49  ;;  %v72_v54 = vmul.f32 %v156_v50, %v58_v39  ;;  %vm78_vm8 = vweird.f32 %v156_v50  ;;  %vm99_vm10 = vmor %vm97_vm9, %vm98_vm7 }
 0x105   :  { %v93_v55 = vmul.f32 %v154_v48, %v92_v51  ;;  %v70_v59 = vsel %vm69_vm6, %v150_v37, %v66_v52  ;;  %vm79_vm12 = vmor %vm77_vm11, %vm78_vm8 }
 0x106   :  { %v73_v56 = vmul.f32 %v156_v50, %v72_v54  ;;  %v90_v57 = vsel %vm89_vm5, %v152_v40, %v86_v53  ;;  %v101_v1 = vmul.f32 %v70_v59, %v192_v16 }
 0x107   :  { %v94_v58 = vmul.f32 0.5, %v93_v55  ;;  %v103_v63 = vmul.f32 %v90_v57, %v190_v15 }
 0x108   :  { %v74_v60 = vmul.f32 0.5, %v73_v56  ;;  %v109_v9 = vmul.f32 %v145_v62, %v101_v1 }
 0x109   :  { %v95_v61 = vsub.f32 1.5, %v94_v58  ;;  %v111_v6 = vmul.f32 %v145_v62, %v103_v63 }
 0x10a   :  { %v75_v0 = vsub.f32 1.5, %v74_v60  ;;  %v117_v15 = vadd.f32 %v146_v5, %v109_v9 }
 0x10b   :  { %v96_v2 = vmul.f32 %v154_v48, %v95_v61  ;;  %v119_v13 = vadd.f32 %v146_v5, %v111_v6 }
 0x10c   :  { %v76_v3 = vmul.f32 %v156_v50, %v75_v0 }
 0x10d   :  { %v100_v4 = vsel %vm99_vm10, %v154_v48, %v96_v2 }
 0x10e   :  { %v104_v7 = vmul.f32 %v100_v4, %v198_v23  ;;  %v80_v8 = vsel %vm79_vm12, %v156_v50, %v76_v3 }
 0x10f   :  { %v102_v10 = vmul.f32 %v80_v8, %v200_v24 }
 0x110   :  { %v112_v11 = vmul.f32 %v145_v62, %v104_v7 }
 0x111   :  { %v110_v12 = vmul.f32 %v145_v62, %v102_v10 }
 0x112   :  { %v120_v14 = vadd.f32 %v146_v5, %v112_v11 }
 0x113   :  { %v118_v16 = vadd.f32 %v146_v5, %v110_v12 }
 0x114   :  { %v141_v17 = vpack.c.bf16 %v120_v14, %v119_v13 }
 0x115   :  { %v136_v18 = vpack.c.bf16 %v118_v16, %v117_v15 }
 0x116   :  { %143 = vst [vmem:[%s225_s3 + $0x8] sm:$0xff] %v141_v17  }
 0x117   :  { %137 = vst [vmem:[%s225_s3] sm:$0xff] %v136_v18  }

// kernel: seq2seq_unixcoder_forward.20
= control target key start
LH: loop header
LB: loop body
LE: loop exit
PB: predicated region body
PF: predicated region fallthrough
CT: control target
= control target key end

     0   :  { %s649_s1 = inlined_call_operand.vmem [shape: bf16[384,128], index: 1, kind: input, shape index: {}]   ;;  %s650_s0 = inlined_call_operand.vmem [shape: bf16[32,128], index: 0, kind: input, shape index: {}]   ;;  %s651_s2 = inlined_call_operand.vmem [shape: f32[1,384], index: 2, kind: input, shape index: {}]   ;;  %s652_s3 = inlined_call_operand.vmem [shape: bf16[32,384], index: 3, kind: output, shape index: {}]  }
   0x1   :  { %v499_v0 = vld [vmem:[%s649_s1 + $0x38] sm:$0xff]  ;;  %v498_v3 = vld [vmem:[%s649_s1 + $0x30] sm:$0xff]  ;;  %v497_v6 = vld [vmem:[%s649_s1 + $0x28] sm:$0xff] }
   0x2   :  { %v507_v1 = vld [vmem:[%s649_s1 + $0x78] sm:$0xff]  ;;  %250 = vmatpush.bf16.xpose.msra.mxu0 %v499_v0  ;;  %516 = vmatpush.bf16.xpose.msra.mxu3 %v499_v0  ;;  %v506_v4 = vld [vmem:[%s649_s1 + $0x70] sm:$0xff]  ;;  %v505_v7 = vld [vmem:[%s649_s1 + $0x68] sm:$0xff] }
   0x3   :  { %v515_v2 = vld [vmem:[%s649_s1 + $0xb8] sm:$0xff]  ;;  %269 = vmatpush.bf16.xpose.msra.mxu1 %v507_v1  ;;  %v514_v5 = vld [vmem:[%s649_s1 + $0xb0] sm:$0xff]  ;;  %v513_v8 = vld [vmem:[%s649_s1 + $0xa8] sm:$0xff] }
   0x4   :  { %288 = vmatpush.bf16.xpose.msra.mxu2 %v515_v2  ;;  %v496_v9 = vld [vmem:[%s649_s1 + $0x20] sm:$0xff]  ;;  %v495_v12 = vld [vmem:[%s649_s1 + $0x18] sm:$0xff]  ;;  %v494_v15 = vld [vmem:[%s649_s1 + $0x10] sm:$0xff] }
   0x5   :  { %v504_v10 = vld [vmem:[%s649_s1 + $0x60] sm:$0xff]  ;;  %v503_v13 = vld [vmem:[%s649_s1 + $0x58] sm:$0xff]  ;;  %v502_v16 = vld [vmem:[%s649_s1 + $0x50] sm:$0xff] }
   0x6   :  { %v512_v11 = vld [vmem:[%s649_s1 + $0xa0] sm:$0xff]  ;;  %v511_v14 = vld [vmem:[%s649_s1 + $0x98] sm:$0xff]  ;;  %v510_v17 = vld [vmem:[%s649_s1 + $0x90] sm:$0xff] }
   0x7   :  { %v493_v18 = vld [vmem:[%s649_s1 + $0x8] sm:$0xff]  ;;  %v492_v21 = vld [vmem:[%s649_s1] sm:$0xff] }
   0x8   :  { %v501_v19 = vld [vmem:[%s649_s1 + $0x48] sm:$0xff]  ;;  %v500_v22 = vld [vmem:[%s649_s1 + $0x40] sm:$0xff] }
   0x9   :  { %v509_v20 = vld [vmem:[%s649_s1 + $0x88] sm:$0xff]  ;;  %v508_v23 = vld [vmem:[%s649_s1 + $0x80] sm:$0xff] }
   0xa   :  { %251 = vmatpush.bf16.xpose.msra.mxu0 %v498_v3  ;;  %517 = vmatpush.bf16.xpose.msra.mxu3 %v498_v3  ;;  %v490_v24 = vld [vmem:[%s650_s0] sm:$0xff]  ;;  %v491_v25 = vld [vmem:[%s650_s0 + $0x8] sm:$0xff] }
   0xb   :  { %270 = vmatpush.bf16.xpose.msra.mxu1 %v506_v4  ;;  %v346_v26 = vld [vmem:[%s651_s2] sm:$0x7] }
   0xc   :  { %289 = vmatpush.bf16.xpose.msra.mxu2 %v514_v5  ;;  %v348_v27 = vperm.slane %v346_v26, 0  ;;  %v349_v28 = vperm.slane %v346_v26, 1  ;;  %v350_v34 = vperm.slane %v346_v26, 2 }
  0x12   :  { %252 = vmatpush.bf16.xpose.msra.mxu0 %v497_v6  ;;  %518 = vmatpush.bf16.xpose.msra.mxu3 %v497_v6 }
  0x13   :  { %271 = vmatpush.bf16.xpose.msra.mxu1 %v505_v7 }
  0x14   :  { %290 = vmatpush.bf16.xpose.msra.mxu2 %v513_v8 }
  0x1a   :  { %253 = vmatpush.bf16.xpose.msra.mxu0 %v496_v9  ;;  %519 = vmatpush.bf16.xpose.msra.mxu3 %v496_v9 }
  0x1b   :  { %272 = vmatpush.bf16.xpose.msra.mxu1 %v504_v10 }
  0x1c   :  { %291 = vmatpush.bf16.xpose.msra.mxu2 %v512_v11 }
  0x22   :  { %254 = vmatpush.bf16.xpose.msra.mxu0 %v495_v12  ;;  %520 = vmatpush.bf16.xpose.msra.mxu3 %v495_v12 }
  0x23   :  { %273 = vmatpush.bf16.xpose.msra.mxu1 %v503_v13 }
  0x24   :  { %292 = vmatpush.bf16.xpose.msra.mxu2 %v511_v14 }
  0x2a   :  { %255 = vmatpush.bf16.xpose.msra.mxu0 %v494_v15  ;;  %521 = vmatpush.bf16.xpose.msra.mxu3 %v494_v15 }
  0x2b   :  { %274 = vmatpush.bf16.xpose.msra.mxu1 %v502_v16 }
  0x2c   :  { %293 = vmatpush.bf16.xpose.msra.mxu2 %v510_v17 }
  0x32   :  { %256 = vmatpush.bf16.xpose.msra.mxu0 %v493_v18  ;;  %522 = vmatpush.bf16.xpose.msra.mxu3 %v493_v18 }
  0x33   :  { %275 = vmatpush.bf16.xpose.msra.mxu1 %v501_v19 }
  0x34   :  { %294 = vmatpush.bf16.xpose.msra.mxu2 %v509_v20 }
  0x3a   :  { %257 = vmatpush.bf16.xpose.msra.mxu0 %v492_v21  ;;  %523 = vmatpush.bf16.xpose.msra.mxu3 %v492_v21 }
  0x3b   :  { %276 = vmatpush.bf16.xpose.msra.mxu1 %v500_v22 }
  0x3c   :  { %295 = vmatpush.bf16.xpose.msra.mxu2 %v508_v23 }
  0x41   :  { %258 = vmatmul.bf16.vlgmr.msra.gmra.mxu0 %v490_v24  ;;  %263 = vmatmul.bf16.vlgmr.msra.gmra.mxu3 %v491_v25 }
  0x42   :  { %277 = vmatmul.bf16.vlgmr.msra.gmra.mxu1 %v490_v24 }
  0x43   :  { %296 = vmatmul.bf16.vlgmr.msra.gmra.mxu2 %v490_v24 }
  0x52   :  { %282 = vmatmul.bf16.gmra.mxu1 %v491_v25 }
  0x53   :  { %301 = vmatmul.bf16.gmra.mxu2 %v491_v25 }
  0xbe   :  { %v259_v29 = vpop.f32.mrf.mxu0 }
  0xbf   :  { %v278_v30 = vpop.f32.mrf.mxu1  ;;  %v354_v31 = vadd.f32 %v348_v27, %v259_v29 }
  0xc0   :  { %v355_v32 = vadd.f32 %v349_v28, %v278_v30 }
  0xc2   :  { %v366_v33 = vpack.c.bf16 %v355_v32, %v354_v31 }
  0xc4   :  { %374 = vst [vmem:[%s652_s3] sm:$0xff] %v366_v33  ;;  %v264_v43 = vpop.f32.mrf.mxu3 }
  0xc5   :  { %v360_v44 = vadd.f32 %v348_v27, %v264_v43 }
  0xc6   :  { %v297_v35 = vpop.f32.mrf.mxu2  ;;  %v261_v37 = vpop.f32.mrf.mxu0 }
  0xc7   :  { %v356_v36 = vadd.f32 %v350_v34, %v297_v35  ;;  %v280_v38 = vpop.f32.mrf.mxu1  ;;  %v357_v39 = vadd.f32 %v348_v27, %v261_v37 }
  0xc8   :  { %v358_v40 = vadd.f32 %v349_v28, %v280_v38 }
  0xc9   :  { %v367_v41 = vpack.c.bf16 %v356_v36, %v356_v36 }
  0xca   :  { %v368_v42 = vpack.c.bf16 %v358_v40, %v357_v39 }
  0xcb   :  { %375 = vst [vmem:[%s652_s3 + $0x8] sm:$0xf] %v367_v41 }
  0xcc   :  { %376 = vst [vmem:[%s652_s3 + $0xc] sm:$0xff] %v368_v42  ;;  %v266_v51 = vpop.f32.mrf.mxu3 }
  0xcd   :  { %v363_v55 = vadd.f32 %v348_v27, %v266_v51 }
  0xce   :  { %v299_v45 = vpop.f32.mrf.mxu2 }
  0xcf   :  { %v359_v46 = vadd.f32 %v350_v34, %v299_v45  ;;  %v283_v47 = vpop.f32.mrf.mxu1 }
  0xd0   :  { %v361_v48 = vadd.f32 %v349_v28, %v283_v47 }
  0xd1   :  { %v369_v49 = vpack.c.bf16 %v359_v46, %v359_v46 }
  0xd2   :  { %v370_v50 = vpack.c.bf16 %v361_v48, %v360_v44 }
  0xd3   :  { %377 = vst [vmem:[%s652_s3 + $0x14] sm:$0xf] %v369_v49 }
  0xd4   :  { %378 = vst [vmem:[%s652_s3 + $0x18] sm:$0xff] %v370_v50 }
  0xd6   :  { %v302_v52 = vpop.f32.mrf.mxu2 }
  0xd7   :  { %v362_v53 = vadd.f32 %v350_v34, %v302_v52  ;;  %v285_v54 = vpop.f32.mrf.mxu1 }
  0xd8   :  { %v364_v56 = vadd.f32 %v349_v28, %v285_v54 }
  0xd9   :  { %v371_v57 = vpack.c.bf16 %v362_v53, %v362_v53 }
  0xda   :  { %v372_v58 = vpack.c.bf16 %v364_v56, %v363_v55 }
  0xdb   :  { %379 = vst [vmem:[%s652_s3 + $0x20] sm:$0xf] %v371_v57 }
  0xdc   :  { %380 = vst [vmem:[%s652_s3 + $0x24] sm:$0xff] %v372_v58 }
  0xde   :  { %v304_v59 = vpop.f32.mrf.mxu2 }
  0xdf   :  { %v365_v60 = vadd.f32 %v350_v34, %v304_v59 }
  0xe1   :  { %v373_v61 = vpack.c.bf16 %v365_v60, %v365_v60 }
  0xe3   :  { %381 = vst [vmem:[%s652_s3 + $0x2c] sm:$0xf] %v373_v61 }

// kernel: seq2seq_unixcoder_forward.29
= control target key start
LH: loop header
LB: loop body
LE: loop exit
PB: predicated region body
PF: predicated region fallthrough
CT: control target
= control target key end

     0   :  { %v376_v29 = vmov 128.0   ;;  %s483_s1 = inlined_call_operand.vmem [shape: bf16[128,128], index: 1, kind: input, shape index: {}]   ;;  %s484_s2 = inlined_call_operand.vmem [shape: f32[1,128], index: 2, kind: input, shape index: {}]   ;;  %s485_s0 = inlined_call_operand.vmem [shape: bf16[32,128], index: 0, kind: input, shape index: {}]   ;;  %s486_s3 = inlined_call_operand.vmem [shape: bf16[32,128], index: 3, kind: input, shape index: {}]   ;;  %s487_s4 = inlined_call_operand.vmem [shape: f32[1,128], index: 4, kind: input, shape index: {}]   ;;  %s488_s5 = inlined_call_operand.vmem [shape: f32[1,128], index: 5, kind: input, shape index: {}]   ;;  %s489_s6 = inlined_call_operand.vmem [shape: bf16[32,128], index: 6, kind: output, shape index: {}]  }
   0x1   :  { %v333_v0 = vld [vmem:[%s483_s1 + $0x38] sm:$0xff]  ;;  %v332_v1 = vld [vmem:[%s483_s1 + $0x30] sm:$0xff]  ;;  %v331_v2 = vld [vmem:[%s483_s1 + $0x28] sm:$0xff]  ;;  %366 = vrcp.f32 %v376_v29 }
   0x2   :  { %115 = vmatpush.bf16.xpose.msra.mxu0 %v333_v0  ;;  %354 = vmatpush.bf16.xpose.msra.mxu1 %v333_v0  ;;  %v330_v3 = vld [vmem:[%s483_s1 + $0x20] sm:$0xff]  ;;  %v329_v4 = vld [vmem:[%s483_s1 + $0x18] sm:$0xff]  ;;  %v328_v5 = vld [vmem:[%s483_s1 + $0x10] sm:$0xff] }
   0x3   :  { %v327_v6 = vld [vmem:[%s483_s1 + $0x8] sm:$0xff]  ;;  %v326_v7 = vld [vmem:[%s483_s1] sm:$0xff] }
   0x4   :  { %v324_v8 = vld [vmem:[%s485_s0] sm:$0xff]  ;;  %v325_v9 = vld [vmem:[%s485_s0 + $0x8] sm:$0xff] }
   0x5   :  { %v352_v10 = vld [vmem:[%s486_s3 + $0x8] sm:$0xff]   ;;  %v335_v11 = vld [vmem:[%s486_s3] sm:$0xff]  }
   0x6   :  { %v363_v12 = vld [vmem:[%s484_s2] ss:$0 sm:$0xff]  ;;  %v340_v13 = vunpack.c.l.bf16 %v352_v10  ;;  %v336_v14 = vunpack.c.l.bf16 %v335_v11  ;;  %v341_v21 = vunpack.c.h.bf16 %v352_v10  ;;  %v337_v22 = vunpack.c.h.bf16 %v335_v11 }
   0x7   :  { %v367_v30 = vpop.eup %366 }
   0x8   :  { %v178_v31 = vmul.f32 128.0, %v367_v30  ;;  %vm182_vm0 = vweird.f32 %v367_v30 }
   0xa   :  { %116 = vmatpush.bf16.xpose.msra.mxu0 %v332_v1  ;;  %355 = vmatpush.bf16.xpose.msra.mxu1 %v332_v1  ;;  %v179_v32 = vsub.f32 1.0, %v178_v31 }
   0xc   :  { %v180_v33 = vmul.f32 %v367_v30, %v179_v32 }
   0xe   :  { %v181_v34 = vadd.f32 %v367_v30, %v180_v33 }
  0x10   :  { %v183_v35 = vsel %vm182_vm0, %v367_v30, %v181_v34  ;;  %v365_v30 = vld [vmem:[%s488_s5] ss:$0 sm:$0xff] }
  0x12   :  { %117 = vmatpush.bf16.xpose.msra.mxu0 %v331_v2  ;;  %356 = vmatpush.bf16.xpose.msra.mxu1 %v331_v2 }
  0x1a   :  { %118 = vmatpush.bf16.xpose.msra.mxu0 %v330_v3  ;;  %357 = vmatpush.bf16.xpose.msra.mxu1 %v330_v3 }
  0x22   :  { %119 = vmatpush.bf16.xpose.msra.mxu0 %v329_v4  ;;  %358 = vmatpush.bf16.xpose.msra.mxu1 %v329_v4 }
  0x2a   :  { %120 = vmatpush.bf16.xpose.msra.mxu0 %v328_v5  ;;  %359 = vmatpush.bf16.xpose.msra.mxu1 %v328_v5 }
  0x32   :  { %121 = vmatpush.bf16.xpose.msra.mxu0 %v327_v6  ;;  %360 = vmatpush.bf16.xpose.msra.mxu1 %v327_v6 }
  0x3a   :  { %122 = vmatpush.bf16.xpose.msra.mxu0 %v326_v7  ;;  %361 = vmatpush.bf16.xpose.msra.mxu1 %v326_v7 }
  0x41   :  { %123 = vmatmul.bf16.vlgmr.msra.gmra.mxu0 %v324_v8  ;;  %128 = vmatmul.bf16.vlgmr.msra.gmra.mxu1 %v325_v9 }
  0xbe   :  { %v124_v15 = vpop.f32.mrf.mxu0  ;;  %v129_v16 = vpop.f32.mrf.mxu1 }
  0xbf   :  { %v153_v17 = vadd.f32 %v363_v12, %v124_v15  ;;  %v155_v18 = vadd.f32 %v363_v12, %v129_v16 }
  0xc1   :  { %v167_v19 = vadd.f32 %v340_v13, %v155_v18  ;;  %v165_v20 = vadd.f32 %v336_v14, %v153_v17 }
  0xc3   :  { %173 = vadd.xlane.f32.xlu1 %v167_v19  ;;  %169 = vadd.xlane.f32.xlu0 %v165_v20 }
  0xc6   :  { %v126_v23 = vpop.f32.mrf.mxu0  ;;  %v131_v24 = vpop.f32.mrf.mxu1 }
  0xc7   :  { %v154_v25 = vadd.f32 %v363_v12, %v126_v23  ;;  %v156_v26 = vadd.f32 %v363_v12, %v131_v24  ;;  %v364_v23 = vld [vmem:[%s487_s4] ss:$0 sm:$0xff] }
  0xc9   :  { %v168_v27 = vadd.f32 %v341_v21, %v156_v26  ;;  %v166_v28 = vadd.f32 %v337_v22, %v154_v25 }
  0xcb   :  { %175 = vadd.xlane.f32.xlu1 %v168_v27  ;;  %171 = vadd.xlane.f32.xlu0 %v166_v28 }
 0x136   :  { %v174_v36 = vpop.xlane.xlu1 %173  ;;  %v170_v37 = vpop.xlane.xlu0 %169 }
 0x137   :  { %v186_v38 = vmul.f32 %v183_v35, %v174_v36  ;;  %v184_v39 = vmul.f32 %v183_v35, %v170_v37 }
 0x139   :  { %v451_v40 = vsub.f32 %v167_v19, %v186_v38  ;;  %v453_v41 = vsub.f32 %v165_v20, %v184_v39 }
 0x13b   :  { %v192_v42 = vmul.f32 %v453_v41, %v453_v41  ;;  %v194_v43 = vmul.f32 %v451_v40, %v451_v40 }
 0x13d   :  { %196 = vadd.xlane.f32.xlu2 %v192_v42  ;;  %200 = vadd.xlane.f32.xlu0 %v194_v43 }
 0x13e   :  { %v176_v44 = vpop.xlane.xlu1 %175  ;;  %v172_v45 = vpop.xlane.xlu0 %171 }
 0x13f   :  { %v187_v46 = vmul.f32 %v183_v35, %v176_v44  ;;  %v185_v47 = vmul.f32 %v183_v35, %v172_v45 }
 0x141   :  { %v459_v48 = vsub.f32 %v168_v27, %v187_v46  ;;  %v461_v49 = vsub.f32 %v166_v28, %v185_v47 }
 0x143   :  { %v195_v50 = vmul.f32 %v459_v48, %v459_v48  ;;  %v193_v51 = vmul.f32 %v461_v49, %v461_v49 }
 0x145   :  { %202 = vadd.xlane.f32.xlu1 %v195_v50  ;;  %198 = vadd.xlane.f32.xlu2 %v193_v51 }
 0x1b0   :  { %v197_v52 = vpop.xlane.xlu2 %196  ;;  %v201_v53 = vpop.xlane.xlu0 %200 }
 0x1b1   :  { %v204_v54 = vmul.f32 %v197_v52, %v183_v35  ;;  %v206_v55 = vmul.f32 %v201_v53, %v183_v35 }
 0x1b3   :  { %v208_v56 = vadd.f32 1e-05, %v204_v54  ;;  %v210_v57 = vadd.f32 1e-05, %v206_v55 }
 0x1b5   :  { %368 = vrsqrt.f32 %v208_v56  ;;  %vm238_vm3 = vweird.f32 %v210_v57  ;;  %vm218_vm4 = vweird.f32 %v208_v56 }
 0x1b6   :  { %370 = vrsqrt.f32 %v210_v57 }
 0x1b8   :  { %v203_v58 = vpop.xlane.xlu1 %202  ;;  %v199_v59 = vpop.xlane.xlu2 %198 }
 0x1b9   :  { %v207_v60 = vmul.f32 %v203_v58, %v183_v35  ;;  %v205_v61 = vmul.f32 %v199_v59, %v183_v35 }
 0x1bb   :  { %v369_v62 = vpop.eup %368  ;;  %v211_v63 = vadd.f32 1e-05, %v207_v60  ;;  %v209_v0 = vadd.f32 1e-05, %v205_v61 }
 0x1bc   :  { %v371_v1 = vpop.eup %370  ;;  %v213_v2 = vmul.f32 %v369_v62, %v208_v56  ;;  %vm219_vm2 = vweird.f32 %v369_v62 }
 0x1bd   :  { %v233_v3 = vmul.f32 %v371_v1, %v210_v57  ;;  %372 = vrsqrt.f32 %v211_v63  ;;  %vm239_vm1 = vweird.f32 %v371_v1  ;;  %vm220_vm6 = vmor %vm218_vm4, %vm219_vm2  ;;  %vm248_vm9 = vweird.f32 %v211_v63 }
 0x1be   :  { %v214_v4 = vmul.f32 %v369_v62, %v213_v2  ;;  %374 = vrsqrt.f32 %v209_v0  ;;  %vm240_vm5 = vmor %vm238_vm3, %vm239_vm1  ;;  %vm228_vm11 = vweird.f32 %v209_v0 }
 0x1bf   :  { %v234_v5 = vmul.f32 %v371_v1, %v233_v3 }
 0x1c0   :  { %v215_v6 = vmul.f32 0.5, %v214_v4 }
 0x1c1   :  { %v235_v7 = vmul.f32 0.5, %v234_v5 }
 0x1c2   :  { %v216_v8 = vsub.f32 1.5, %v215_v6 }
 0x1c3   :  { %v373_v9 = vpop.eup %372  ;;  %v236_v10 = vsub.f32 1.5, %v235_v7 }
 0x1c4   :  { %v375_v11 = vpop.eup %374  ;;  %v243_v12 = vmul.f32 %v373_v9, %v211_v63  ;;  %v217_v13 = vmul.f32 %v369_v62, %v216_v8  ;;  %vm249_vm7 = vweird.f32 %v373_v9 }
 0x1c5   :  { %v237_v14 = vmul.f32 %v371_v1, %v236_v10  ;;  %v223_v15 = vmul.f32 %v375_v11, %v209_v0  ;;  %vm229_vm8 = vweird.f32 %v375_v11  ;;  %vm250_vm10 = vmor %vm248_vm9, %vm249_vm7 }
 0x1c6   :  { %v244_v16 = vmul.f32 %v373_v9, %v243_v12  ;;  %v221_v20 = vsel %vm220_vm6, %v369_v62, %v217_v13  ;;  %vm230_vm12 = vmor %vm228_vm11, %vm229_vm8 }
 0x1c7   :  { %v224_v17 = vmul.f32 %v375_v11, %v223_v15  ;;  %v241_v18 = vsel %vm240_vm5, %v371_v1, %v237_v14  ;;  %v252_v26 = vmul.f32 %v221_v20, %v453_v41 }
 0x1c8   :  { %v245_v19 = vmul.f32 0.5, %v244_v16  ;;  %v254_v24 = vmul.f32 %v241_v18, %v451_v40 }
 0x1c9   :  { %v225_v21 = vmul.f32 0.5, %v224_v17  ;;  %v260_v34 = vmul.f32 %v364_v23, %v252_v26 }
 0x1ca   :  { %v246_v22 = vsub.f32 1.5, %v245_v19  ;;  %v262_v31 = vmul.f32 %v364_v23, %v254_v24 }
 0x1cb   :  { %v226_v25 = vsub.f32 1.5, %v225_v21  ;;  %v268_v40 = vadd.f32 %v365_v30, %v260_v34 }
 0x1cc   :  { %v247_v27 = vmul.f32 %v373_v9, %v246_v22  ;;  %v270_v38 = vadd.f32 %v365_v30, %v262_v31 }
 0x1cd   :  { %v227_v28 = vmul.f32 %v375_v11, %v226_v25 }
 0x1ce   :  { %v251_v29 = vsel %vm250_vm10, %v373_v9, %v247_v27 }
 0x1cf   :  { %v255_v32 = vmul.f32 %v251_v29, %v459_v48  ;;  %v231_v33 = vsel %vm230_vm12, %v375_v11, %v227_v28 }
 0x1d0   :  { %v253_v35 = vmul.f32 %v231_v33, %v461_v49 }
 0x1d1   :  { %v263_v36 = vmul.f32 %v364_v23, %v255_v32 }
 0x1d2   :  { %v261_v37 = vmul.f32 %v364_v23, %v253_v35 }
 0x1d3   :  { %v271_v39 = vadd.f32 %v365_v30, %v263_v36 }
 0x1d4   :  { %v269_v41 = vadd.f32 %v365_v30, %v261_v37 }
 0x1d5   :  { %v350_v42 = vpack.c.bf16 %v271_v39, %v270_v38 }
 0x1d6   :  { %v345_v43 = vpack.c.bf16 %v269_v41, %v268_v40 }
 0x1d7   :  { %353 = vst [vmem:[%s489_s6 + $0x8] sm:$0xff] %v350_v42  }
 0x1d8   :  { %346 = vst [vmem:[%s489_s6] sm:$0xff] %v345_v43  }

// kernel: seq2seq_unixcoder_forward.28
= control target key start
LH: loop header
LB: loop body
LE: loop exit
PB: predicated region body
PF: predicated region fallthrough
CT: control target
= control target key end

     0   :  { %s1922_s24 = smov 0   ;;  %s1924_s25 = smov 0   ;;  %s2269_s0 = inlined_call_operand.vmem [shape: bf16[2,16,384], index: 0, kind: input, shape index: {}, may-alias: {0,3,4}]   ;;  %s2270_s1 = inlined_call_operand.vmem [shape: bf16[2,16,384], index: 1, kind: input, shape index: {}, may-alias: {1,2}]   ;;  %s2271_s2 = inlined_call_operand.vmem [shape: bf16[2,16,384], index: 2, kind: input, shape index: {}, may-alias: {1,2}]   ;;  %s2272_s3 = inlined_call_operand.vmem [shape: bf16[2,16,384], index: 3, kind: input, shape index: {}, may-alias: {0,3,4}]   ;;  %s2273_s4 = inlined_call_operand.vmem [shape: bf16[2,16,384], index: 4, kind: input, shape index: {}, may-alias: {0,3,4}]   ;;  %s2274_s5 = inlined_call_operand.vmem [shape: s32[2,1,16], index: 5, kind: input, shape index: {}]   ;;  %s2275_s6 = inlined_call_operand.vmem [shape: s32[2,1,16], index: 6, kind: input, shape index: {}]   ;;  %s2276_s7 = inlined_call_operand.vmem [shape: bf16[2,16,128], index: 7, kind: output, shape index: {}]  }
   0x1   :  { %s1926_s26 = smov 0   ;;  %s1928_s27 = smov 0  }
   0x2   :  { %s1930_s28 = smov 0  }
   0x3 LB: > { %s29_s29 = sadd.s32 1, %s1872_s27  ;;  %p45_p1 = scmp.ne.s32.totalorder %s1864_s25, %s1860_s24  ;;  %s1876_s28 = sphi %s1930_s28, %s17_s28   ;;  %s1872_s27 = sphi %s1928_s27, %s2289_s27   ;;  %s1868_s26 = sphi %s1926_s26, %s2288_s26   ;;  %s1864_s25 = sphi %s1924_s25, %s2287_s25   ;;  %s1860_s24 = sphi %s1922_s24, %s2286_s24  }
   0x4   : > { %p31_p0 = scmp.ge.s32.totalorder %s29_s29, 2  ;;  %p46_p2 = scmp.eq.s32.totalorder %s1876_s28, 0 }
   0x5   : > { %s38_s9 = sadd.s32 1, %s1864_s25  ;;  %p1599_p5 = scmp.ge.s32.totalorder %s1876_s28, 2 }
   0x6   : > { %s2291_s29 = smov (%p31_p0, %s29_s29), 0  ;;  %p1953_p3 = por %p46_p2, %p45_p1 }
   0x7   : > { %s33_s8 = ssub.s32 %s1872_s27, %s2291_s29  ;;  %255 = sbr.rel (%p1599_p5) target bundleno = 47 (0x2f), region = 16 }
   0x8   : > { %p36_p4 = scmp.eq.s32.totalorder %s33_s8, 0 }
   0xa   : > { %s1961_s10 = scalar_select %p36_p4, %s1864_s25, %s38_s9  }
   0xc   : > { %258 = sbr.rel (!%p1953_p3) target bundleno = 19 (0x13), region = 20  ;;  %s260_s11 = sand.u32 (%p1953_p3), 1, %s1864_s25  }
   0xd   : > { %s1745_s12 = smul.u32 (%p1953_p3), 24, %s1872_s27  ;;  %s1600_s13 = sshll.u32 (%p1953_p3), %s260_s11, 3 }
   0xe   : > { %s262_s17 = scalar_lea.vmem (%p1953_p3), [#allocation2], %s1600_s13 }
   0xf   : > { %s268_s16 = scalar_lea.vmem (%p1953_p3), %s2269_s0, %s1745_s12 }
  0x10   : > { %v285_v0 = vld [vmem:[%s268_s16] sm:$0xf] (%p1953_p3)  ;;  %v287_v1 = vld [vmem:[%s268_s16 + $0xc] sm:$0xf] (%p1953_p3) }
  0x11   : > { %286 = vst [vmem:[%s262_s17] sm:$0xf] %v285_v0 }
  0x12   : > { %288 = vst [vmem:[%s262_s17 + $0x4] sm:$0xf] %v287_v1 }
  0x13 PF: > { %316 = sbr.rel (!%p1953_p3) target bundleno = 26 (0x1a), region = 61  ;;  %s318_s18 = sand.u32 (%p1953_p3), 1, %s1864_s25  }
  0x14   : > { %s1603_s19 = smul.u32 (%p1953_p3), 24, %s1872_s27  ;;  %s1602_s20 = sshll.u32 (%p1953_p3), %s318_s18, 3 }
  0x15   : > { %s320_s8 = scalar_lea.vmem (%p1953_p3), [#allocation3], %s1602_s20 }
  0x16   : > { %s1449_s23 = scalar_lea.vmem (%p1953_p3), %s2270_s1, %s1603_s19 }
  0x17   : > { %v1604_v2 = vld [vmem:[%s1449_s23 + $0x4] sm:$0xf] (%p1953_p3)  ;;  %v1605_v3 = vld [vmem:[%s1449_s23 + $0x10] sm:$0xf] (%p1953_p3) }
  0x18   : > { %342 = vst [vmem:[%s320_s8] sm:$0xf] %v1604_v2 }
  0x19   : > { %344 = vst [vmem:[%s320_s8 + $0x4] sm:$0xf] %v1605_v3 }
  0x1a PF: > { %372 = sbr.rel (!%p1953_p3) target bundleno = 33 (0x21), region = 102  ;;  %s374_s9 = sand.u32 (%p1953_p3), 1, %s1864_s25  }
  0x1b   : > { %s1607_s11 = smul.u32 (%p1953_p3), 24, %s1872_s27  ;;  %s1606_s12 = sshll.u32 (%p1953_p3), %s374_s9, 3 }
  0x1c   : > { %s376_s16 = scalar_lea.vmem (%p1953_p3), [#allocation4], %s1606_s12 }
  0x1d   : > { %s1455_s15 = scalar_lea.vmem (%p1953_p3), %s2271_s2, %s1607_s11 }
  0x1e   : > { %v1608_v4 = vld [vmem:[%s1455_s15 + $0x8] sm:$0xf] (%p1953_p3)  ;;  %v1609_v5 = vld [vmem:[%s1455_s15 + $0x14] sm:$0xf] (%p1953_p3) }
  0x1f   : > { %398 = vst [vmem:[%s376_s16] sm:$0xf] %v1608_v4 }
  0x20   : > { %400 = vst [vmem:[%s376_s16 + $0x4] sm:$0xf] %v1609_v5 }
  0x21 PF: > { %428 = sbr.rel (!%p1953_p3) target bundleno = 40 (0x28), region = 143  ;;  %s430_s17 = sand.u32 (%p1953_p3), 1, %s1864_s25  }
  0x22   : > { %s1611_s18 = smul.u32 (%p1953_p3), 24, %s1872_s27  ;;  %s1610_s19 = sshll.u32 (%p1953_p3), %s430_s17, 3 }
  0x23   : > { %s432_s23 = scalar_lea.vmem (%p1953_p3), [#allocation5], %s1610_s19 }
  0x24   : > { %s1461_s22 = scalar_lea.vmem (%p1953_p3), %s2272_s3, %s1611_s18 }
  0x25   : > { %v1612_v6 = vld [vmem:[%s1461_s22 + $0x4] sm:$0xf] (%p1953_p3)  ;;  %v1613_v7 = vld [vmem:[%s1461_s22 + $0x10] sm:$0xf] (%p1953_p3) }
  0x26   : > { %454 = vst [vmem:[%s432_s23] sm:$0xf] %v1612_v6 }
  0x27   : > { %456 = vst [vmem:[%s432_s23 + $0x4] sm:$0xf] %v1613_v7 }
  0x28 PF: > { %484 = sbr.rel (!%p1953_p3) target bundleno = 47 (0x2f), region = 184  ;;  %s486_s8 = sand.u32 (%p1953_p3), 1, %s1864_s25  }
  0x29   : > { %s1615_s9 = smul.u32 (%p1953_p3), 24, %s1872_s27  ;;  %s1614_s11 = sshll.u32 (%p1953_p3), %s486_s8, 3 }
  0x2a   : > { %s488_s15 = scalar_lea.vmem (%p1953_p3), [#allocation6], %s1614_s11 }
  0x2b   : > { %s1467_s14 = scalar_lea.vmem (%p1953_p3), %s2273_s4, %s1615_s9 }
  0x2c   : > { %v1616_v8 = vld [vmem:[%s1467_s14 + $0x8] sm:$0xf] (%p1953_p3)  ;;  %v1617_v9 = vld [vmem:[%s1467_s14 + $0x14] sm:$0xf] (%p1953_p3) }
  0x2d   : > { %510 = vst [vmem:[%s488_s15] sm:$0xf] %v1616_v8 }
  0x2e   : > { %512 = vst [vmem:[%s488_s15 + $0x4] sm:$0xf] %v1617_v9 }
  0x2f PF: > { %p1618_p6 = scmp.ge.s32.totalorder %s1876_s28, 1  ;;  %p551_p7 = scmp.lt.s32.totalorder %s1876_s28, 3 }
  0x31   : > { %p552_p8 = pnand %p1618_p6, %p551_p7 }
  0x32   : > { %s558_s30 = sand.u32 (!%p552_p8), 1, %s1860_s24   ;;  %p644_p9 = scmp.lt.s32.totalorder (!%p552_p8), %s1868_s26, 1 }
  0x33   : > { %555 = sbr.rel (%p552_p8) target bundleno = 967 (0x3c7), region = 233  ;;  %s2002_s16 = sshll.u32 (!%p552_p8), %s558_s30, 3 }
  0x34   : > { %s2005_s17 = scalar_lea.vmem (!%p552_p8), [#allocation3], %s2002_s16  ;;  %s2009_s18 = scalar_lea.vmem (!%p552_p8), [#allocation5], %s2002_s16 }
  0x35   : > { %s2015_s24 = scalar_lea.vmem (!%p552_p8), [#allocation2], %s2002_s16  ;;  %s1878_s22 = smov (!%p552_p8), 96  }
  0x36   : > { %s1880_s11 = smov (!%p552_p8), 64   ;;  %s1881_s12 = smov (!%p552_p8), 32  }
  0x37   : > { %s2083_s13 = scalar_lea.vmem (!%p552_p8), [#allocation6], %s2002_s16  ;;  %s2087_s14 = scalar_lea.vmem (!%p552_p8), [#allocation4], %s2002_s16 }
  0x38   : > { %vm698_vm0 = vcmask 261120   ;;  %v1726_v10 = vld [vmem:[%s2005_s17] sm:$0xff]  ;;  %v1725_v14 = vld [vmem:[%s2015_s24] sm:$0xff]  ;;  %s2293_s26 = smov (!%p644_p9, %s1868_s26), 1  ;;  %v666_v18 = vlaneseq  ;;  %v1879_v19 = vmov 0   ;;  %vm751_vm7 = vcmask 130048  }
  0x39   : > { %v1727_v11 = vld [vmem:[%s2009_s18] sm:$0xff]  ;;  %v703_v12 = vsel %vm698_vm0, %v1726_v10, 0  ;;  %s649_s21 = scalar_lea.vmem %s2275_s6, %s2293_s26  ;;  %s646_s9 = scalar_lea.vmem %s2274_s5, %s2293_s26  ;;  %v1735_v49 = vld [vmem:[%s2015_s24] sm:$0xff]  ;;  %vm850_vm10 = vcmask 257024   ;;  %vm1035_vm11 = vcmask 519424   ;;  %vm1220_vm12 = vcmask 781824  }
  0x3a   : > { %v729_v13 = vsel %vm698_vm0, %v1727_v11, 0  ;;  %712 = vmatpush.bf16.xpose.msra.mxu0 %v703_v12  ;;  %v1731_v15 = vld [vmem:[%s2005_s17] sm:$0xff]  ;;  %v675_v16 = vld [vmem:[%s649_s21] sm:$0x1]  ;;  %v667_v22 = vshrl.u32 %v666_v18, 7  ;;  %v674_v23 = vand.u32 127, %v666_v18 }
  0x3b   : > { %738 = vmatpush.bf16.xpose.msra.mxu1 %v729_v13  ;;  %869 = vrot.lane.b32.xlu2 %v1731_v15, %s1878_s22  ;;  %v661_v17 = vld [vmem:[%s646_s9] sm:$0x1]  ;;  %vm676_vm1 = vcmp.ne.s32.totalorder %v675_v16, 0  ;;  %v1732_v38 = vld [vmem:[%s2009_s18] sm:$0xff]  ;;  %s1724_s15 = sshll.u32 %s2293_s26, 3  ;;  %vm1405_vm13 = vcmask 1044224  }
  0x3c   : > { %vm662_vm2 = vcmp.ne.s32.totalorder %v661_v17, 0  ;;  %v677_v20 = vsel %vm676_vm1, 1, %v1879_v19  ;;  %vm680_vm4 = vcmp.le.s32.totalorder %v674_v23, %v667_v22  ;;  %v668_v33 = vadd.s32 8, %v667_v22  ;;  %v1737_v48 = vld [vmem:[%s2009_s18] sm:$0xff]  ;;  %v1730_v51 = vld [vmem:[%s2015_s24] sm:$0xff] }
  0x3d   : > { %v663_v21 = vsel %vm662_vm2, 1, %v1879_v19  ;;  %v678_v24 = vperm.slane %v677_v20, 0  ;;  %v1741_v50 = vld [vmem:[%s2005_s17] sm:$0xff]  ;;  %v1740_v53 = vld [vmem:[%s2015_s24] sm:$0xff] }
  0x3e   : > { %v664_v25 = vperm.slane %v663_v21, 0  ;;  %vm681_vm8 = vcmp.le.s32.totalorder %v674_v23, %v668_v33  ;;  %v1736_v52 = vld [vmem:[%s2005_s17] sm:$0xff]  ;;  %v1729_v56 = vld [vmem:[%s2083_s13] sm:$0xff]  ;;  %s658_s17 = scalar_lea.vmem %s2276_s7, %s1724_s15 }
  0x3f   : > { %vm2034_vm3 = vcmp.eq.s32.totalorder %v678_v24, 1  ;;  %v1742_v54 = vld [vmem:[%s2009_s18] sm:$0xff]  ;;  %v1728_v57 = vld [vmem:[%s2087_s14] sm:$0xff]  ;;  %814 = vmatpush.bf16.msra.mxu2 %v1729_v56 }
  0x40   : > { %vm2038_vm5 = vcmp.eq.s32.totalorder %v664_v25, 1  ;;  %vm2044_vm6 = vmand %vm2034_vm3, %vm680_vm4  ;;  %837 = vmatpush.bf16.msra.mxu3 %v1728_v57 }
  0x41   : > { %1634 = vmatmul.msk.bf16.vlgmr.msra.gmra.mxu0 %vm698_vm0, %v1725_v14  ;;  %vm2057_vm9 = vmand %vm2034_vm3, %vm681_vm8 }
  0x42   : > { %1639 = vmatmul.msk.bf16.vlgmr.msra.gmra.mxu1 %vm698_vm0, %v1725_v14 }
  0x43   : > { %900 = vrot.lane.b32.xlu2 %v1732_v38, %s1878_s22 }
  0x4b   : > { %1085 = vrot.lane.b32.xlu2 %v1737_v48, %s1880_s11 }
  0x53   : > { %1047 = vrot.lane.b32.xlu2 %v1735_v49, %s1880_s11 }
  0x5b   : > { %1239 = vrot.lane.b32.xlu2 %v1741_v50, %s1881_s12 }
  0x63   : > { %1232 = vrot.lane.b32.xlu2 %v1740_v53, %s1881_s12 }
  0x95   : > { %v870_v55 = vpop.permute.xlu2 %869 }
  0x96   : > { %v875_v58 = vsel %vm698_vm0, %v870_v55, 0 }
  0x97   : > { %884 = vmatpush.bf16.xpose.msrb.mxu2 %v875_v58 }
  0x9d   : > { %v901_v59 = vpop.permute.xlu2 %900 }
  0x9e   : > { %v903_v60 = vsel %vm698_vm0, %v901_v59, 0 }
  0x9f   : > { %912 = vmatpush.bf16.xpose.msrb.mxu3 %v903_v60 }
  0xa5   : > { %v1086_v11 = vpop.permute.xlu2 %1085 }
  0xa6   : > { %v1088_v17 = vsel %vm698_vm0, %v1086_v11, 0 }
  0xad   : > { %v1048_v19 = vpop.permute.xlu2 %1047 }
  0xb5   : > { %v1240_v24 = vpop.permute.xlu2 %1239 }
  0xb6   : > { %v1245_v26 = vsel %vm698_vm0, %v1240_v24, 0  ;;  %v1744_v24 = vld [vmem:[%s2083_s13] sm:$0xff] }
  0xbe   : > { %v714_v27 = vpop.f32.mrf.mxu0 }
  0xbf   : > { %v740_v28 = vpop.f32.mrf.mxu1  ;;  %v719_v31 = vmul.f32 0.17677669, %v714_v27  ;;  %v1733_v27 = vld [vmem:[%s2087_s14] sm:$0xff] }
  0xc0   : > { %v745_v32 = vmul.f32 0.17677669, %v740_v28  ;;  %v1734_v28 = vld [vmem:[%s2083_s13] sm:$0xff]  ;;  %1001 = vrot.lane.b32.xlu2 %v1733_v27, %s1878_s22 }
  0xc1   : > { %v747_v35 = vsel %vm2038_vm5, %v719_v31, -1e+30  ;;  %v1739_v31 = vld [vmem:[%s2083_s13] sm:$0xff] }
  0xc2   : > { %v749_v34 = vsel %vm2044_vm6, %v745_v32, -1e+30  ;;  %v752_v37 = vsel %vm751_vm7, %v747_v35, -inf  ;;  %v1233_v32 = vpop.permute.xlu2 %1232 }
  0xc3   : > { %v758_v36 = vsel %vm751_vm7, %v749_v34, -inf  ;;  %753 = vmax.xlane.f32.xlu0 %v752_v37 }
  0xc4   : > { %759 = vmax.xlane.f32.xlu1 %v758_v36 }
  0xc6   : > { %v716_v39 = vpop.f32.mrf.mxu0 }
  0xc7   : > { %v742_v40 = vpop.f32.mrf.mxu1  ;;  %v720_v42 = vmul.f32 0.17677669, %v716_v39 }
  0xc8   : > { %v746_v43 = vmul.f32 0.17677669, %v742_v40  ;;  %1161 = vrot.lane.b32.xlu2 %v1739_v31, %s1880_s11 }
  0xc9   : > { %v748_v45 = vsel %vm2038_vm5, %v720_v42, -1e+30 }
  0xca   : > { %v750_v44 = vsel %vm2057_vm9, %v746_v43, -1e+30  ;;  %v755_v47 = vsel %vm751_vm7, %v748_v45, -inf }
  0xcb   : > { %v761_v46 = vsel %vm751_vm7, %v750_v44, -inf  ;;  %756 = vmax.xlane.f32.xlu0 %v755_v47 }
  0xcc   : > { %762 = vmax.xlane.f32.xlu1 %v761_v46 }
  0xdf   : > { %862 = vrot.lane.b32.xlu0 %v1730_v51, %s1878_s22 }
  0xe5   : > { %1054 = vrot.lane.b32.xlu1 %v1736_v52, %s1880_s11 }
  0xe7   : > { %1270 = vrot.lane.b32.xlu0 %v1742_v54, %s1881_s12 }
  0xef   : > { %976 = vrot.lane.b32.xlu0 %v1734_v28, %s1878_s22 }
 0x136   : > { %v754_v62 = vpop.xlane.xlu0 %753 }
 0x137   : > { %v760_v61 = vpop.xlane.xlu1 %759 }
 0x138   : > { %v764_v63 = vmax.f32 %v754_v62, %v760_v61 }
 0x13a   : > { %v766_v0 = vsub.f32 %v747_v35, %v764_v63  ;;  %v772_v1 = vsub.f32 %v749_v34, %v764_v63 }
 0x13c   : > { %v768_v4 = vmul.f32 1.442695, %v766_v0  ;;  %v774_v6 = vmul.f32 1.442695, %v772_v1 }
 0x13e   : > { %v757_v3 = vpop.xlane.xlu0 %756  ;;  %1790 = vpow2.f32 %v768_v4 }
 0x13f   : > { %v763_v2 = vpop.xlane.xlu1 %762  ;;  %1792 = vpow2.f32 %v774_v6  ;;  %v1002_v6 = vpop.permute.xlu2 %1001 }
 0x140   : > { %v765_v5 = vmax.f32 %v757_v3, %v763_v2  ;;  %1014 = vmatpush.bf16.msrb.mxu1 %v1002_v6 }
 0x142   : > { %v767_v7 = vsub.f32 %v748_v45, %v765_v5  ;;  %v773_v8 = vsub.f32 %v750_v44, %v765_v5 }
 0x144   : > { %v770_v9 = vmul.f32 1.442695, %v767_v7  ;;  %v776_v10 = vmul.f32 1.442695, %v773_v8  ;;  %v2092_v12 = vpop.eup %1790 }
 0x145   : > { %v2094_v13 = vpop.eup %1792 }
 0x146   : > { %1794 = vpow2.f32 %v770_v9 }
 0x147   : > { %1796 = vpow2.f32 %v776_v10  ;;  %v1162_v28 = vpop.permute.xlu2 %1161 }
 0x14c   : > { %v2096_v14 = vpop.eup %1794 }
 0x14d   : > { %v2098_v15 = vpop.eup %1796  ;;  %v792_v16 = vpack.c.bf16 %v2096_v14, %v2092_v12 }
 0x14e   : > { %v795_v18 = vpack.c.bf16 %v2098_v15, %v2094_v13 }
 0x14f   : > { %1649 = vmatmul.msk.bf16.vlgmr.msra.gmra.mxu3 %vm751_vm7, %v792_v16 }
 0x150   : > { %1644 = vmatmul.msk.bf16.vlgmr.msra.gmra.mxu2 %vm751_vm7, %v795_v18  ;;  %1097 = vmatpush.bf16.xpose.msra.mxu3 %v1088_v17 }
 0x151   : > { %v863_v20 = vpop.permute.xlu0 %862 }
 0x157   : > { %v1055_v21 = vpop.permute.xlu1 %1054 }
 0x158   : > { %v1060_v22 = vsel %vm698_vm0, %v1055_v21, 0 }
 0x159   : > { %1069 = vmatpush.bf16.xpose.msra.mxu2 %v1060_v22  ;;  %v1271_v23 = vpop.permute.xlu0 %1270 }
 0x15a   : > { %v1273_v25 = vsel %vm698_vm0, %v1271_v23, 0 }
 0x15f   : > { %1663 = vmatmul.msk.bf16.vlgmr.msrb.gmra.mxu3 %vm698_vm0, %v863_v20 }
 0x160   : > { %1658 = vmatmul.msk.bf16.vlgmr.msrb.gmra.mxu2 %vm698_vm0, %v863_v20  ;;  %1282 = vmatpush.bf16.xpose.msrb.mxu3 %v1273_v25  ;;  %v1738_v25 = vld [vmem:[%s2087_s14] sm:$0xff] }
 0x161   : > { %1254 = vmatpush.bf16.xpose.msrb.mxu2 %v1245_v26  ;;  %v1743_v26 = vld [vmem:[%s2087_s14] sm:$0xff]  ;;  %v977_v27 = vpop.permute.xlu0 %976 }
 0x162   : > { %989 = vmatpush.bf16.msrb.mxu0 %v977_v27 }
 0x166   : > { %1174 = vmatpush.bf16.msra.mxu0 %v1162_v28 }
 0x16f   : > { %1687 = vmatmul.msk.bf16.vlgmr.msra.gmra.mxu3 %vm698_vm0, %v1048_v19 }
 0x170   : > { %1682 = vmatmul.msk.bf16.vlgmr.msra.gmra.mxu2 %vm698_vm0, %v1048_v19 }
 0x17f   : > { %1711 = vmatmul.msk.bf16.vlgmr.msrb.gmra.mxu3 %vm698_vm0, %v1233_v32 }
 0x180   : > { %1706 = vmatmul.msk.bf16.vlgmr.msrb.gmra.mxu2 %vm698_vm0, %v1233_v32 }
 0x1d2   : > { %v839_v33 = vpop.f32.mrf.mxu3 }
 0x1d3   : > { %v816_v34 = vpop.f32.mrf.mxu2 }
 0x1d4   : > { %v2122_v35 = vadd.f32 %v839_v33, %v816_v34  ;;  %v778_v33 = vsel %vm751_vm7, %v2092_v12, 0.0 }
 0x1da   : > { %v841_v36 = vpop.f32.mrf.mxu3 }
 0x1db   : > { %v818_v37 = vpop.f32.mrf.mxu2 }
 0x1dc   : > { %v2124_v38 = vadd.f32 %v841_v36, %v818_v37 }
 0x1e2   : > { %v914_v39 = vpop.f32.mrf.mxu3 }
 0x1e3   : > { %v886_v40 = vpop.f32.mrf.mxu2  ;;  %v919_v42 = vmul.f32 0.17677669, %v914_v39 }
 0x1e4   : > { %v891_v43 = vmul.f32 0.17677669, %v886_v40 }
 0x1e5   : > { %v2128_v44 = vsel %vm2044_vm6, %v919_v42, -1e+30 }
 0x1e6   : > { %v931_v45 = vsel %vm751_vm7, %v2128_v44, -inf  ;;  %v2134_v46 = vsel %vm2038_vm5, %v891_v43, -1e+30 }
 0x1e7   : > { %932 = vmax.xlane.f32.xlu2 %v931_v45  ;;  %v925_v47 = vsel %vm751_vm7, %v2134_v46, -inf }
 0x1e8   : > { %926 = vmax.xlane.f32.xlu1 %v925_v47 }
 0x1ea   : > { %v916_v48 = vpop.f32.mrf.mxu3 }
 0x1eb   : > { %v888_v49 = vpop.f32.mrf.mxu2  ;;  %v920_v50 = vmul.f32 0.17677669, %v916_v48 }
 0x1ec   : > { %v892_v51 = vmul.f32 0.17677669, %v888_v49 }
 0x1ed   : > { %v2140_v52 = vsel %vm2057_vm9, %v920_v50, -1e+30 }
 0x1ee   : > { %v934_v53 = vsel %vm751_vm7, %v2140_v52, -inf  ;;  %v2146_v54 = vsel %vm2038_vm5, %v892_v51, -1e+30 }
 0x1ef   : > { %v928_v55 = vsel %vm751_vm7, %v2146_v54, -inf }
 0x1f0   : > { %935 = vmax.xlane.f32.xlu1 %v934_v53  ;;  %929 = vmax.xlane.f32.xlu0 %v928_v55 }
 0x1f2   : > { %v1099_v56 = vpop.f32.mrf.mxu3 }
 0x1f3   : > { %v1071_v57 = vpop.f32.mrf.mxu2  ;;  %v1104_v58 = vmul.f32 0.17677669, %v1099_v56 }
 0x1f4   : > { %v1076_v59 = vmul.f32 0.17677669, %v1071_v57 }
 0x1f5   : > { %v2152_v60 = vsel %vm2044_vm6, %v1104_v58, -1e+30 }
 0x1f6   : > { %v2156_v61 = vsel %vm2038_vm5, %v1076_v59, -1e+30  ;;  %v1116_v62 = vsel %vm751_vm7, %v2152_v60, -inf }
 0x1f7   : > { %v1110_v63 = vsel %vm751_vm7, %v2156_v61, -inf }
 0x1f8   : > { %1111 = vmax.xlane.f32.xlu1 %v1110_v63  ;;  %1117 = vmax.xlane.f32.xlu0 %v1116_v62 }
 0x1fa   : > { %v1101_v0 = vpop.f32.mrf.mxu3 }
 0x1fb   : > { %v1073_v1 = vpop.f32.mrf.mxu2  ;;  %v1105_v5 = vmul.f32 0.17677669, %v1101_v0 }
 0x1fc   : > { %v1077_v2 = vmul.f32 0.17677669, %v1073_v1 }
 0x1fd   : > { %v2170_v11 = vsel %vm2057_vm9, %v1105_v5, -1e+30 }
 0x1fe   : > { %v2164_v3 = vsel %vm2038_vm5, %v1077_v2, -1e+30  ;;  %v1119_v20 = vsel %vm751_vm7, %v2170_v11, -inf }
 0x1ff   : > { %v1113_v4 = vsel %vm751_vm7, %v2164_v3, -inf }
 0x200   : > { %1114 = vmax.xlane.f32.xlu1 %v1113_v4 }
 0x202   : > { %v1284_v7 = vpop.f32.mrf.mxu3 }
 0x203   : > { %v1256_v8 = vpop.f32.mrf.mxu2  ;;  %v1289_v9 = vmul.f32 0.17677669, %v1284_v7 }
 0x204   : > { %v1261_v10 = vmul.f32 0.17677669, %v1256_v8 }
 0x205   : > { %v2174_v16 = vsel %vm2044_vm6, %v1289_v9, -1e+30 }
 0x206   : > { %v2178_v17 = vsel %vm2038_vm5, %v1261_v10, -1e+30  ;;  %v1301_v18 = vsel %vm751_vm7, %v2174_v16, -inf }
 0x207   : > { %v1295_v19 = vsel %vm751_vm7, %v2178_v17, -inf  ;;  %1302 = vmax.xlane.f32.xlu0 %v1301_v18 }
 0x208   : > { %1296 = vmax.xlane.f32.xlu2 %v1295_v19  ;;  %1120 = vmax.xlane.f32.xlu1 %v1119_v20 }
 0x20a   : > { %v1286_v30 = vpop.f32.mrf.mxu3 }
 0x20b   : > { %v1290_v21 = vmul.f32 0.17677669, %v1286_v30  ;;  %v1258_v41 = vpop.f32.mrf.mxu2 }
 0x20c   : > { %v1262_v31 = vmul.f32 0.17677669, %v1258_v41 }
 0x20d   : > { %v2188_v22 = vsel %vm2057_vm9, %v1290_v21, -1e+30 }
 0x20e   : > { %v1304_v23 = vsel %vm751_vm7, %v2188_v22, -inf  ;;  %v2200_v32 = vsel %vm2038_vm5, %v1262_v31, -1e+30 }
 0x20f   : > { %1305 = vmax.xlane.f32.xlu0 %v1304_v23  ;;  %v1298_v34 = vsel %vm751_vm7, %v2200_v32, -inf }
 0x220   : > { %1346 = vrot.lane.b32.xlu2 %v1744_v24, %s1881_s12 }
 0x221   : > { %1186 = vrot.lane.b32.xlu1 %v1738_v25, %s1880_s11 }
 0x223   : > { %1371 = vrot.lane.b32.xlu0 %v1743_v26, %s1881_s12 }
 0x249   : > { %779 = vadd.xlane.f32.xlu2 %v778_v33 }
 0x24b   : > { %1299 = vmax.xlane.f32.xlu1 %v1298_v34 }
 0x25a   : > { %v933_v36 = vpop.xlane.xlu2 %932 }
 0x25b   : > { %v927_v37 = vpop.xlane.xlu1 %926 }
 0x25c   : > { %v937_v39 = vmax.f32 %v927_v37, %v933_v36 }
 0x25e   : > { %v939_v40 = vsub.f32 %v2134_v46, %v937_v39  ;;  %v945_v42 = vsub.f32 %v2128_v44, %v937_v39 }
 0x260   : > { %v941_v43 = vmul.f32 1.442695, %v939_v40  ;;  %v947_v45 = vmul.f32 1.442695, %v945_v42 }
 0x262   : > { %1798 = vpow2.f32 %v941_v43 }
 0x263   : > { %1800 = vpow2.f32 %v947_v45  ;;  %v936_v29 = vpop.xlane.xlu1 %935  ;;  %v930_v47 = vpop.xlane.xlu0 %929  ;;  %v781_v45 = vsel %vm751_vm7, %v2096_v14, 0.0  ;;  %v787_v14 = vsel %vm751_vm7, %v2098_v15, 0.0 }
 0x264   : > { %v938_v48 = vmax.f32 %v930_v47, %v936_v29 }
 0x266   : > { %v940_v12 = vsub.f32 %v2146_v54, %v938_v48  ;;  %v946_v49 = vsub.f32 %v2140_v52, %v938_v48 }
 0x268   : > { %v1799_v50 = vpop.eup %1798  ;;  %v943_v51 = vmul.f32 1.442695, %v940_v12  ;;  %v949_v53 = vmul.f32 1.442695, %v946_v49 }
 0x269   : > { %v1801_v55 = vpop.eup %1800  ;;  %v951_v56 = vsel %vm751_vm7, %v1799_v50, 0.0 }
 0x26a   : > { %1802 = vpow2.f32 %v943_v51  ;;  %v957_v44 = vsel %vm751_vm7, %v1801_v55, 0.0  ;;  %952 = vadd.xlane.f32.xlu1 %v951_v56 }
 0x26b   : > { %1804 = vpow2.f32 %v949_v53  ;;  %958 = vadd.xlane.f32.xlu2 %v957_v44  ;;  %v1112_v46 = vpop.xlane.xlu1 %1111  ;;  %v1118_v57 = vpop.xlane.xlu0 %1117 }
 0x26c   : > { %v1122_v58 = vmax.f32 %v1112_v46, %v1118_v57 }
 0x26e   : > { %v1124_v59 = vsub.f32 %v2156_v61, %v1122_v58  ;;  %v1130_v63 = vsub.f32 %v2152_v60, %v1122_v58 }
 0x270   : > { %v1803_v54 = vpop.eup %1802  ;;  %v1126_v62 = vmul.f32 1.442695, %v1124_v59  ;;  %v1132_v61 = vmul.f32 1.442695, %v1130_v63 }
 0x271   : > { %v1805_v52 = vpop.eup %1804  ;;  %v954_v0 = vsel %vm751_vm7, %v1803_v54, 0.0  ;;  %v965_v1 = vpack.c.bf16 %v1803_v54, %v1799_v50 }
 0x272   : > { %1806 = vpow2.f32 %v1126_v62  ;;  %v960_v2 = vsel %vm751_vm7, %v1805_v52, 0.0  ;;  %955 = vadd.xlane.f32.xlu0 %v954_v0  ;;  %v968_v4 = vpack.c.bf16 %v1805_v52, %v1801_v55 }
 0x273   : > { %961 = vadd.xlane.f32.xlu1 %v960_v2  ;;  %v1115_v5 = vpop.xlane.xlu1 %1114  ;;  %1673 = vmatmul.msk.bf16.vlgmr.msrb.gmra.mxu1 %vm751_vm7, %v965_v1  ;;  %1808 = vpow2.f32 %v1132_v61 }
 0x274   : > { %1668 = vmatmul.msk.bf16.vlgmr.msrb.gmra.mxu0 %vm751_vm7, %v968_v4 }
 0x278   : > { %v1807_v6 = vpop.eup %1806 }
 0x279   : > { %v1136_v7 = vsel %vm751_vm7, %v1807_v6, 0.0  ;;  %v1809_v21 = vpop.eup %1808 }
 0x27a   : > { %v1303_v60 = vpop.xlane.xlu0 %1302  ;;  %v1142_v26 = vsel %vm751_vm7, %v1809_v21, 0.0 }
 0x27b   : > { %1137 = vadd.xlane.f32.xlu1 %v1136_v7  ;;  %v1297_v8 = vpop.xlane.xlu2 %1296  ;;  %v1121_v9 = vpop.xlane.xlu1 %1120 }
 0x27c   : > { %v1123_v10 = vmax.f32 %v1115_v5, %v1121_v9  ;;  %v1307_v18 = vmax.f32 %v1297_v8, %v1303_v60 }
 0x27e   : > { %v1125_v19 = vsub.f32 %v2164_v3, %v1123_v10  ;;  %v1131_v20 = vsub.f32 %v2170_v11, %v1123_v10  ;;  %v1309_v30 = vsub.f32 %v2178_v17, %v1307_v18  ;;  %v1315_v3 = vsub.f32 %v2174_v16, %v1307_v18 }
 0x280   : > { %v1128_v23 = vmul.f32 1.442695, %v1125_v19  ;;  %v1134_v24 = vmul.f32 1.442695, %v1131_v20  ;;  %v1311_v25 = vmul.f32 1.442695, %v1309_v30 }
 0x281   : > { %v1317_v34 = vmul.f32 1.442695, %v1315_v3 }
 0x282   : > { %1810 = vpow2.f32 %v1128_v23  ;;  %v1306_v39 = vpop.xlane.xlu0 %1305 }
 0x283   : > { %1812 = vpow2.f32 %v1134_v24  ;;  %1143 = vadd.xlane.f32.xlu1 %v1142_v26  ;;  %v1347_v27 = vpop.permute.xlu2 %1346 }
 0x284   : > { %1814 = vpow2.f32 %v1311_v25  ;;  %1359 = vmatpush.bf16.msrb.mxu0 %v1347_v27 }
 0x285   : > { %1816 = vpow2.f32 %v1317_v34 }
 0x288   : > { %v1811_v28 = vpop.eup %1810 }
 0x289   : > { %v1813_v41 = vpop.eup %1812  ;;  %v1139_v11 = vsel %vm751_vm7, %v1811_v28, 0.0  ;;  %v1150_v40 = vpack.c.bf16 %v1811_v28, %v1807_v6 }
 0x28a   : > { %v1815_v31 = vpop.eup %1814  ;;  %v1153_v17 = vpack.c.bf16 %v1813_v41, %v1809_v21  ;;  %v1145_v36 = vsel %vm751_vm7, %v1813_v41, 0.0 }
 0x28b   : > { %1140 = vadd.xlane.f32.xlu1 %v1139_v11  ;;  %v1321_v33 = vsel %vm751_vm7, %v1815_v31, 0.0  ;;  %v1817_v16 = vpop.eup %1816 }
 0x28c   : > { %1322 = vadd.xlane.f32.xlu0 %v1321_v33  ;;  %1692 = vmatmul.msk.bf16.vlgmr.msra.gmra.mxu0 %vm751_vm7, %v1153_v17  ;;  %v1327_v42 = vsel %vm751_vm7, %v1817_v16, 0.0 }
 0x293   : > { %1146 = vadd.xlane.f32.xlu1 %v1145_v36  ;;  %v1187_v37 = vpop.permute.xlu1 %1186 }
 0x294   : > { %1199 = vmatpush.bf16.msra.mxu1 %v1187_v37 }
 0x295   : > { %v1372_v43 = vpop.permute.xlu0 %1371 }
 0x297   : > { %1697 = vmatmul.msk.bf16.vlgmr.msra.gmra.mxu1 %vm751_vm7, %v1150_v40 }
 0x298   : > { %1384 = vmatpush.bf16.msrb.mxu1 %v1372_v43 }
 0x29b   : > { %1328 = vadd.xlane.f32.xlu1 %v1327_v42 }
 0x2a3   : > { %782 = vadd.xlane.f32.xlu1 %v781_v45 }
 0x2be   : > { %v1300_v29 = vpop.xlane.xlu1 %1299 }
 0x2bf   : > { %v1308_v47 = vmax.f32 %v1300_v29, %v1306_v39 }
 0x2c1   : > { %v1310_v48 = vsub.f32 %v2200_v32, %v1308_v47  ;;  %v1316_v12 = vsub.f32 %v2188_v22, %v1308_v47  ;;  %v784_v22 = vsel %vm751_vm7, %v2094_v13, 0.0  ;;  %v780_v32 = vpop.xlane.xlu2 %779 }
 0x2c3   : > { %v1313_v49 = vmul.f32 1.442695, %v1310_v48  ;;  %v1319_v50 = vmul.f32 1.442695, %v1316_v12 }
 0x2c5   : > { %1818 = vpow2.f32 %v1313_v49 }
 0x2c6   : > { %1820 = vpow2.f32 %v1319_v50 }
 0x2cb   : > { %v1819_v51 = vpop.eup %1818 }
 0x2cc   : > { %v1821_v53 = vpop.eup %1820  ;;  %v1335_v55 = vpack.c.bf16 %v1819_v51, %v1815_v31  ;;  %v1324_v56 = vsel %vm751_vm7, %v1819_v51, 0.0 }
 0x2cd   : > { %v1338_v44 = vpack.c.bf16 %v1821_v53, %v1817_v16  ;;  %v1330_v46 = vsel %vm751_vm7, %v1821_v53, 0.0  ;;  %1325 = vadd.xlane.f32.xlu2 %v1324_v56 }
 0x2ce   : > { %1331 = vadd.xlane.f32.xlu0 %v1330_v46  ;;  %1721 = vmatmul.msk.bf16.vlgmr.msrb.gmra.mxu1 %vm751_vm7, %v1335_v55 }
 0x2cf   : > { %1716 = vmatmul.msk.bf16.vlgmr.msrb.gmra.mxu0 %vm751_vm7, %v1338_v44 }
 0x2d5   : > { %788 = vadd.xlane.f32.xlu2 %v787_v14 }
 0x2d6   : > { %785 = vadd.xlane.f32.xlu0 %v784_v22 }
 0x2dd   : > { %v953_v57 = vpop.xlane.xlu1 %952 }
 0x2de   : > { %v959_v58 = vpop.xlane.xlu2 %958 }
 0x2df   : > { %v963_v59 = vadd.f32 %v959_v58, %v953_v57 }
 0x2e1   : > { %1822 = vrcp.f32 %v963_v59 }
 0x2e5   : > { %v956_v62 = vpop.xlane.xlu0 %955 }
 0x2e6   : > { %v962_v54 = vpop.xlane.xlu1 %961 }
 0x2e7   : > { %v964_v63 = vadd.f32 %v962_v54, %v956_v62  ;;  %v1823_v2 = vpop.eup %1822 }
 0x2e9   : > { %1824 = vrcp.f32 %v964_v63 }
 0x2ee   : > { %v1138_v4 = vpop.xlane.xlu1 %1137 }
 0x2ef   : > { %v1825_v7 = vpop.eup %1824 }
 0x2f0   : > { %v1016_v52 = vpop.f32.mrf.mxu1 }
 0x2f1   : > { %v991_v0 = vpop.f32.mrf.mxu0 }
 0x2f2   : > { %v1017_v1 = vadd.f32 %v1016_v52, %v991_v0 }
 0x2f4   : > { %v1023_v5 = vmul.f32 %v1823_v2, %v1017_v1 }
 0x2f6   : > { %v1025_v15 = vpack.c.bf16 %v1023_v5, %v1023_v5  ;;  %v1144_v8 = vpop.xlane.xlu1 %1143 }
 0x2f7   : > { %v1148_v18 = vadd.f32 %v1144_v8, %v1138_v4 }
 0x2f8   : > { %1029 = vrot.lane.b32.xlu1 %v1025_v15, %s1881_s12  ;;  %v1018_v13 = vpop.f32.mrf.mxu1 }
 0x2f9   : > { %v993_v61 = vpop.f32.mrf.mxu0  ;;  %1826 = vrcp.f32 %v1148_v18 }
 0x2fa   : > { %v1019_v6 = vadd.f32 %v1018_v13, %v993_v61 }
 0x2fc   : > { %v1024_v60 = vmul.f32 %v1825_v7, %v1019_v6 }
 0x2fe   : > { %v1026_v9 = vpack.c.bf16 %v1024_v60, %v1024_v60  ;;  %v1141_v10 = vpop.xlane.xlu1 %1140 }
 0x2ff   : > { %v1827_v24 = vpop.eup %1826  ;;  %v1323_v17 = vpop.xlane.xlu0 %1322 }
 0x300   : > { %1031 = vrot.lane.b32.xlu0 %v1026_v9, %s1881_s12 }
 0x306   : > { %v1147_v19 = vpop.xlane.xlu1 %1146 }
 0x307   : > { %v1149_v30 = vadd.f32 %v1147_v19, %v1141_v10 }
 0x309   : > { %v1176_v20 = vpop.f32.mrf.mxu0  ;;  %1828 = vrcp.f32 %v1149_v30 }
 0x30e   : > { %v1329_v33 = vpop.xlane.xlu1 %1328 }
 0x30f   : > { %v1829_v3 = vpop.eup %1828  ;;  %v1333_v37 = vadd.f32 %v1329_v33, %v1323_v17 }
 0x311   : > { %v1178_v27 = vpop.f32.mrf.mxu0  ;;  %1830 = vrcp.f32 %v1333_v37 }
 0x314   : > { %v1201_v21 = vpop.f32.mrf.mxu1 }
 0x315   : > { %v1202_v23 = vadd.f32 %v1201_v21, %v1176_v20 }
 0x316   : > { %v783_v39 = vpop.xlane.xlu1 %782 }
 0x317   : > { %v1208_v25 = vmul.f32 %v1827_v24, %v1202_v23  ;;  %v1831_v12 = vpop.eup %1830 }
 0x319   : > { %v1210_v26 = vpack.c.bf16 %v1208_v25, %v1208_v25 }
 0x31b   : > { %1214 = vrot.lane.b32.xlu2 %v1210_v26, %s1880_s11 }
 0x31c   : > { %v1203_v28 = vpop.f32.mrf.mxu1 }
 0x31d   : > { %v1204_v41 = vadd.f32 %v1203_v28, %v1178_v27 }
 0x31f   : > { %v1209_v11 = vmul.f32 %v1829_v3, %v1204_v41 }
 0x321   : > { %v1211_v31 = vpack.c.bf16 %v1209_v11, %v1209_v11 }
 0x323   : > { %1216 = vrot.lane.b32.xlu0 %v1211_v31, %s1880_s11 }
 0x340   : > { %v1326_v34 = vpop.xlane.xlu2 %1325 }
 0x341   : > { %v1332_v36 = vpop.xlane.xlu0 %1331 }
 0x342   : > { %v1334_v29 = vadd.f32 %v1332_v36, %v1326_v34 }
 0x348   : > { %v789_v40 = vpop.xlane.xlu2 %788 }
 0x349   : > { %v791_v16 = vadd.f32 %v789_v40, %v783_v39  ;;  %v786_v42 = vpop.xlane.xlu0 %785 }
 0x34a   : > { %v790_v43 = vadd.f32 %v786_v42, %v780_v32 }
 0x34b   : > { %1832 = vrcp.f32 %v791_v16  ;;  %v1386_v45 = vpop.f32.mrf.mxu1 }
 0x34c   : > { %1834 = vrcp.f32 %v790_v43  ;;  %v1361_v47 = vpop.f32.mrf.mxu0 }
 0x34d   : > { %v1387_v48 = vadd.f32 %v1386_v45, %v1361_v47  ;;  %1836 = vrcp.f32 %v1334_v29 }
 0x34f   : > { %v1393_v49 = vmul.f32 %v1831_v12, %v1387_v48 }
 0x351   : > { %v1833_v50 = vpop.eup %1832  ;;  %v1395_v51 = vpack.c.bf16 %v1393_v49, %v1393_v49 }
 0x352   : > { %v1835_v53 = vpop.eup %1834  ;;  %v847_v55 = vmul.f32 %v1833_v50, %v2124_v38 }
 0x353   : > { %v846_v56 = vmul.f32 %v1835_v53, %v2122_v35  ;;  %1399 = vrot.lane.b32.xlu1 %v1395_v51, %s1878_s22  ;;  %v1388_v44 = vpop.f32.mrf.mxu1  ;;  %v1837_v57 = vpop.eup %1836 }
 0x354   : > { %v849_v46 = vpack.c.bf16 %v847_v55, %v847_v55  ;;  %v1363_v14 = vpop.f32.mrf.mxu0 }
 0x355   : > { %v848_v22 = vpack.c.bf16 %v846_v56, %v846_v56  ;;  %v1389_v32 = vadd.f32 %v1388_v44, %v1363_v14 }
 0x356   : > { %852 = vst.msk [vmem:[%s658_s17 + $0x4] sm:$0xf] %vm850_vm10, %v849_v46 }
 0x357   : > { %v1394_v58 = vmul.f32 %v1837_v57, %v1389_v32  ;;  %851 = vst.msk [vmem:[%s658_s17] sm:$0xf] %vm850_vm10, %v848_v22 }
 0x359   : > { %v1396_v59 = vpack.c.bf16 %v1394_v58, %v1394_v58 }
 0x35b   : > { %1401 = vrot.lane.b32.xlu2 %v1396_v59, %s1878_s22 }
 0x36a   : > { %v1030_v38 = vpop.permute.xlu1 %1029 }
 0x36b   : > { %1036 = vst.msk [vmem:[%s658_s17] sm:$0xf] %vm1035_vm11, %v1030_v38 }
 0x372   : > { %v1032_v54 = vpop.permute.xlu0 %1031 }
 0x373   : > { %1037 = vst.msk [vmem:[%s658_s17 + $0x4] sm:$0xf] %vm1035_vm11, %v1032_v54 }
 0x375   : > { %v1215_v35 = vpop.permute.xlu2 %1214 }
 0x376   : > { %1221 = vst.msk [vmem:[%s658_s17] sm:$0xf] %vm1220_vm12, %v1215_v35 }
 0x395   : > { %v1217_v62 = vpop.permute.xlu0 %1216 }
 0x396   : > { %1222 = vst.msk [vmem:[%s658_s17 + $0x4] sm:$0xf] %vm1220_vm12, %v1217_v62 }
 0x3b5   : > { %v1402_v52 = vpop.permute.xlu2 %1401 }
 0x3b6   : > { %1407 = vst.msk [vmem:[%s658_s17 + $0x4] sm:$0xf] %vm1405_vm13, %v1402_v52 }
 0x3c5   : > { %v1400_v63 = vpop.permute.xlu1 %1399 }
 0x3c6   : > { %1406 = vst.msk [vmem:[%s658_s17] sm:$0xf] %vm1405_vm13, %v1400_v63 }
 0x3c7 PF: > { %s17_s28 = sadd.s32 1, %s1876_s28   ;;  %s2286_s24 = smov %s1864_s25 }
 0x3c8   : > { %p14_p10 = scmp.ge.s32.totalorder %s17_s28, 4   ;;  %s2287_s25 = smov %s1961_s10 }
 0x3c9   : > { %s2288_s26 = smov %s1872_s27  ;;  %s2289_s27 = smov %s2291_s29 }
 0x3ca   :  { %16 = sbr.rel (!%p14_p10) target bundleno = 3 (0x3), region = 326 }

// kernel: seq2seq_unixcoder_forward.31
= control target key start
LH: loop header
LB: loop body
LE: loop exit
PB: predicated region body
PF: predicated region fallthrough
CT: control target
= control target key end

     0   :  { %s685_s1 = inlined_call_operand.vmem [shape: bf16[128,256], index: 1, kind: input, shape index: {}]   ;;  %s686_s0 = inlined_call_operand.vmem [shape: bf16[32,256], index: 0, kind: input, shape index: {}]   ;;  %s687_s2 = inlined_call_operand.vmem [shape: f32[1,128], index: 2, kind: input, shape index: {}]   ;;  %s688_s3 = inlined_call_operand.vmem [shape: bf16[32,128], index: 3, kind: input, shape index: {}]   ;;  %s689_s4 = inlined_call_operand.vmem [shape: f32[1,128], index: 4, kind: input, shape index: {}]   ;;  %s690_s5 = inlined_call_operand.vmem [shape: f32[1,128], index: 5, kind: input, shape index: {}]   ;;  %s691_s6 = inlined_call_operand.vmem [shape: bf16[32,128], index: 6, kind: output, shape index: {}]  }
   0x1   :  { %v417_v0 = vld [vmem:[%s685_s1 + $0x70] sm:$0xf]  ;;  %v442_v1 = vld [vmem:[%s685_s1 + $0x74] sm:$0xf0]  ;;  %v441_v2 = vld [vmem:[%s685_s1 + $0x74] sm:$0xf] }
   0x2   :  { %v418_v3 = vor.u32 %v442_v1, %v417_v0  ;;  %v419_v4 = vld [vmem:[%s685_s1 + $0x78] sm:$0xf0]  ;;  %v409_v6 = vld [vmem:[%s685_s1 + $0x60] sm:$0xf]  ;;  %v440_v7 = vld [vmem:[%s685_s1 + $0x64] sm:$0xf0] }
   0x3   :  { %v422_v5 = vor.u32 %v441_v2, %v419_v4  ;;  %v439_v8 = vld [vmem:[%s685_s1 + $0x64] sm:$0xf]  ;;  %v411_v9 = vld [vmem:[%s685_s1 + $0x68] sm:$0xf0]  ;;  %v410_v10 = vor.u32 %v440_v7, %v409_v6  ;;  %v401_v12 = vld [vmem:[%s685_s1 + $0x50] sm:$0xf] }
   0x4   :  { %155 = vmatpush.bf16.xpose.msra.mxu0 %v418_v3  ;;  %463 = vmatpush.bf16.xpose.msra.mxu2 %v418_v3  ;;  %v414_v11 = vor.u32 %v439_v8, %v411_v9  ;;  %v438_v13 = vld [vmem:[%s685_s1 + $0x54] sm:$0xf0]  ;;  %v437_v14 = vld [vmem:[%s685_s1 + $0x54] sm:$0xf]  ;;  %v403_v15 = vld [vmem:[%s685_s1 + $0x58] sm:$0xf0] }
   0x5   :  { %174 = vmatpush.bf16.xpose.msra.mxu1 %v422_v5  ;;  %471 = vmatpush.bf16.xpose.msra.mxu3 %v422_v5  ;;  %v402_v16 = vor.u32 %v438_v13, %v401_v12  ;;  %v406_v17 = vor.u32 %v437_v14, %v403_v15  ;;  %v393_v18 = vld [vmem:[%s685_s1 + $0x40] sm:$0xf]  ;;  %v436_v19 = vld [vmem:[%s685_s1 + $0x44] sm:$0xf0]  ;;  %v435_v20 = vld [vmem:[%s685_s1 + $0x44] sm:$0xf] }
   0x6   :  { %v395_v21 = vld [vmem:[%s685_s1 + $0x48] sm:$0xf0]  ;;  %v394_v22 = vor.u32 %v436_v19, %v393_v18  ;;  %v385_v24 = vld [vmem:[%s685_s1 + $0x30] sm:$0xf]  ;;  %v434_v25 = vld [vmem:[%s685_s1 + $0x34] sm:$0xf0] }
   0x7   :  { %v398_v23 = vor.u32 %v435_v20, %v395_v21  ;;  %v433_v26 = vld [vmem:[%s685_s1 + $0x34] sm:$0xf]  ;;  %v387_v27 = vld [vmem:[%s685_s1 + $0x38] sm:$0xf0]  ;;  %v386_v28 = vor.u32 %v434_v25, %v385_v24  ;;  %v377_v30 = vld [vmem:[%s685_s1 + $0x20] sm:$0xf] }
   0x8   :  { %v390_v29 = vor.u32 %v433_v26, %v387_v27  ;;  %v432_v31 = vld [vmem:[%s685_s1 + $0x24] sm:$0xf0]  ;;  %v431_v32 = vld [vmem:[%s685_s1 + $0x24] sm:$0xf]  ;;  %v379_v33 = vld [vmem:[%s685_s1 + $0x28] sm:$0xf0] }
   0x9   :  { %v378_v34 = vor.u32 %v432_v31, %v377_v30  ;;  %v382_v35 = vor.u32 %v431_v32, %v379_v33  ;;  %v369_v36 = vld [vmem:[%s685_s1 + $0x10] sm:$0xf]  ;;  %v430_v37 = vld [vmem:[%s685_s1 + $0x14] sm:$0xf0]  ;;  %v429_v38 = vld [vmem:[%s685_s1 + $0x14] sm:$0xf] }
   0xa   :  { %v371_v39 = vld [vmem:[%s685_s1 + $0x18] sm:$0xf0]  ;;  %v370_v40 = vor.u32 %v430_v37, %v369_v36  ;;  %v361_v42 = vld [vmem:[%s685_s1] sm:$0xf]  ;;  %v428_v43 = vld [vmem:[%s685_s1 + $0x4] sm:$0xf0] }
   0xb   :  { %v374_v41 = vor.u32 %v429_v38, %v371_v39  ;;  %v427_v44 = vld [vmem:[%s685_s1 + $0x4] sm:$0xf]  ;;  %v363_v45 = vld [vmem:[%s685_s1 + $0x8] sm:$0xf0]  ;;  %v362_v46 = vor.u32 %v428_v43, %v361_v42  ;;  %v345_v48 = vld [vmem:[%s686_s0] sm:$0xf] }
   0xc   :  { %156 = vmatpush.bf16.xpose.msra.mxu0 %v410_v10  ;;  %464 = vmatpush.bf16.xpose.msra.mxu2 %v410_v10  ;;  %v366_v47 = vor.u32 %v427_v44, %v363_v45  ;;  %v424_v49 = vld [vmem:[%s686_s0 + $0x4] sm:$0xf0]  ;;  %v353_v50 = vld [vmem:[%s686_s0 + $0x10] sm:$0xf]  ;;  %v426_v51 = vld [vmem:[%s686_s0 + $0x14] sm:$0xf0] }
   0xd   :  { %175 = vmatpush.bf16.xpose.msra.mxu1 %v414_v11  ;;  %472 = vmatpush.bf16.xpose.msra.mxu3 %v414_v11  ;;  %v423_v52 = vld [vmem:[%s686_s0 + $0x4] sm:$0xf]  ;;  %v347_v53 = vld [vmem:[%s686_s0 + $0x8] sm:$0xf0]  ;;  %v425_v54 = vld [vmem:[%s686_s0 + $0x14] sm:$0xf]  ;;  %v346_v56 = vor.u32 %v424_v49, %v345_v48  ;;  %v354_v57 = vor.u32 %v426_v51, %v353_v50 }
   0xe   :  { %v355_v55 = vld [vmem:[%s686_s0 + $0x18] sm:$0xf0]  ;;  %v350_v58 = vor.u32 %v423_v52, %v347_v53  ;;  %v444_v60 = vld [vmem:[%s688_s3] sm:$0xff]   ;;  %v461_v3 = vld [vmem:[%s688_s3 + $0x8] sm:$0xff]  }
   0xf   :  { %v358_v59 = vor.u32 %v425_v54, %v355_v55  ;;  %v480_v62 = vld [vmem:[%s687_s2] ss:$0 sm:$0xff]  ;;  %v445_v1 = vunpack.c.l.bf16 %v444_v60  ;;  %v449_v9 = vunpack.c.l.bf16 %v461_v3  ;;  %v446_v13 = vunpack.c.h.bf16 %v444_v60 }
  0x10   :  { %v450_v20 = vunpack.c.h.bf16 %v461_v3 }
  0x14   :  { %157 = vmatpush.bf16.xpose.msra.mxu0 %v402_v16  ;;  %465 = vmatpush.bf16.xpose.msra.mxu2 %v402_v16 }
  0x15   :  { %176 = vmatpush.bf16.xpose.msra.mxu1 %v406_v17  ;;  %473 = vmatpush.bf16.xpose.msra.mxu3 %v406_v17 }
  0x1c   :  { %158 = vmatpush.bf16.xpose.msra.mxu0 %v394_v22  ;;  %466 = vmatpush.bf16.xpose.msra.mxu2 %v394_v22 }
  0x1d   :  { %177 = vmatpush.bf16.xpose.msra.mxu1 %v398_v23  ;;  %474 = vmatpush.bf16.xpose.msra.mxu3 %v398_v23  ;;  %v493_v23 = vmov 128.0  }
  0x1e   :  { %483 = vrcp.f32 %v493_v23 }
  0x24   :  { %159 = vmatpush.bf16.xpose.msra.mxu0 %v386_v28  ;;  %467 = vmatpush.bf16.xpose.msra.mxu2 %v386_v28  ;;  %v484_v24 = vpop.eup %483 }
  0x25   :  { %178 = vmatpush.bf16.xpose.msra.mxu1 %v390_v29  ;;  %475 = vmatpush.bf16.xpose.msra.mxu3 %v390_v29  ;;  %v237_v25 = vmul.f32 128.0, %v484_v24  ;;  %vm241_vm0 = vweird.f32 %v484_v24 }
  0x27   :  { %v238_v26 = vsub.f32 1.0, %v237_v25 }
  0x29   :  { %v239_v27 = vmul.f32 %v484_v24, %v238_v26 }
  0x2b   :  { %v240_v28 = vadd.f32 %v484_v24, %v239_v27 }
  0x2c   :  { %160 = vmatpush.bf16.xpose.msra.mxu0 %v378_v34  ;;  %468 = vmatpush.bf16.xpose.msra.mxu2 %v378_v34 }
  0x2d   :  { %179 = vmatpush.bf16.xpose.msra.mxu1 %v382_v35  ;;  %476 = vmatpush.bf16.xpose.msra.mxu3 %v382_v35  ;;  %v242_v29 = vsel %vm241_vm0, %v484_v24, %v240_v28 }
  0x34   :  { %161 = vmatpush.bf16.xpose.msra.mxu0 %v370_v40  ;;  %469 = vmatpush.bf16.xpose.msra.mxu2 %v370_v40 }
  0x35   :  { %180 = vmatpush.bf16.xpose.msra.mxu1 %v374_v41  ;;  %477 = vmatpush.bf16.xpose.msra.mxu3 %v374_v41 }
  0x3c   :  { %162 = vmatpush.bf16.xpose.msra.mxu0 %v362_v46  ;;  %470 = vmatpush.bf16.xpose.msra.mxu2 %v362_v46 }
  0x3d   :  { %181 = vmatpush.bf16.xpose.msra.mxu1 %v366_v47  ;;  %478 = vmatpush.bf16.xpose.msra.mxu3 %v366_v47 }
  0x43   :  { %163 = vmatmul.bf16.vlgmr.msra.gmra.mxu0 %v346_v56  ;;  %168 = vmatmul.bf16.vlgmr.msra.gmra.mxu2 %v354_v57 }
  0x44   :  { %182 = vmatmul.bf16.vlgmr.msra.gmra.mxu1 %v350_v58  ;;  %187 = vmatmul.bf16.vlgmr.msra.gmra.mxu3 %v358_v59 }
  0xc0   :  { %v164_v61 = vpop.f32.mrf.mxu0 }
  0xc1   :  { %v183_v63 = vpop.f32.mrf.mxu1 }
  0xc2   :  { %v184_v0 = vadd.f32 %v183_v63, %v164_v61 }
  0xc4   :  { %v212_v2 = vadd.f32 %v480_v62, %v184_v0 }
  0xc6   :  { %v169_v4 = vpop.f32.mrf.mxu2  ;;  %v224_v5 = vadd.f32 %v445_v1, %v212_v2 }
  0xc7   :  { %v188_v6 = vpop.f32.mrf.mxu3 }
  0xc8   :  { %v189_v7 = vadd.f32 %v188_v6, %v169_v4  ;;  %228 = vadd.xlane.f32.xlu0 %v224_v5  ;;  %v166_v8 = vpop.f32.mrf.mxu0 }
  0xc9   :  { %v185_v10 = vpop.f32.mrf.mxu1 }
  0xca   :  { %v214_v11 = vadd.f32 %v480_v62, %v189_v7  ;;  %v186_v12 = vadd.f32 %v185_v10, %v166_v8 }
  0xcc   :  { %v213_v14 = vadd.f32 %v480_v62, %v186_v12  ;;  %v226_v15 = vadd.f32 %v449_v9, %v214_v11 }
  0xce   :  { %232 = vadd.xlane.f32.xlu1 %v226_v15  ;;  %v171_v16 = vpop.f32.mrf.mxu2  ;;  %v225_v17 = vadd.f32 %v446_v13, %v213_v14  ;;  %v481_v14 = vld [vmem:[%s689_s4] ss:$0 sm:$0xff] }
  0xcf   :  { %v190_v18 = vpop.f32.mrf.mxu3 }
  0xd0   :  { %v191_v19 = vadd.f32 %v190_v18, %v171_v16  ;;  %230 = vadd.xlane.f32.xlu0 %v225_v17 }
  0xd2   :  { %v215_v21 = vadd.f32 %v480_v62, %v191_v19 }
  0xd4   :  { %v227_v22 = vadd.f32 %v450_v20, %v215_v21  ;;  %v482_v21 = vld [vmem:[%s690_s5] ss:$0 sm:$0xff] }
  0xd6   :  { %234 = vadd.xlane.f32.xlu1 %v227_v22 }
 0x13b   :  { %v229_v30 = vpop.xlane.xlu0 %228 }
 0x13c   :  { %v243_v31 = vmul.f32 %v242_v29, %v229_v30 }
 0x13e   :  { %v247_v32 = vsub.f32 %v224_v5, %v243_v31 }
 0x140   :  { %v251_v33 = vmul.f32 %v247_v32, %v247_v32 }
 0x141   :  { %v233_v34 = vpop.xlane.xlu1 %232 }
 0x142   :  { %v245_v35 = vmul.f32 %v242_v29, %v233_v34  ;;  %255 = vadd.xlane.f32.xlu2 %v251_v33 }
 0x143   :  { %v231_v36 = vpop.xlane.xlu0 %230 }
 0x144   :  { %v658_v37 = vsub.f32 %v226_v15, %v245_v35  ;;  %v244_v38 = vmul.f32 %v242_v29, %v231_v36 }
 0x146   :  { %v660_v39 = vsub.f32 %v225_v17, %v244_v38  ;;  %v253_v40 = vmul.f32 %v658_v37, %v658_v37 }
 0x148   :  { %259 = vadd.xlane.f32.xlu0 %v253_v40  ;;  %v252_v41 = vmul.f32 %v660_v39, %v660_v39 }
 0x149   :  { %v235_v42 = vpop.xlane.xlu1 %234 }
 0x14a   :  { %v246_v43 = vmul.f32 %v242_v29, %v235_v42  ;;  %257 = vadd.xlane.f32.xlu2 %v252_v41 }
 0x14c   :  { %v666_v44 = vsub.f32 %v227_v22, %v246_v43 }
 0x14e   :  { %v254_v45 = vmul.f32 %v666_v44, %v666_v44 }
 0x150   :  { %261 = vadd.xlane.f32.xlu1 %v254_v45 }
 0x1b5   :  { %v256_v46 = vpop.xlane.xlu2 %255 }
 0x1b6   :  { %v263_v47 = vmul.f32 %v256_v46, %v242_v29 }
 0x1b8   :  { %v267_v48 = vadd.f32 1e-05, %v263_v47 }
 0x1ba   :  { %485 = vrsqrt.f32 %v267_v48  ;;  %vm277_vm2 = vweird.f32 %v267_v48 }
 0x1bb   :  { %v260_v49 = vpop.xlane.xlu0 %259 }
 0x1bc   :  { %v265_v50 = vmul.f32 %v260_v49, %v242_v29 }
 0x1bd   :  { %v258_v51 = vpop.xlane.xlu2 %257 }
 0x1be   :  { %v269_v52 = vadd.f32 1e-05, %v265_v50  ;;  %v264_v53 = vmul.f32 %v258_v51, %v242_v29 }
 0x1c0   :  { %v486_v54 = vpop.eup %485  ;;  %487 = vrsqrt.f32 %v269_v52  ;;  %v268_v55 = vadd.f32 1e-05, %v264_v53  ;;  %vm297_vm6 = vweird.f32 %v269_v52 }
 0x1c1   :  { %v272_v56 = vmul.f32 %v486_v54, %v267_v48  ;;  %vm278_vm1 = vweird.f32 %v486_v54 }
 0x1c2   :  { %489 = vrsqrt.f32 %v268_v55  ;;  %vm279_vm3 = vmor %vm277_vm2, %vm278_vm1  ;;  %vm287_vm8 = vweird.f32 %v268_v55 }
 0x1c3   :  { %v273_v57 = vmul.f32 %v486_v54, %v272_v56  ;;  %v262_v58 = vpop.xlane.xlu1 %261 }
 0x1c4   :  { %v266_v59 = vmul.f32 %v262_v58, %v242_v29 }
 0x1c5   :  { %v274_v60 = vmul.f32 0.5, %v273_v57 }
 0x1c6   :  { %v488_v61 = vpop.eup %487  ;;  %v270_v62 = vadd.f32 1e-05, %v266_v59 }
 0x1c7   :  { %v275_v63 = vsub.f32 1.5, %v274_v60  ;;  %v292_v0 = vmul.f32 %v488_v61, %v269_v52  ;;  %vm298_vm4 = vweird.f32 %v488_v61 }
 0x1c8   :  { %v490_v1 = vpop.eup %489  ;;  %491 = vrsqrt.f32 %v270_v62  ;;  %vm299_vm7 = vmor %vm297_vm6, %vm298_vm4  ;;  %vm307_vm11 = vweird.f32 %v270_v62 }
 0x1c9   :  { %v276_v2 = vmul.f32 %v486_v54, %v275_v63  ;;  %v293_v3 = vmul.f32 %v488_v61, %v292_v0  ;;  %v282_v4 = vmul.f32 %v490_v1, %v268_v55  ;;  %vm288_vm5 = vweird.f32 %v490_v1 }
 0x1ca   :  { %vm289_vm9 = vmor %vm287_vm8, %vm288_vm5 }
 0x1cb   :  { %v294_v5 = vmul.f32 0.5, %v293_v3  ;;  %v283_v6 = vmul.f32 %v490_v1, %v282_v4  ;;  %v280_v7 = vsel %vm279_vm3, %v486_v54, %v276_v2 }
 0x1cc   :  { %v311_v15 = vmul.f32 %v280_v7, %v247_v32 }
 0x1cd   :  { %v295_v8 = vsub.f32 1.5, %v294_v5  ;;  %v284_v9 = vmul.f32 0.5, %v283_v6 }
 0x1ce   :  { %v492_v10 = vpop.eup %491  ;;  %v319_v22 = vmul.f32 %v481_v14, %v311_v15 }
 0x1cf   :  { %v296_v11 = vmul.f32 %v488_v61, %v295_v8  ;;  %v285_v12 = vsub.f32 1.5, %v284_v9  ;;  %v302_v13 = vmul.f32 %v492_v10, %v270_v62  ;;  %vm308_vm10 = vweird.f32 %v492_v10 }
 0x1d0   :  { %v327_v28 = vadd.f32 %v482_v21, %v319_v22  ;;  %vm309_vm12 = vmor %vm307_vm11, %vm308_vm10 }
 0x1d1   :  { %v286_v16 = vmul.f32 %v490_v1, %v285_v12  ;;  %v303_v17 = vmul.f32 %v492_v10, %v302_v13  ;;  %v300_v18 = vsel %vm299_vm7, %v488_v61, %v296_v11 }
 0x1d2   :  { %v313_v25 = vmul.f32 %v300_v18, %v658_v37 }
 0x1d3   :  { %v290_v19 = vsel %vm289_vm9, %v490_v1, %v286_v16  ;;  %v304_v20 = vmul.f32 0.5, %v303_v17 }
 0x1d4   :  { %v312_v23 = vmul.f32 %v290_v19, %v660_v39  ;;  %v321_v31 = vmul.f32 %v481_v14, %v313_v25 }
 0x1d5   :  { %v305_v24 = vsub.f32 1.5, %v304_v20 }
 0x1d6   :  { %v320_v26 = vmul.f32 %v481_v14, %v312_v23  ;;  %v329_v35 = vadd.f32 %v482_v21, %v321_v31 }
 0x1d7   :  { %v306_v27 = vmul.f32 %v492_v10, %v305_v24 }
 0x1d8   :  { %v328_v29 = vadd.f32 %v482_v21, %v320_v26 }
 0x1d9   :  { %v310_v30 = vsel %vm309_vm12, %v492_v10, %v306_v27 }
 0x1da   :  { %v454_v32 = vpack.c.bf16 %v328_v29, %v327_v28  ;;  %v314_v33 = vmul.f32 %v310_v30, %v666_v44 }
 0x1dc   :  { %455 = vst [vmem:[%s691_s6] sm:$0xff] %v454_v32   ;;  %v322_v34 = vmul.f32 %v481_v14, %v314_v33 }
 0x1de   :  { %v330_v36 = vadd.f32 %v482_v21, %v322_v34 }
 0x1e0   :  { %v459_v38 = vpack.c.bf16 %v330_v36, %v329_v35 }
 0x1e2   :  { %462 = vst [vmem:[%s691_s6 + $0x8] sm:$0xff] %v459_v38  }

// kernel: seq2seq_unixcoder_forward.30
= control target key start
LH: loop header
LB: loop body
LE: loop exit
PB: predicated region body
PF: predicated region fallthrough
CT: control target
= control target key end

     0   :  { %s601_s1 = inlined_call_operand.vmem [shape: bf16[256,128], index: 1, kind: input, shape index: {}]   ;;  %s602_s0 = inlined_call_operand.vmem [shape: bf16[32,128], index: 0, kind: input, shape index: {}]   ;;  %s603_s2 = inlined_call_operand.vmem [shape: f32[1,256], index: 2, kind: input, shape index: {}]   ;;  %s604_s3 = inlined_call_operand.vmem [shape: bf16[32,256], index: 3, kind: output, shape index: {}]  }
   0x1   :  { %v422_v0 = vld [vmem:[%s601_s1 + $0x38] sm:$0xff]  ;;  %v421_v2 = vld [vmem:[%s601_s1 + $0x30] sm:$0xff]  ;;  %v420_v4 = vld [vmem:[%s601_s1 + $0x28] sm:$0xff] }
   0x2   :  { %v430_v1 = vld [vmem:[%s601_s1 + $0x78] sm:$0xff]  ;;  %178 = vmatpush.bf16.xpose.msra.mxu0 %v422_v0  ;;  %431 = vmatpush.bf16.xpose.msra.mxu2 %v422_v0  ;;  %v429_v3 = vld [vmem:[%s601_s1 + $0x70] sm:$0xff]  ;;  %v428_v5 = vld [vmem:[%s601_s1 + $0x68] sm:$0xff] }
   0x3   :  { %197 = vmatpush.bf16.xpose.msra.mxu1 %v430_v1  ;;  %439 = vmatpush.bf16.xpose.msra.mxu3 %v430_v1  ;;  %v419_v6 = vld [vmem:[%s601_s1 + $0x20] sm:$0xff]  ;;  %v418_v8 = vld [vmem:[%s601_s1 + $0x18] sm:$0xff]  ;;  %v417_v10 = vld [vmem:[%s601_s1 + $0x10] sm:$0xff] }
   0x4   :  { %v427_v7 = vld [vmem:[%s601_s1 + $0x60] sm:$0xff]  ;;  %v426_v9 = vld [vmem:[%s601_s1 + $0x58] sm:$0xff]  ;;  %v425_v11 = vld [vmem:[%s601_s1 + $0x50] sm:$0xff] }
   0x5   :  { %v416_v12 = vld [vmem:[%s601_s1 + $0x8] sm:$0xff]  ;;  %v415_v14 = vld [vmem:[%s601_s1] sm:$0xff] }
   0x6   :  { %v424_v13 = vld [vmem:[%s601_s1 + $0x48] sm:$0xff]  ;;  %v423_v15 = vld [vmem:[%s601_s1 + $0x40] sm:$0xff] }
   0x7   :  { %v413_v16 = vld [vmem:[%s602_s0] sm:$0xff]  ;;  %v414_v17 = vld [vmem:[%s602_s0 + $0x8] sm:$0xff] }
   0x8   :  { %v243_v18 = vld [vmem:[%s603_s2] sm:$0x3] }
   0x9   :  { %v245_v19 = vperm.slane %v243_v18, 0  ;;  %v246_v20 = vperm.slane %v243_v18, 1 }
   0xa   :  { %179 = vmatpush.bf16.xpose.msra.mxu0 %v421_v2  ;;  %432 = vmatpush.bf16.xpose.msra.mxu2 %v421_v2 }
   0xb   :  { %198 = vmatpush.bf16.xpose.msra.mxu1 %v429_v3  ;;  %440 = vmatpush.bf16.xpose.msra.mxu3 %v429_v3 }
  0x12   :  { %180 = vmatpush.bf16.xpose.msra.mxu0 %v420_v4  ;;  %433 = vmatpush.bf16.xpose.msra.mxu2 %v420_v4 }
  0x13   :  { %199 = vmatpush.bf16.xpose.msra.mxu1 %v428_v5  ;;  %441 = vmatpush.bf16.xpose.msra.mxu3 %v428_v5 }
  0x1a   :  { %181 = vmatpush.bf16.xpose.msra.mxu0 %v419_v6  ;;  %434 = vmatpush.bf16.xpose.msra.mxu2 %v419_v6 }
  0x1b   :  { %200 = vmatpush.bf16.xpose.msra.mxu1 %v427_v7  ;;  %442 = vmatpush.bf16.xpose.msra.mxu3 %v427_v7 }
  0x22   :  { %182 = vmatpush.bf16.xpose.msra.mxu0 %v418_v8  ;;  %435 = vmatpush.bf16.xpose.msra.mxu2 %v418_v8 }
  0x23   :  { %201 = vmatpush.bf16.xpose.msra.mxu1 %v426_v9  ;;  %443 = vmatpush.bf16.xpose.msra.mxu3 %v426_v9 }
  0x2a   :  { %183 = vmatpush.bf16.xpose.msra.mxu0 %v417_v10  ;;  %436 = vmatpush.bf16.xpose.msra.mxu2 %v417_v10 }
  0x2b   :  { %202 = vmatpush.bf16.xpose.msra.mxu1 %v425_v11  ;;  %444 = vmatpush.bf16.xpose.msra.mxu3 %v425_v11 }
  0x32   :  { %184 = vmatpush.bf16.xpose.msra.mxu0 %v416_v12  ;;  %437 = vmatpush.bf16.xpose.msra.mxu2 %v416_v12 }
  0x33   :  { %203 = vmatpush.bf16.xpose.msra.mxu1 %v424_v13  ;;  %445 = vmatpush.bf16.xpose.msra.mxu3 %v424_v13 }
  0x3a   :  { %185 = vmatpush.bf16.xpose.msra.mxu0 %v415_v14  ;;  %438 = vmatpush.bf16.xpose.msra.mxu2 %v415_v14 }
  0x3b   :  { %204 = vmatpush.bf16.xpose.msra.mxu1 %v423_v15  ;;  %446 = vmatpush.bf16.xpose.msra.mxu3 %v423_v15 }
  0x41   :  { %186 = vmatmul.bf16.vlgmr.msra.gmra.mxu0 %v413_v16  ;;  %191 = vmatmul.bf16.vlgmr.msra.gmra.mxu2 %v414_v17 }
  0x42   :  { %205 = vmatmul.bf16.vlgmr.msra.gmra.mxu1 %v413_v16  ;;  %210 = vmatmul.bf16.vlgmr.msra.gmra.mxu3 %v414_v17 }
  0xbe   :  { %v187_v21 = vpop.f32.mrf.mxu0 }
  0xbf   :  { %v540_v22 = vadd.f32 %v245_v19, %v187_v21  ;;  %v206_v23 = vpop.f32.mrf.mxu1 }
  0xc0   :  { %v542_v24 = vadd.f32 %v246_v20, %v206_v23 }
  0xc1   :  { %v257_v25 = vmul.f32 %v540_v22, %v540_v22 }
  0xc2   :  { %v258_v26 = vmul.f32 %v542_v24, %v542_v24 }
  0xc3   :  { %v265_v27 = vmul.f32 %v257_v25, %v540_v22 }
  0xc4   :  { %v266_v28 = vmul.f32 %v258_v26, %v542_v24  ;;  %v192_v29 = vpop.f32.mrf.mxu2 }
  0xc5   :  { %v273_v30 = vmul.f32 0.044715, %v265_v27  ;;  %v550_v31 = vadd.f32 %v245_v19, %v192_v29  ;;  %v211_v32 = vpop.f32.mrf.mxu3 }
  0xc6   :  { %v274_v33 = vmul.f32 0.044715, %v266_v28  ;;  %v552_v34 = vadd.f32 %v246_v20, %v211_v32  ;;  %v189_v35 = vpop.f32.mrf.mxu0 }
  0xc7   :  { %v281_v36 = vadd.f32 %v273_v30, %v540_v22  ;;  %v261_v37 = vmul.f32 %v550_v31, %v550_v31  ;;  %v557_v38 = vadd.f32 %v245_v19, %v189_v35  ;;  %v208_v39 = vpop.f32.mrf.mxu1 }
  0xc8   :  { %v282_v40 = vadd.f32 %v274_v33, %v542_v24  ;;  %v262_v41 = vmul.f32 %v552_v34, %v552_v34  ;;  %v562_v42 = vadd.f32 %v246_v20, %v208_v39 }
  0xc9   :  { %v289_v43 = vmul.f32 0.7978846, %v281_v36  ;;  %v269_v44 = vmul.f32 %v261_v37, %v550_v31  ;;  %v259_v45 = vmul.f32 %v557_v38, %v557_v38 }
  0xca   :  { %v290_v46 = vmul.f32 0.7978846, %v282_v40  ;;  %v270_v47 = vmul.f32 %v262_v41, %v552_v34  ;;  %v260_v48 = vmul.f32 %v562_v42, %v562_v42 }
  0xcb   :  { %447 = vtanh.f32 %v289_v43  ;;  %v277_v49 = vmul.f32 0.044715, %v269_v44  ;;  %v267_v50 = vmul.f32 %v259_v45, %v557_v38 }
  0xcc   :  { %449 = vtanh.f32 %v290_v46  ;;  %v278_v51 = vmul.f32 0.044715, %v270_v47  ;;  %v268_v52 = vmul.f32 %v260_v48, %v562_v42  ;;  %v194_v53 = vpop.f32.mrf.mxu2 }
  0xcd   :  { %v285_v54 = vadd.f32 %v277_v49, %v550_v31  ;;  %v275_v55 = vmul.f32 0.044715, %v267_v50  ;;  %v573_v56 = vadd.f32 %v245_v19, %v194_v53  ;;  %v213_v57 = vpop.f32.mrf.mxu3 }
  0xce   :  { %v286_v58 = vadd.f32 %v278_v51, %v552_v34  ;;  %v276_v59 = vmul.f32 0.044715, %v268_v52  ;;  %v256_v60 = vadd.f32 %v246_v20, %v213_v57 }
  0xcf   :  { %v293_v61 = vmul.f32 0.7978846, %v285_v54  ;;  %v283_v62 = vadd.f32 %v275_v55, %v557_v38  ;;  %v263_v63 = vmul.f32 %v573_v56, %v573_v56 }
  0xd0   :  { %v294_v0 = vmul.f32 0.7978846, %v286_v58  ;;  %v284_v1 = vadd.f32 %v276_v59, %v562_v42  ;;  %v264_v2 = vmul.f32 %v256_v60, %v256_v60 }
  0xd1   :  { %v448_v3 = vpop.eup %447  ;;  %451 = vtanh.f32 %v293_v61  ;;  %v291_v4 = vmul.f32 0.7978846, %v283_v62  ;;  %v271_v5 = vmul.f32 %v263_v63, %v573_v56 }
  0xd2   :  { %v450_v6 = vpop.eup %449  ;;  %v305_v7 = vadd.f32 1.0, %v448_v3  ;;  %453 = vtanh.f32 %v294_v0  ;;  %v292_v8 = vmul.f32 0.7978846, %v284_v1  ;;  %v272_v9 = vmul.f32 %v264_v2, %v256_v60 }
  0xd3   :  { %v306_v10 = vadd.f32 1.0, %v450_v6  ;;  %455 = vtanh.f32 %v291_v4  ;;  %v279_v11 = vmul.f32 0.044715, %v271_v5 }
  0xd4   :  { %v313_v12 = vmul.f32 0.5, %v305_v7  ;;  %457 = vtanh.f32 %v292_v8  ;;  %v280_v13 = vmul.f32 0.044715, %v272_v9 }
  0xd5   :  { %v314_v14 = vmul.f32 0.5, %v306_v10  ;;  %v287_v15 = vadd.f32 %v279_v11, %v573_v56 }
  0xd6   :  { %v321_v16 = vmul.f32 %v313_v12, %v540_v22  ;;  %v288_v17 = vadd.f32 %v280_v13, %v256_v60 }
  0xd7   :  { %v452_v18 = vpop.eup %451  ;;  %v322_v19 = vmul.f32 %v314_v14, %v542_v24  ;;  %v295_v20 = vmul.f32 0.7978846, %v287_v15 }
  0xd8   :  { %v454_v21 = vpop.eup %453  ;;  %v309_v23 = vadd.f32 1.0, %v452_v18  ;;  %v296_v25 = vmul.f32 0.7978846, %v288_v17 }
  0xd9   :  { %v456_v26 = vpop.eup %455  ;;  %v329_v27 = vpack.c.bf16 %v322_v19, %v321_v16  ;;  %v310_v28 = vadd.f32 1.0, %v454_v21  ;;  %459 = vtanh.f32 %v295_v20 }
  0xda   :  { %v458_v29 = vpop.eup %457  ;;  %v317_v30 = vmul.f32 0.5, %v309_v23  ;;  %v307_v32 = vadd.f32 1.0, %v456_v26  ;;  %461 = vtanh.f32 %v296_v25 }
  0xdb   :  { %333 = vst [vmem:[%s604_s3] sm:$0xff] %v329_v27  ;;  %v318_v22 = vmul.f32 0.5, %v310_v28  ;;  %v308_v33 = vadd.f32 1.0, %v458_v29 }
  0xdc   :  { %v325_v24 = vmul.f32 %v317_v30, %v550_v31  ;;  %v315_v35 = vmul.f32 0.5, %v307_v32 }
  0xdd   :  { %v326_v36 = vmul.f32 %v318_v22, %v552_v34  ;;  %v316_v37 = vmul.f32 0.5, %v308_v33 }
  0xde   :  { %v323_v39 = vmul.f32 %v315_v35, %v557_v38 }
  0xdf   :  { %v460_v40 = vpop.eup %459  ;;  %v331_v41 = vpack.c.bf16 %v326_v36, %v325_v24  ;;  %v324_v43 = vmul.f32 %v316_v37, %v562_v42 }
  0xe0   :  { %v462_v44 = vpop.eup %461  ;;  %v311_v45 = vadd.f32 1.0, %v460_v40 }
  0xe1   :  { %335 = vst [vmem:[%s604_s3 + $0x10] sm:$0xff] %v331_v41  ;;  %v330_v46 = vpack.c.bf16 %v324_v43, %v323_v39  ;;  %v312_v47 = vadd.f32 1.0, %v462_v44 }
  0xe2   :  { %v319_v48 = vmul.f32 0.5, %v311_v45 }
  0xe3   :  { %334 = vst [vmem:[%s604_s3 + $0x8] sm:$0xff] %v330_v46  ;;  %v320_v31 = vmul.f32 0.5, %v312_v47 }
  0xe4   :  { %v327_v34 = vmul.f32 %v319_v48, %v573_v56 }
  0xe5   :  { %v328_v38 = vmul.f32 %v320_v31, %v256_v60 }
  0xe7   :  { %v332_v49 = vpack.c.bf16 %v328_v38, %v327_v34 }
  0xe9   :  { %336 = vst [vmem:[%s604_s3 + $0x18] sm:$0xff] %v332_v49 }

// kernel: seq2seq_unixcoder_forward.21
= control target key start
LH: loop header
LB: loop body
LE: loop exit
PB: predicated region body
PF: predicated region fallthrough
CT: control target
= control target key end

     0   :  { %s1217_s15 = smov 0   ;;  %s1219_s16 = smov 0   ;;  %s1406_s0 = inlined_call_operand.vmem [shape: bf16[2,16,384], index: 0, kind: input, shape index: {}, may-alias: {0,1,2}]   ;;  %s1407_s1 = inlined_call_operand.vmem [shape: bf16[2,16,384], index: 1, kind: input, shape index: {}, may-alias: {0,1,2}]   ;;  %s1408_s2 = inlined_call_operand.vmem [shape: bf16[2,16,384], index: 2, kind: input, shape index: {}, may-alias: {0,1,2}]   ;;  %s1409_s3 = inlined_call_operand.vmem [shape: s32[2,1,16], index: 3, kind: input, shape index: {}]   ;;  %s1410_s4 = inlined_call_operand.vmem [shape: bf16[2,16,128], index: 4, kind: output, shape index: {}]  }
   0x1   :  { %s1221_s17 = smov 0   ;;  %s1223_s18 = smov 0  }
   0x2   :  { %s1225_s19 = smov 0  }
   0x3 LB: > { %s26_s20 = sadd.s32 1, %s1182_s18  ;;  %p42_p1 = scmp.ne.s32.totalorder %s1174_s16, %s1170_s15  ;;  %s1186_s19 = sphi %s1225_s19, %s14_s19   ;;  %s1182_s18 = sphi %s1223_s18, %s1417_s18   ;;  %s1178_s17 = sphi %s1221_s17, %s1416_s17   ;;  %s1174_s16 = sphi %s1219_s16, %s1415_s16   ;;  %s1170_s15 = sphi %s1217_s15, %s1414_s15  }
   0x4   : > { %p28_p0 = scmp.ge.s32.totalorder %s26_s20, 2  ;;  %p43_p2 = scmp.eq.s32.totalorder %s1186_s19, 0 }
   0x5   : > { %s35_s23 = sadd.s32 1, %s1174_s16  ;;  %p983_p5 = scmp.ge.s32.totalorder %s1186_s19, 2 }
   0x6   : > { %s1419_s20 = smov (%p28_p0, %s26_s20), 0  ;;  %p1248_p3 = por %p43_p2, %p42_p1 }
   0x7   : > { %s30_s22 = ssub.s32 %s1182_s18, %s1419_s20  ;;  %174 = sbr.rel (%p983_p5) target bundleno = 33 (0x21), region = 16 }
   0x8   : > { %p33_p4 = scmp.eq.s32.totalorder %s30_s22, 0 }
   0xa   : > { %s1256_s24 = scalar_select %p33_p4, %s1174_s16, %s35_s23  }
   0xc   : > { %177 = sbr.rel (!%p1248_p3) target bundleno = 19 (0x13), region = 20  ;;  %s179_s25 = sand.u32 (%p1248_p3), 1, %s1174_s16  }
   0xd   : > { %s1071_s26 = smul.u32 (%p1248_p3), 24, %s1182_s18  ;;  %s984_s27 = sshll.u32 (%p1248_p3), %s179_s25, 3 }
   0xe   : > { %s181_s5 = scalar_lea.vmem (%p1248_p3), [#allocation2], %s984_s27 }
   0xf   : > { %s187_s30 = scalar_lea.vmem (%p1248_p3), %s1406_s0, %s1071_s26 }
  0x10   : > { %v204_v0 = vld [vmem:[%s187_s30] sm:$0xf] (%p1248_p3)  ;;  %v206_v1 = vld [vmem:[%s187_s30 + $0xc] sm:$0xf] (%p1248_p3) }
  0x11   : > { %205 = vst [vmem:[%s181_s5] sm:$0xf] %v204_v0 }
  0x12   : > { %207 = vst [vmem:[%s181_s5 + $0x4] sm:$0xf] %v206_v1 }
  0x13 PF: > { %235 = sbr.rel (!%p1248_p3) target bundleno = 26 (0x1a), region = 61  ;;  %s237_s6 = sand.u32 (%p1248_p3), 1, %s1174_s16  }
  0x14   : > { %s987_s7 = smul.u32 (%p1248_p3), 24, %s1182_s18  ;;  %s986_s8 = sshll.u32 (%p1248_p3), %s237_s6, 3 }
  0x15   : > { %s239_s12 = scalar_lea.vmem (%p1248_p3), [#allocation3], %s986_s8 }
  0x16   : > { %s882_s11 = scalar_lea.vmem (%p1248_p3), %s1407_s1, %s987_s7 }
  0x17   : > { %v988_v2 = vld [vmem:[%s882_s11 + $0x4] sm:$0xf] (%p1248_p3)  ;;  %v989_v3 = vld [vmem:[%s882_s11 + $0x10] sm:$0xf] (%p1248_p3) }
  0x18   : > { %261 = vst [vmem:[%s239_s12] sm:$0xf] %v988_v2 }
  0x19   : > { %263 = vst [vmem:[%s239_s12 + $0x4] sm:$0xf] %v989_v3 }
  0x1a PF: > { %291 = sbr.rel (!%p1248_p3) target bundleno = 33 (0x21), region = 102  ;;  %s293_s13 = sand.u32 (%p1248_p3), 1, %s1174_s16  }
  0x1b   : > { %s991_s14 = smul.u32 (%p1248_p3), 24, %s1182_s18  ;;  %s990_s22 = sshll.u32 (%p1248_p3), %s293_s13, 3 }
  0x1c   : > { %s295_s27 = scalar_lea.vmem (%p1248_p3), [#allocation4], %s990_s22 }
  0x1d   : > { %s888_s26 = scalar_lea.vmem (%p1248_p3), %s1408_s2, %s991_s14 }
  0x1e   : > { %v992_v4 = vld [vmem:[%s888_s26 + $0x8] sm:$0xf] (%p1248_p3)  ;;  %v993_v5 = vld [vmem:[%s888_s26 + $0x14] sm:$0xf] (%p1248_p3) }
  0x1f   : > { %317 = vst [vmem:[%s295_s27] sm:$0xf] %v992_v4 }
  0x20   : > { %319 = vst [vmem:[%s295_s27 + $0x4] sm:$0xf] %v993_v5 }
  0x21 PF: > { %p994_p6 = scmp.ge.s32.totalorder %s1186_s19, 1  ;;  %p352_p7 = scmp.lt.s32.totalorder %s1186_s19, 3 }
  0x23   : > { %p353_p8 = pnand %p994_p6, %p352_p7 }
  0x24   : > { %s359_s21 = sand.u32 (!%p353_p8), 1, %s1170_s15   ;;  %s1188_s30 = smov (!%p353_p8), 96  }
  0x25   : > { %356 = sbr.rel (%p353_p8) target bundleno = 869 (0x365), region = 147  ;;  %s1283_s28 = sshll.u32 (!%p353_p8), %s359_s21, 3 }
  0x26   : > { %s368_s29 = scalar_lea.vmem (!%p353_p8), [#allocation3], %s1283_s28  ;;  %s1189_s5 = smov (!%p353_p8), 64  }
  0x27   : > { %s1290_s15 = scalar_lea.vmem (!%p353_p8), [#allocation2], %s1283_s28  ;;  %s1190_s6 = smov (!%p353_p8), 32  }
  0x28   : > { %p414_p9 = scmp.lt.s32.totalorder (!%p353_p8), %s1178_s17, 1  ;;  %s1324_s10 = scalar_lea.vmem (!%p353_p8), [#allocation4], %s1283_s28 }
  0x2a   : > { %vm447_vm0 = vcmask 261120   ;;  %v1060_v6 = vld [vmem:[%s368_s29] sm:$0xff]  ;;  %v1059_v10 = vld [vmem:[%s1290_s15] sm:$0xff]  ;;  %s1421_s17 = smov (!%p414_p9, %s1178_s17), 1  ;;  %v1191_v21 = vmov 0   ;;  %vm472_vm3 = vcmask 130048  }
  0x2b   : > { %v1063_v7 = vld [vmem:[%s368_s29] sm:$0xff]  ;;  %v452_v9 = vsel %vm447_vm0, %v1060_v6, 0  ;;  %v1062_v11 = vld [vmem:[%s1290_s15] sm:$0xff]  ;;  %s416_s9 = scalar_lea.vmem %s1409_s3, %s1421_s17  ;;  %s1058_s11 = sshll.u32 %s1421_s17, 3  ;;  %vm523_vm4 = vcmask 257024   ;;  %vm628_vm5 = vcmask 519424  }
  0x2c   : > { %v1066_v8 = vld [vmem:[%s368_s29] sm:$0xff]  ;;  %542 = vrot.lane.b32.xlu1 %v1063_v7, %s1188_s30  ;;  %461 = vmatpush.bf16.xpose.msra.mxu0 %v452_v9  ;;  %v1068_v13 = vld [vmem:[%s1290_s15] sm:$0xff]  ;;  %s1377_s14 = scalar_lea.vmem %s1410_s4, %s1058_s11  ;;  %vm733_vm6 = vcmask 781824   ;;  %vm838_vm7 = vcmask 1044224  }
  0x2d   : > { %647 = vrot.lane.b32.xlu2 %v1066_v8, %s1189_s5  ;;  %v1069_v12 = vld [vmem:[%s368_s29] sm:$0xff]  ;;  %v428_v19 = vld [vmem:[%s416_s9] sm:$0x1] }
  0x2e   : > { %vm429_vm1 = vcmp.ne.s32.totalorder %v428_v19, 0  ;;  %v1065_v34 = vld [vmem:[%s1290_s15] sm:$0xff] }
  0x2f   : > { %v430_v22 = vsel %vm429_vm1, 1, %v1191_v21  ;;  %v1061_v35 = vld [vmem:[%s1324_s10] sm:$0xff] }
  0x30   : > { %v431_v23 = vperm.slane %v430_v22, 0  ;;  %510 = vmatpush.bf16.msra.mxu1 %v1061_v35  ;;  %v1064_v44 = vld [vmem:[%s1324_s10] sm:$0xff] }
  0x31   : > { %v1070_v0 = vld [vmem:[%s1324_s10] sm:$0xff] }
  0x32   : > { %vm1311_vm2 = vcmp.eq.s32.totalorder %v431_v23, 1  ;;  %v1067_v35 = vld [vmem:[%s1324_s10] sm:$0xff] }
  0x33   : > { %1008 = vmatmul.msk.bf16.vlgmr.msra.gmra.mxu0 %vm447_vm0, %v1059_v10 }
  0x34   : > { %535 = vrot.lane.b32.xlu1 %v1062_v11, %s1188_s30 }
  0x35   : > { %752 = vrot.lane.b32.xlu2 %v1069_v12, %s1190_s6 }
  0x3c   : > { %745 = vrot.lane.b32.xlu1 %v1068_v13, %s1190_s6 }
  0x87   : > { %v648_v14 = vpop.permute.xlu2 %647 }
  0x88   : > { %v653_v36 = vsel %vm447_vm0, %v648_v14, 0 }
  0x89   : > { %662 = vmatpush.bf16.xpose.msrb.mxu1 %v653_v36 }
  0x8f   : > { %v753_v15 = vpop.permute.xlu2 %752 }
  0x90   : > { %v758_v16 = vsel %vm447_vm0, %v753_v15, 0 }
  0x91   : > { %767 = vmatpush.bf16.xpose.msrb.mxu0 %v758_v16 }
  0x9e   : > { %v543_v17 = vpop.permute.xlu1 %542 }
  0x9f   : > { %v548_v18 = vsel %vm447_vm0, %v543_v17, 0 }
  0xa0   : > { %557 = vmatpush.bf16.xpose.msra.mxu2 %v548_v18 }
  0xa6   : > { %v536_v20 = vpop.permute.xlu1 %535 }
  0xa7   : > { %1022 = vmatmul.msk.bf16.vlgmr.msra.gmra.mxu2 %vm447_vm0, %v536_v20 }
  0xae   : > { %v746_v24 = vpop.permute.xlu1 %745 }
  0xaf   : > { %1050 = vmatmul.msk.bf16.vlgmr.msrb.gmra.mxu0 %vm447_vm0, %v746_v24 }
  0xb0   : > { %v463_v25 = vpop.f32.mrf.mxu0 }
  0xb1   : > { %v468_v27 = vmul.f32 0.17677669, %v463_v25 }
  0xb3   : > { %v470_v28 = vsel %vm1311_vm2, %v468_v27, -1e+30 }
  0xb4   : > { %v473_v29 = vsel %vm472_vm3, %v470_v28, -inf }
  0xb5   : > { %474 = vmax.xlane.f32.xlu0 %v473_v29 }
  0xb8   : > { %v465_v30 = vpop.f32.mrf.mxu0 }
  0xb9   : > { %v469_v31 = vmul.f32 0.17677669, %v465_v30 }
  0xbb   : > { %v471_v32 = vsel %vm1311_vm2, %v469_v31, -1e+30 }
  0xbc   : > { %v476_v33 = vsel %vm472_vm3, %v471_v32, -inf }
  0xbd   : > { %477 = vmax.xlane.f32.xlu0 %v476_v33 }
  0xd1   : > { %640 = vrot.lane.b32.xlu0 %v1065_v34, %s1189_s5 }
  0xd9   : > { %594 = vrot.lane.b32.xlu0 %v1064_v44, %s1188_s30 }
 0x128   : > { %v475_v37 = vpop.xlane.xlu0 %474 }
 0x129   : > { %v479_v41 = vsub.f32 %v470_v28, %v475_v37 }
 0x12a   : > { %v559_v38 = vpop.f32.mrf.mxu2 }
 0x12b   : > { %v564_v39 = vmul.f32 0.17677669, %v559_v38  ;;  %v481_v46 = vmul.f32 1.442695, %v479_v41 }
 0x12c   : > { %v769_v40 = vpop.f32.mrf.mxu0 }
 0x12d   : > { %v774_v42 = vmul.f32 0.17677669, %v769_v40  ;;  %v566_v43 = vsel %vm1311_vm2, %v564_v39, -1e+30  ;;  %1116 = vpow2.f32 %v481_v46 }
 0x12e   : > { %v568_v45 = vsel %vm472_vm3, %v566_v43, -inf }
 0x12f   : > { %569 = vmax.xlane.f32.xlu2 %v568_v45  ;;  %v776_v48 = vsel %vm1311_vm2, %v774_v42, -1e+30 }
 0x130   : > { %v478_v47 = vpop.xlane.xlu0 %477  ;;  %v778_v54 = vsel %vm472_vm3, %v776_v48, -inf }
 0x131   : > { %v480_v49 = vsub.f32 %v471_v32, %v478_v47 }
 0x132   : > { %v561_v50 = vpop.f32.mrf.mxu2 }
 0x133   : > { %v565_v51 = vmul.f32 0.17677669, %v561_v50  ;;  %v483_v52 = vmul.f32 1.442695, %v480_v49  ;;  %v1117_v59 = vpop.eup %1116 }
 0x134   : > { %v771_v53 = vpop.f32.mrf.mxu0  ;;  %v485_v26 = vsel %vm472_vm3, %v1117_v59, 0.0 }
 0x135   : > { %v567_v55 = vsel %vm1311_vm2, %v565_v51, -1e+30  ;;  %v775_v56 = vmul.f32 0.17677669, %v771_v53  ;;  %1118 = vpow2.f32 %v483_v52 }
 0x136   : > { %v571_v57 = vsel %vm472_vm3, %v567_v55, -inf }
 0x137   : > { %572 = vmax.xlane.f32.xlu1 %v571_v57  ;;  %779 = vmax.xlane.f32.xlu2 %v778_v54  ;;  %v777_v58 = vsel %vm1311_vm2, %v775_v56, -1e+30 }
 0x138   : > { %v781_v61 = vsel %vm472_vm3, %v777_v58, -inf }
 0x13b   : > { %v1119_v60 = vpop.eup %1118 }
 0x13c   : > { %v491_v62 = vpack.c.bf16 %v1119_v60, %v1117_v59  ;;  %v488_v37 = vsel %vm472_vm3, %v1119_v60, 0.0 }
 0x13e   : > { %1013 = vmatmul.msk.bf16.vlgmr.msra.gmra.mxu1 %vm472_vm3, %v491_v62 }
 0x13f   : > { %782 = vmax.xlane.f32.xlu1 %v781_v61 }
 0x143   : > { %v641_v63 = vpop.permute.xlu0 %640 }
 0x14b   : > { %v595_v1 = vpop.permute.xlu0 %594 }
 0x14c   : > { %607 = vmatpush.bf16.msra.mxu3 %v595_v1 }
 0x14e   : > { %1036 = vmatmul.msk.bf16.vlgmr.msrb.gmra.mxu1 %vm447_vm0, %v641_v63 }
 0x158   : > { %804 = vrot.lane.b32.xlu1 %v1070_v0, %s1190_s6 }
 0x1a2   : > { %v570_v2 = vpop.xlane.xlu2 %569 }
 0x1a3   : > { %v574_v3 = vsub.f32 %v566_v43, %v570_v2 }
 0x1a5   : > { %v576_v4 = vmul.f32 1.442695, %v574_v3 }
 0x1a7   : > { %1120 = vpow2.f32 %v576_v4 }
 0x1aa   : > { %v573_v5 = vpop.xlane.xlu1 %572  ;;  %v780_v10 = vpop.xlane.xlu2 %779 }
 0x1ab   : > { %v575_v6 = vsub.f32 %v567_v55, %v573_v5  ;;  %v784_v13 = vsub.f32 %v776_v48, %v780_v10 }
 0x1ad   : > { %v578_v7 = vmul.f32 1.442695, %v575_v6  ;;  %v1121_v8 = vpop.eup %1120  ;;  %v786_v16 = vmul.f32 1.442695, %v784_v13 }
 0x1ae   : > { %v580_v31 = vsel %vm472_vm3, %v1121_v8, 0.0 }
 0x1af   : > { %1122 = vpow2.f32 %v578_v7 }
 0x1b0   : > { %1124 = vpow2.f32 %v786_v16 }
 0x1b2   : > { %v783_v11 = vpop.xlane.xlu1 %782 }
 0x1b3   : > { %v785_v14 = vsub.f32 %v777_v58, %v783_v11 }
 0x1b5   : > { %v1123_v9 = vpop.eup %1122  ;;  %v788_v17 = vmul.f32 1.442695, %v785_v14 }
 0x1b6   : > { %v586_v12 = vpack.c.bf16 %v1123_v9, %v1121_v8  ;;  %v1125_v19 = vpop.eup %1124  ;;  %v583_v33 = vsel %vm472_vm3, %v1123_v9, 0.0 }
 0x1b7   : > { %1126 = vpow2.f32 %v788_v17  ;;  %v790_v34 = vsel %vm472_vm3, %v1125_v19, 0.0 }
 0x1b8   : > { %1027 = vmatmul.msk.bf16.vlgmr.msra.gmra.mxu3 %vm472_vm3, %v586_v12 }
 0x1bb   : > { %v1347_v15 = vpop.f32.mrf.mxu1 }
 0x1bd   : > { %v1127_v20 = vpop.eup %1126 }
 0x1be   : > { %v796_v22 = vpack.c.bf16 %v1127_v20, %v1125_v19  ;;  %v793_v36 = vsel %vm472_vm3, %v1127_v20, 0.0 }
 0x1c3   : > { %v1349_v18 = vpop.f32.mrf.mxu1 }
 0x1ca   : > { %v805_v21 = vpop.permute.xlu1 %804 }
 0x1cb   : > { %817 = vmatpush.bf16.msrb.mxu2 %v805_v21  ;;  %v664_v23 = vpop.f32.mrf.mxu1 }
 0x1cc   : > { %v669_v24 = vmul.f32 0.17677669, %v664_v23 }
 0x1ce   : > { %1055 = vmatmul.msk.bf16.vlgmr.msrb.gmra.mxu2 %vm472_vm3, %v796_v22  ;;  %v671_v25 = vsel %vm1311_vm2, %v669_v24, -1e+30 }
 0x1cf   : > { %v673_v27 = vsel %vm472_vm3, %v671_v25, -inf }
 0x1d0   : > { %674 = vmax.xlane.f32.xlu0 %v673_v27 }
 0x1d3   : > { %v666_v28 = vpop.f32.mrf.mxu1 }
 0x1d4   : > { %v670_v29 = vmul.f32 0.17677669, %v666_v28 }
 0x1d6   : > { %v672_v30 = vsel %vm1311_vm2, %v670_v29, -1e+30 }
 0x1d7   : > { %v676_v32 = vsel %vm472_vm3, %v672_v30, -inf }
 0x1d8   : > { %581 = vadd.xlane.f32.xlu0 %v580_v31  ;;  %677 = vmax.xlane.f32.xlu2 %v676_v32 }
 0x1e0   : > { %584 = vadd.xlane.f32.xlu0 %v583_v33 }
 0x1e8   : > { %791 = vadd.xlane.f32.xlu0 %v790_v34 }
 0x1f0   : > { %794 = vadd.xlane.f32.xlu0 %v793_v36  ;;  %699 = vrot.lane.b32.xlu2 %v1067_v35, %s1189_s5 }
 0x1f8   : > { %486 = vadd.xlane.f32.xlu0 %v485_v26 }
 0x200   : > { %489 = vadd.xlane.f32.xlu0 %v488_v37 }
 0x23b   : > { %v609_v48 = vpop.f32.mrf.mxu3 }
 0x243   : > { %v675_v38 = vpop.xlane.xlu0 %674  ;;  %v611_v59 = vpop.f32.mrf.mxu3 }
 0x244   : > { %v679_v39 = vsub.f32 %v671_v25, %v675_v38 }
 0x246   : > { %v681_v40 = vmul.f32 1.442695, %v679_v39 }
 0x248   : > { %1128 = vpow2.f32 %v681_v40 }
 0x24b   : > { %v678_v41 = vpop.xlane.xlu2 %677  ;;  %v582_v42 = vpop.xlane.xlu0 %581 }
 0x24c   : > { %v680_v43 = vsub.f32 %v672_v30, %v678_v41  ;;  %1130 = vrcp.f32 %v582_v42 }
 0x24e   : > { %v1129_v44 = vpop.eup %1128  ;;  %v683_v45 = vmul.f32 1.442695, %v680_v43 }
 0x24f   : > { %v685_v46 = vsel %vm472_vm3, %v1129_v44, 0.0 }
 0x250   : > { %1132 = vpow2.f32 %v683_v45  ;;  %686 = vadd.xlane.f32.xlu2 %v685_v46 }
 0x251   : > { %v819_v58 = vpop.f32.mrf.mxu2 }
 0x252   : > { %v1131_v47 = vpop.eup %1130 }
 0x253   : > { %v616_v49 = vmul.f32 %v1131_v47, %v609_v48  ;;  %v700_v50 = vpop.permute.xlu2 %699  ;;  %v585_v51 = vpop.xlane.xlu0 %584 }
 0x254   : > { %712 = vmatpush.bf16.msrb.mxu3 %v700_v50  ;;  %1134 = vrcp.f32 %v585_v51 }
 0x255   : > { %v618_v52 = vpack.c.bf16 %v616_v49, %v616_v49 }
 0x256   : > { %v1133_v53 = vpop.eup %1132 }
 0x257   : > { %622 = vrot.lane.b32.xlu0 %v618_v52, %s1190_s6  ;;  %v688_v54 = vsel %vm472_vm3, %v1133_v53, 0.0  ;;  %v691_v55 = vpack.c.bf16 %v1133_v53, %v1129_v44 }
 0x258   : > { %689 = vadd.xlane.f32.xlu1 %v688_v54 }
 0x259   : > { %1041 = vmatmul.msk.bf16.vlgmr.msrb.gmra.mxu3 %vm472_vm3, %v691_v55  ;;  %v821_v2 = vpop.f32.mrf.mxu2 }
 0x25a   : > { %v1135_v57 = vpop.eup %1134 }
 0x25b   : > { %v792_v56 = vpop.xlane.xlu0 %791  ;;  %v617_v61 = vmul.f32 %v1135_v57, %v611_v59 }
 0x25c   : > { %1136 = vrcp.f32 %v792_v56 }
 0x25d   : > { %v619_v0 = vpack.c.bf16 %v617_v61, %v617_v61 }
 0x262   : > { %v1137_v60 = vpop.eup %1136 }
 0x263   : > { %v795_v62 = vpop.xlane.xlu0 %794  ;;  %v826_v63 = vmul.f32 %v1137_v60, %v819_v58 }
 0x264   : > { %1138 = vrcp.f32 %v795_v62 }
 0x265   : > { %v828_v25 = vpack.c.bf16 %v826_v63, %v826_v63 }
 0x268   : > { %624 = vrot.lane.b32.xlu2 %v619_v0, %s1190_s6 }
 0x26a   : > { %v1139_v1 = vpop.eup %1138 }
 0x26b   : > { %v487_v3 = vpop.xlane.xlu0 %486  ;;  %v827_v4 = vmul.f32 %v1139_v1, %v821_v2 }
 0x26c   : > { %1140 = vrcp.f32 %v487_v3 }
 0x26d   : > { %v829_v5 = vpack.c.bf16 %v827_v4, %v827_v4 }
 0x270   : > { %834 = vrot.lane.b32.xlu2 %v829_v5, %s1188_s30 }
 0x272   : > { %v1141_v6 = vpop.eup %1140 }
 0x273   : > { %v519_v7 = vmul.f32 %v1141_v6, %v1347_v15  ;;  %v490_v8 = vpop.xlane.xlu0 %489 }
 0x274   : > { %1142 = vrcp.f32 %v490_v8 }
 0x275   : > { %v521_v9 = vpack.c.bf16 %v519_v7, %v519_v7 }
 0x277   : > { %524 = vst.msk [vmem:[%s1377_s14] sm:$0xf] %vm523_vm4, %v521_v9 }
 0x27a   : > { %v1143_v10 = vpop.eup %1142 }
 0x27b   : > { %v520_v11 = vmul.f32 %v1143_v10, %v1349_v18 }
 0x27d   : > { %v522_v12 = vpack.c.bf16 %v520_v11, %v520_v11 }
 0x27f   : > { %525 = vst.msk [vmem:[%s1377_s14 + $0x4] sm:$0xf] %vm523_vm4, %v522_v12 }
 0x2c3   : > { %v687_v13 = vpop.xlane.xlu2 %686 }
 0x2c4   : > { %1144 = vrcp.f32 %v687_v13 }
 0x2c9   : > { %v623_v14 = vpop.permute.xlu0 %622 }
 0x2ca   : > { %629 = vst.msk [vmem:[%s1377_s14] sm:$0xf] %vm628_vm5, %v623_v14  ;;  %v1145_v17 = vpop.eup %1144 }
 0x2cb   : > { %v625_v15 = vpop.permute.xlu2 %624  ;;  %v690_v16 = vpop.xlane.xlu1 %689 }
 0x2cc   : > { %630 = vst.msk [vmem:[%s1377_s14 + $0x4] sm:$0xf] %vm628_vm5, %v625_v15  ;;  %1146 = vrcp.f32 %v690_v16 }
 0x2d2   : > { %v1147_v18 = vpop.eup %1146 }
 0x2d3   : > { %v835_v29 = vpop.permute.xlu2 %834 }
 0x2dc   : > { %v714_v19 = vpop.f32.mrf.mxu3 }
 0x2dd   : > { %v721_v20 = vmul.f32 %v1145_v17, %v714_v19 }
 0x2df   : > { %v723_v21 = vpack.c.bf16 %v721_v20, %v721_v20 }
 0x2e1   : > { %727 = vrot.lane.b32.xlu1 %v723_v21, %s1189_s5 }
 0x2e4   : > { %v716_v22 = vpop.f32.mrf.mxu3 }
 0x2e5   : > { %v722_v23 = vmul.f32 %v1147_v18, %v716_v22 }
 0x2e7   : > { %v724_v24 = vpack.c.bf16 %v722_v23, %v722_v23 }
 0x2e9   : > { %729 = vrot.lane.b32.xlu0 %v724_v24, %s1189_s5 }
 0x2f1   : > { %832 = vrot.lane.b32.xlu0 %v828_v25, %s1188_s30 }
 0x353   : > { %v728_v27 = vpop.permute.xlu1 %727 }
 0x354   : > { %734 = vst.msk [vmem:[%s1377_s14] sm:$0xf] %vm733_vm6, %v728_v27 }
 0x35b   : > { %v730_v28 = vpop.permute.xlu0 %729 }
 0x35c   : > { %735 = vst.msk [vmem:[%s1377_s14 + $0x4] sm:$0xf] %vm733_vm6, %v730_v28 }
 0x35d   : > { %840 = vst.msk [vmem:[%s1377_s14 + $0x4] sm:$0xf] %vm838_vm7, %v835_v29 }
 0x363   : > { %v833_v30 = vpop.permute.xlu0 %832 }
 0x364   : > { %839 = vst.msk [vmem:[%s1377_s14] sm:$0xf] %vm838_vm7, %v833_v30 }
 0x365 PF: > { %s14_s19 = sadd.s32 1, %s1186_s19   ;;  %s1414_s15 = smov %s1174_s16 }
 0x366   : > { %p11_p10 = scmp.ge.s32.totalorder %s14_s19, 4   ;;  %s1415_s16 = smov %s1256_s24 }
 0x367   : > { %s1416_s17 = smov %s1182_s18  ;;  %s1417_s18 = smov %s1419_s20 }
 0x368   :  { %13 = sbr.rel (!%p11_p10) target bundleno = 3 (0x3), region = 213 }

// kernel: seq2seq_unixcoder_forward.37
= control target key start
LH: loop header
LB: loop body
LE: loop exit
PB: predicated region body
PF: predicated region fallthrough
CT: control target
= control target key end

     0   :  { %vm21_vm0 = vcmask 7168   ;;  %v850_v46 = vmov -1e+30   ;;  %s1151_s1 = inlined_call_operand.vmem [shape: bf16[512,128], index: 1, kind: input, shape index: {}]   ;;  %s1152_s0 = inlined_call_operand.vmem [shape: bf16[32,128], index: 0, kind: input, shape index: {}]   ;;  %s1153_s3 = inlined_call_operand.vmem [shape: f32[1,512], index: 3, kind: input, shape index: {}]   ;;  %s1154_s2 = inlined_call_operand.vmem [shape: bf16[32,128], index: 2, kind: input, shape index: {}]   ;;  %s1155_s4 = inlined_call_operand.vmem [shape: f32[32,1], index: 4, kind: output, shape index: {}]  }
   0x1   :  { %v753_v0 = vld [vmem:[%s1151_s1 + $0x38] sm:$0xff]  ;;  %v752_v4 = vld [vmem:[%s1151_s1 + $0x30] sm:$0xff]  ;;  %v751_v8 = vld [vmem:[%s1151_s1 + $0x28] sm:$0xff]  ;;  %22 = vst.msk [vmem:[#allocation2] sm:$0xff] %vm21_vm0, %v850_v46 }
   0x2   :  { %v761_v1 = vld [vmem:[%s1151_s1 + $0x78] sm:$0xff]  ;;  %344 = vmatpush.bf16.xpose.msra.mxu0 %v753_v0  ;;  %v760_v5 = vld [vmem:[%s1151_s1 + $0x70] sm:$0xff]  ;;  %v759_v9 = vld [vmem:[%s1151_s1 + $0x68] sm:$0xff]  ;;  %23 = vst.msk [vmem:[#allocation2 + $0x8] sm:$0xff] %vm21_vm0, %v850_v46 }
   0x3   :  { %v769_v2 = vld [vmem:[%s1151_s1 + $0xb8] sm:$0xff]  ;;  %363 = vmatpush.bf16.xpose.msra.mxu1 %v761_v1  ;;  %v768_v6 = vld [vmem:[%s1151_s1 + $0xb0] sm:$0xff]  ;;  %v767_v10 = vld [vmem:[%s1151_s1 + $0xa8] sm:$0xff]  ;;  %24 = vst.msk [vmem:[#allocation2 + $0x10] sm:$0xff] %vm21_vm0, %v850_v46 }
   0x4   :  { %v777_v3 = vld [vmem:[%s1151_s1 + $0xf8] sm:$0xff]  ;;  %382 = vmatpush.bf16.xpose.msra.mxu2 %v769_v2  ;;  %v776_v7 = vld [vmem:[%s1151_s1 + $0xf0] sm:$0xff]  ;;  %v775_v11 = vld [vmem:[%s1151_s1 + $0xe8] sm:$0xff]  ;;  %25 = vst.msk [vmem:[#allocation2 + $0x18] sm:$0xff] %vm21_vm0, %v850_v46 }
   0x5   :  { %401 = vmatpush.bf16.xpose.msra.mxu3 %v777_v3  ;;  %v750_v12 = vld [vmem:[%s1151_s1 + $0x20] sm:$0xff]  ;;  %v749_v16 = vld [vmem:[%s1151_s1 + $0x18] sm:$0xff]  ;;  %v748_v20 = vld [vmem:[%s1151_s1 + $0x10] sm:$0xff] }
   0x6   :  { %v758_v13 = vld [vmem:[%s1151_s1 + $0x60] sm:$0xff]  ;;  %v757_v17 = vld [vmem:[%s1151_s1 + $0x58] sm:$0xff]  ;;  %v756_v21 = vld [vmem:[%s1151_s1 + $0x50] sm:$0xff] }
   0x7   :  { %v766_v14 = vld [vmem:[%s1151_s1 + $0xa0] sm:$0xff]  ;;  %v765_v18 = vld [vmem:[%s1151_s1 + $0x98] sm:$0xff]  ;;  %v764_v22 = vld [vmem:[%s1151_s1 + $0x90] sm:$0xff] }
   0x8   :  { %v774_v15 = vld [vmem:[%s1151_s1 + $0xe0] sm:$0xff]  ;;  %v773_v19 = vld [vmem:[%s1151_s1 + $0xd8] sm:$0xff]  ;;  %v772_v23 = vld [vmem:[%s1151_s1 + $0xd0] sm:$0xff] }
   0x9   :  { %v747_v24 = vld [vmem:[%s1151_s1 + $0x8] sm:$0xff]  ;;  %v746_v28 = vld [vmem:[%s1151_s1] sm:$0xff] }
   0xa   :  { %345 = vmatpush.bf16.xpose.msra.mxu0 %v752_v4  ;;  %v755_v25 = vld [vmem:[%s1151_s1 + $0x48] sm:$0xff]  ;;  %v754_v29 = vld [vmem:[%s1151_s1 + $0x40] sm:$0xff] }
   0xb   :  { %364 = vmatpush.bf16.xpose.msra.mxu1 %v760_v5  ;;  %v763_v26 = vld [vmem:[%s1151_s1 + $0x88] sm:$0xff]  ;;  %v762_v30 = vld [vmem:[%s1151_s1 + $0x80] sm:$0xff] }
   0xc   :  { %383 = vmatpush.bf16.xpose.msra.mxu2 %v768_v6  ;;  %v771_v27 = vld [vmem:[%s1151_s1 + $0xc8] sm:$0xff]  ;;  %v770_v31 = vld [vmem:[%s1151_s1 + $0xc0] sm:$0xff] }
   0xd   :  { %402 = vmatpush.bf16.xpose.msra.mxu3 %v776_v7  ;;  %v744_v32 = vld [vmem:[%s1152_s0] sm:$0xff]  ;;  %v745_v33 = vld [vmem:[%s1152_s0 + $0x8] sm:$0xff] }
   0xe   :  { %v130_v34 = vld [vmem:[%s1153_s3] sm:$0xf] }
   0xf   :  { %v132_v35 = vperm.slane %v130_v34, 0  ;;  %v133_v36 = vperm.slane %v130_v34, 1  ;;  %v134_v41 = vperm.slane %v130_v34, 2  ;;  %v135_v42 = vperm.slane %v130_v34, 3  ;;  %v1069_v34 = vld [vmem:[#allocation2 + $0x18] sm:$0xff] }
  0x12   :  { %346 = vmatpush.bf16.xpose.msra.mxu0 %v751_v8 }
  0x13   :  { %365 = vmatpush.bf16.xpose.msra.mxu1 %v759_v9 }
  0x14   :  { %384 = vmatpush.bf16.xpose.msra.mxu2 %v767_v10 }
  0x15   :  { %403 = vmatpush.bf16.xpose.msra.mxu3 %v775_v11 }
  0x1a   :  { %347 = vmatpush.bf16.xpose.msra.mxu0 %v750_v12 }
  0x1b   :  { %366 = vmatpush.bf16.xpose.msra.mxu1 %v758_v13 }
  0x1c   :  { %385 = vmatpush.bf16.xpose.msra.mxu2 %v766_v14 }
  0x1d   :  { %404 = vmatpush.bf16.xpose.msra.mxu3 %v774_v15 }
  0x22   :  { %348 = vmatpush.bf16.xpose.msra.mxu0 %v749_v16 }
  0x23   :  { %367 = vmatpush.bf16.xpose.msra.mxu1 %v757_v17 }
  0x24   :  { %386 = vmatpush.bf16.xpose.msra.mxu2 %v765_v18 }
  0x25   :  { %405 = vmatpush.bf16.xpose.msra.mxu3 %v773_v19 }
  0x2a   :  { %349 = vmatpush.bf16.xpose.msra.mxu0 %v748_v20  ;;  %v851_v20 = vmov 0  }
  0x2b   :  { %368 = vmatpush.bf16.xpose.msra.mxu1 %v756_v21  ;;  %799 = vset.pattern.permute.xlu2 %v851_v20  ;;  %v852_v21 = vmov 0.0  }
  0x2c   :  { %387 = vmatpush.bf16.xpose.msra.mxu2 %v764_v22  ;;  %800 = vset.pattern.permute.xlu0 %v851_v20  ;;  %26 = vst.msk [vmem:[#allocation3] sm:$0xff] %vm21_vm0, %v852_v21  ;;  %v1039_v22 = vld [vmem:[#allocation2] sm:$0xff] }
  0x2d   :  { %406 = vmatpush.bf16.xpose.msra.mxu3 %v772_v23  ;;  %801 = vset.pattern.permute.xlu1 %v851_v20  ;;  %27 = vst.msk [vmem:[#allocation3 + $0x8] sm:$0xff] %vm21_vm0, %v852_v21 }
  0x2e   :  { %28 = vst.msk [vmem:[#allocation3 + $0x10] sm:$0xff] %vm21_vm0, %v852_v21 }
  0x2f   :  { %29 = vst.msk [vmem:[#allocation3 + $0x18] sm:$0xff] %vm21_vm0, %v852_v21 }
  0x32   :  { %350 = vmatpush.bf16.xpose.msra.mxu0 %v747_v24 }
  0x33   :  { %369 = vmatpush.bf16.xpose.msra.mxu1 %v755_v25 }
  0x34   :  { %388 = vmatpush.bf16.xpose.msra.mxu2 %v763_v26  ;;  %v1049_v26 = vld [vmem:[#allocation2 + $0x8] sm:$0xff] }
  0x35   :  { %407 = vmatpush.bf16.xpose.msra.mxu3 %v771_v27 }
  0x3a   :  { %351 = vmatpush.bf16.xpose.msra.mxu0 %v746_v28 }
  0x3b   :  { %370 = vmatpush.bf16.xpose.msra.mxu1 %v754_v29 }
  0x3c   :  { %389 = vmatpush.bf16.xpose.msra.mxu2 %v762_v30  ;;  %v1059_v30 = vld [vmem:[#allocation2 + $0x10] sm:$0xff] }
  0x3d   :  { %408 = vmatpush.bf16.xpose.msra.mxu3 %v770_v31 }
  0x41   :  { %352 = vmatmul.bf16.vlgmr.msra.gmra.mxu0 %v744_v32 }
  0x42   :  { %371 = vmatmul.bf16.vlgmr.msra.gmra.mxu1 %v744_v32 }
  0x43   :  { %390 = vmatmul.bf16.vlgmr.msra.gmra.mxu2 %v744_v32 }
  0x44   :  { %409 = vmatmul.bf16.vlgmr.msra.gmra.mxu3 %v744_v32 }
  0x51   :  { %357 = vmatmul.bf16.gmra.mxu0 %v745_v33 }
  0x52   :  { %376 = vmatmul.bf16.gmra.mxu1 %v745_v33 }
  0x53   :  { %395 = vmatmul.bf16.gmra.mxu2 %v745_v33 }
  0x54   :  { %414 = vmatmul.bf16.gmra.mxu3 %v745_v33 }
  0xbe   :  { %v353_v37 = vpop.f32.mrf.mxu0 }
  0xbf   :  { %v372_v38 = vpop.f32.mrf.mxu1  ;;  %v983_v39 = vadd.f32 %v353_v37, %v132_v35 }
  0xc0   :  { %v985_v40 = vadd.f32 %v372_v38, %v133_v36 }
  0xc2   :  { %v424_v43 = vmax.f32 %v983_v39, %v985_v40 }
  0xc6   :  { %v391_v44 = vpop.f32.mrf.mxu2  ;;  %v355_v49 = vpop.f32.mrf.mxu0 }
  0xc7   :  { %v410_v45 = vpop.f32.mrf.mxu3  ;;  %v990_v47 = vadd.f32 %v391_v44, %v134_v41  ;;  %v374_v50 = vpop.f32.mrf.mxu1  ;;  %v998_v52 = vadd.f32 %v355_v49, %v132_v35 }
  0xc8   :  { %v992_v48 = vadd.f32 %v410_v45, %v135_v42  ;;  %v1000_v53 = vadd.f32 %v374_v50, %v133_v36 }
  0xc9   :  { %v425_v51 = vmax.f32 %v424_v43, %v990_v47 }
  0xca   :  { %v429_v57 = vmax.f32 %v998_v52, %v1000_v53 }
  0xcb   :  { %v426_v54 = vmax.f32 %v425_v51, %v992_v48 }
  0xcd   :  { %427 = vmax.xlane.f32.xlu0 %v426_v54 }
  0xce   :  { %v393_v55 = vpop.f32.mrf.mxu2  ;;  %v358_v59 = vpop.f32.mrf.mxu0 }
  0xcf   :  { %v412_v56 = vpop.f32.mrf.mxu3  ;;  %v1005_v58 = vadd.f32 %v393_v55, %v134_v41  ;;  %v377_v60 = vpop.f32.mrf.mxu1  ;;  %v1010_v63 = vadd.f32 %v358_v59, %v132_v35 }
  0xd0   :  { %v1008_v62 = vadd.f32 %v412_v56, %v135_v42  ;;  %v1012_v0 = vadd.f32 %v377_v60, %v133_v36 }
  0xd1   :  { %v430_v61 = vmax.f32 %v429_v57, %v1005_v58 }
  0xd2   :  { %v434_v2 = vmax.f32 %v1010_v63, %v1012_v0 }
  0xd3   :  { %v431_v1 = vmax.f32 %v430_v61, %v1008_v62 }
  0xd5   :  { %432 = vmax.xlane.f32.xlu0 %v431_v1 }
  0xd6   :  { %v396_v3 = vpop.f32.mrf.mxu2  ;;  %v360_v7 = vpop.f32.mrf.mxu0 }
  0xd7   :  { %v415_v4 = vpop.f32.mrf.mxu3  ;;  %v1017_v5 = vadd.f32 %v396_v3, %v134_v41  ;;  %v379_v8 = vpop.f32.mrf.mxu1  ;;  %v1022_v10 = vadd.f32 %v360_v7, %v132_v35 }
  0xd8   :  { %v1019_v6 = vadd.f32 %v415_v4, %v135_v42  ;;  %v1024_v11 = vadd.f32 %v379_v8, %v133_v36 }
  0xd9   :  { %v435_v9 = vmax.f32 %v434_v2, %v1017_v5 }
  0xda   :  { %v439_v15 = vmax.f32 %v1022_v10, %v1024_v11 }
  0xdb   :  { %v436_v12 = vmax.f32 %v435_v9, %v1019_v6 }
  0xdd   :  { %437 = vmax.xlane.f32.xlu1 %v436_v12 }
  0xde   :  { %v398_v13 = vpop.f32.mrf.mxu2 }
  0xdf   :  { %v417_v14 = vpop.f32.mrf.mxu3  ;;  %v1029_v16 = vadd.f32 %v398_v13, %v134_v41 }
  0xe0   :  { %v1032_v18 = vadd.f32 %v417_v14, %v135_v42 }
  0xe1   :  { %v440_v17 = vmax.f32 %v439_v15, %v1029_v16 }
  0xe3   :  { %v441_v19 = vmax.f32 %v440_v17, %v1032_v18 }
  0xe5   :  { %442 = vmax.xlane.f32.xlu1 %v441_v19 }
 0x140   :  { %v428_v23 = vpop.xlane.xlu0 %427 }
 0x141   :  { %v1042_v24 = vmax.f32 %v1039_v22, %v428_v23 }
 0x143   :  { %v452_v25 = vsub.f32 %v1039_v22, %v1042_v24  ;;  %565 = vst.msk [vmem:[#allocation2] sm:$0xff] %vm21_vm0, %v1042_v24  ;;  %470 = vperm.xlu2 %799, %v1042_v24  }
 0x148   :  { %v433_v27 = vpop.xlane.xlu0 %432 }
 0x149   :  { %v1052_v28 = vmax.f32 %v1049_v26, %v433_v27 }
 0x14b   :  { %v453_v29 = vsub.f32 %v1049_v26, %v1052_v28  ;;  %566 = vst.msk [vmem:[#allocation2 + $0x8] sm:$0xff] %vm21_vm0, %v1052_v28  ;;  %475 = vperm.xlu2 %799, %v1052_v28   ;;  %v572_v28 = vld [vmem:[#allocation2] sm:$0xff] }
 0x150   :  { %v438_v31 = vpop.xlane.xlu1 %437 }
 0x151   :  { %v1062_v32 = vmax.f32 %v1059_v30, %v438_v31 }
 0x153   :  { %v454_v33 = vsub.f32 %v1059_v30, %v1062_v32  ;;  %567 = vst.msk [vmem:[#allocation2 + $0x10] sm:$0xff] %vm21_vm0, %v1062_v32  ;;  %480 = vperm.xlu0 %800, %v1062_v32  }
 0x158   :  { %v443_v35 = vpop.xlane.xlu1 %442 }
 0x159   :  { %v1072_v36 = vmax.f32 %v1069_v34, %v443_v35 }
 0x15b   :  { %v455_v37 = vsub.f32 %v1069_v34, %v1072_v36  ;;  %568 = vst.msk [vmem:[#allocation2 + $0x18] sm:$0xff] %vm21_vm0, %v1072_v36  ;;  %485 = vperm.xlu1 %801, %v1072_v36  }
 0x19d   :  { %v471_v38 = vpop.permute.xlu2 %470 }
 0x19e   :  { %v488_v41 = vsub.f32 %v983_v39, %v471_v38  ;;  %v489_v42 = vsub.f32 %v985_v40, %v471_v38  ;;  %v490_v43 = vsub.f32 %v990_v47, %v471_v38  ;;  %v491_v44 = vsub.f32 %v992_v48, %v471_v38 }
 0x1a0   :  { %v504_v45 = vmul.f32 1.442695, %v488_v41  ;;  %v506_v46 = vmul.f32 1.442695, %v489_v42  ;;  %v508_v49 = vmul.f32 1.442695, %v490_v43 }
 0x1a1   :  { %v510_v50 = vmul.f32 1.442695, %v491_v44  ;;  %v794_v41 = vld [vmem:[%s1152_s0 + $0x8] sm:$0xff]  }
 0x1a2   :  { %802 = vpow2.f32 %v504_v45  ;;  %v795_v42 = vld [vmem:[%s1154_s2 + $0x8] sm:$0xff]   ;;  %v785_v43 = vunpack.c.h.bf16 %v794_v41 }
 0x1a3   :  { %804 = vpow2.f32 %v506_v46 }
 0x1a4   :  { %806 = vpow2.f32 %v508_v49 }
 0x1a5   :  { %v476_v51 = vpop.permute.xlu2 %475  ;;  %808 = vpow2.f32 %v510_v50 }
 0x1a6   :  { %v492_v54 = vsub.f32 %v998_v52, %v476_v51  ;;  %v493_v55 = vsub.f32 %v1000_v53, %v476_v51  ;;  %v494_v39 = vsub.f32 %v1005_v58, %v476_v51  ;;  %v495_v40 = vsub.f32 %v1008_v62, %v476_v51  ;;  %v1090_v52 = vld [vmem:[%s1152_s0] sm:$0xff]  }
 0x1a7   :  { %v1095_v53 = vld [vmem:[%s1154_s2] sm:$0xff]   ;;  %v780_v4 = vunpack.c.l.bf16 %v1090_v52 }
 0x1a8   :  { %v803_v47 = vpop.eup %802  ;;  %v512_v56 = vmul.f32 1.442695, %v492_v54  ;;  %v514_v48 = vmul.f32 1.442695, %v493_v55  ;;  %v516_v59 = vmul.f32 1.442695, %v494_v39  ;;  %v788_v7 = vunpack.c.l.bf16 %v1095_v53 }
 0x1a9   :  { %v805_v57 = vpop.eup %804  ;;  %v518_v1 = vmul.f32 1.442695, %v495_v40 }
 0x1aa   :  { %810 = vpow2.f32 %v512_v56  ;;  %v536_v60 = vadd.f32 %v805_v57, %v803_v47  ;;  %v807_v61 = vpop.eup %806  ;;  %v46_v14 = vmul.f32 %v788_v7, %v780_v4  ;;  %v792_v4 = vunpack.c.l.bf16 %v795_v42 }
 0x1ab   :  { %812 = vpow2.f32 %v514_v48  ;;  %v809_v3 = vpop.eup %808 }
 0x1ac   :  { %v537_v2 = vadd.f32 %v807_v61, %v536_v60  ;;  %814 = vpow2.f32 %v516_v59 }
 0x1ad   :  { %816 = vpow2.f32 %v518_v1 }
 0x1ae   :  { %v538_v58 = vadd.f32 %v809_v3, %v537_v2  ;;  %v781_v2 = vunpack.c.h.bf16 %v1090_v52  ;;  %v789_v3 = vunpack.c.h.bf16 %v1095_v53 }
 0x1b0   :  { %v811_v62 = vpop.eup %810  ;;  %539 = vadd.xlane.f32.xlu2 %v538_v58  ;;  %v47_v58 = vmul.f32 %v789_v3, %v781_v2 }
 0x1b1   :  { %v813_v8 = vpop.eup %812 }
 0x1b2   :  { %v541_v9 = vadd.f32 %v813_v8, %v811_v62  ;;  %v815_v12 = vpop.eup %814  ;;  %v784_v62 = vunpack.c.l.bf16 %v794_v41  ;;  %v456_v8 = vmul.f32 1.442695, %v452_v25 }
 0x1b3   :  { %v817_v15 = vpop.eup %816 }
 0x1b4   :  { %v542_v13 = vadd.f32 %v815_v12, %v541_v9  ;;  %v48_v7 = vmul.f32 %v792_v4, %v784_v62  ;;  %v458_v9 = vmul.f32 1.442695, %v453_v29 }
 0x1b6   :  { %v543_v17 = vadd.f32 %v817_v15, %v542_v13  ;;  %v448_v13 = vld [vmem:[#allocation3] sm:$0xff] }
 0x1b8   :  { %544 = vadd.xlane.f32.xlu1 %v543_v17  ;;  %50 = vadd.xlane.f32.xlu2 %v46_v14  ;;  %v449_v17 = vld [vmem:[#allocation3 + $0x8] sm:$0xff] }
 0x1c5   :  { %v481_v19 = vpop.permute.xlu0 %480 }
 0x1c6   :  { %v496_v20 = vsub.f32 %v1010_v63, %v481_v19  ;;  %v497_v21 = vsub.f32 %v1012_v0, %v481_v19  ;;  %v498_v23 = vsub.f32 %v1017_v5, %v481_v19  ;;  %v499_v27 = vsub.f32 %v1019_v6, %v481_v19 }
 0x1c7   :  { %v793_v63 = vunpack.c.h.bf16 %v795_v42  ;;  %v450_v42 = vld [vmem:[#allocation3 + $0x10] sm:$0xff] }
 0x1c8   :  { %v520_v31 = vmul.f32 1.442695, %v496_v20  ;;  %v522_v35 = vmul.f32 1.442695, %v497_v21  ;;  %v524_v38 = vmul.f32 1.442695, %v498_v23 }
 0x1c9   :  { %v526_v0 = vmul.f32 1.442695, %v499_v27  ;;  %v49_v44 = vmul.f32 %v793_v63, %v785_v43 }
 0x1ca   :  { %818 = vpow2.f32 %v520_v31  ;;  %v460_v31 = vmul.f32 1.442695, %v454_v33 }
 0x1cb   :  { %820 = vpow2.f32 %v522_v35  ;;  %56 = vadd.xlane.f32.xlu1 %v49_v44 }
 0x1cc   :  { %822 = vpow2.f32 %v524_v38  ;;  %v462_v38 = vmul.f32 1.442695, %v455_v37 }
 0x1cd   :  { %v486_v5 = vpop.permute.xlu1 %485  ;;  %824 = vpow2.f32 %v526_v0 }
 0x1ce   :  { %v500_v6 = vsub.f32 %v1022_v10, %v486_v5  ;;  %v501_v45 = vsub.f32 %v1024_v11, %v486_v5  ;;  %v502_v46 = vsub.f32 %v1029_v16, %v486_v5  ;;  %v503_v49 = vsub.f32 %v1032_v18, %v486_v5  ;;  %v451_v5 = vld [vmem:[#allocation3 + $0x18] sm:$0xff] }
 0x1d0   :  { %v819_v50 = vpop.eup %818  ;;  %v528_v51 = vmul.f32 1.442695, %v500_v6  ;;  %v530_v54 = vmul.f32 1.442695, %v501_v45  ;;  %v532_v39 = vmul.f32 1.442695, %v502_v46 }
 0x1d1   :  { %v821_v55 = vpop.eup %820  ;;  %v534_v56 = vmul.f32 1.442695, %v503_v49  ;;  %v573_v49 = vld [vmem:[#allocation2 + $0x8] sm:$0xff] }
 0x1d2   :  { %826 = vpow2.f32 %v528_v51  ;;  %v546_v40 = vadd.f32 %v821_v55, %v819_v50  ;;  %v823_v47 = vpop.eup %822 }
 0x1d3   :  { %828 = vpow2.f32 %v530_v54  ;;  %v825_v10 = vpop.eup %824 }
 0x1d4   :  { %v547_v48 = vadd.f32 %v823_v47, %v546_v40  ;;  %830 = vpow2.f32 %v532_v39 }
 0x1d5   :  { %832 = vpow2.f32 %v534_v56  ;;  %v575_v56 = vld [vmem:[#allocation2 + $0x18] sm:$0xff] }
 0x1d6   :  { %v548_v11 = vadd.f32 %v825_v10, %v547_v48  ;;  %834 = vpow2.f32 %v456_v8 }
 0x1d7   :  { %836 = vpow2.f32 %v458_v9 }
 0x1d8   :  { %v827_v16 = vpop.eup %826  ;;  %549 = vadd.xlane.f32.xlu0 %v548_v11 }
 0x1d9   :  { %v829_v57 = vpop.eup %828 }
 0x1da   :  { %v551_v59 = vadd.f32 %v829_v57, %v827_v16  ;;  %v831_v18 = vpop.eup %830  ;;  %v574_v57 = vld [vmem:[#allocation2 + $0x10] sm:$0xff] }
 0x1db   :  { %v833_v61 = vpop.eup %832 }
 0x1dc   :  { %v552_v60 = vadd.f32 %v831_v18, %v551_v59  ;;  %v835_v12 = vpop.eup %834 }
 0x1dd   :  { %v464_v52 = vmul.f32 %v835_v12, %v448_v13  ;;  %v837_v15 = vpop.eup %836 }
 0x1de   :  { %v553_v1 = vadd.f32 %v833_v61, %v552_v60  ;;  %v465_v19 = vmul.f32 %v837_v15, %v449_v17 }
 0x1e0   :  { %554 = vadd.xlane.f32.xlu2 %v553_v1 }
 0x1e8   :  { %52 = vadd.xlane.f32.xlu2 %v47_v58 }
 0x1f0   :  { %54 = vadd.xlane.f32.xlu2 %v48_v7 }
 0x223   :  { %v540_v53 = vpop.xlane.xlu2 %539 }
 0x224   :  { %v556_v14 = vadd.f32 %v540_v53, %v464_v52 }
 0x226   :  { %561 = vst.msk [vmem:[#allocation3] sm:$0xff] %vm21_vm0, %v556_v14 }
 0x22b   :  { %v545_v20 = vpop.xlane.xlu1 %544  ;;  %v51_v21 = vpop.xlane.xlu2 %50 }
 0x22c   :  { %v557_v22 = vadd.f32 %v545_v20, %v465_v19  ;;  %58 = vst.msk [vmem:[#allocation4] sm:$0xff] %vm21_vm0, %v51_v21 }
 0x22d   :  { %v576_v24 = vld [vmem:[#allocation3] sm:$0xff] }
 0x22e   :  { %562 = vst.msk [vmem:[#allocation3 + $0x8] sm:$0xff] %vm21_vm0, %v557_v22  ;;  %838 = vlog2.f32 %v576_v24 }
 0x22f   :  { %840 = vpow2.f32 %v460_v31 }
 0x230   :  { %842 = vpow2.f32 %v462_v38 }
 0x233   :  { %v592_v29 = vld [vmem:[#allocation4] sm:$0xff] }
 0x234   :  { %v839_v25 = vpop.eup %838 }
 0x235   :  { %v581_v26 = vmul.f32 0.6931472, %v839_v25  ;;  %v841_v41 = vpop.eup %840  ;;  %v577_v32 = vld [vmem:[#allocation3 + $0x8] sm:$0xff] }
 0x236   :  { %v466_v43 = vmul.f32 %v841_v41, %v450_v42  ;;  %v843_v44 = vpop.eup %842  ;;  %844 = vlog2.f32 %v577_v32 }
 0x237   :  { %v588_v23 = vadd.f32 %v581_v26, %v572_v28  ;;  %v467_v30 = vmul.f32 %v843_v44, %v451_v5 }
 0x239   :  { %v596_v27 = vsub.f32 %v588_v23, %v592_v29 }
 0x23b   :  { %600 = vst.msk [vmem:[%s1155_s4] sm:$0xff] %vm21_vm0, %v596_v27 }
 0x23c   :  { %v845_v34 = vpop.eup %844 }
 0x23d   :  { %v583_v46 = vmul.f32 0.6931472, %v845_v34 }
 0x23e   :  { %v57_v35 = vpop.xlane.xlu1 %56 }
 0x23f   :  { %61 = vst.msk [vmem:[#allocation4 + $0x18] sm:$0xff] %vm21_vm0, %v57_v35  ;;  %v589_v50 = vadd.f32 %v583_v46, %v573_v49 }
 0x246   :  { %v595_v48 = vld [vmem:[#allocation4 + $0x18] sm:$0xff] }
 0x24b   :  { %v550_v63 = vpop.xlane.xlu0 %549 }
 0x24c   :  { %v558_v0 = vadd.f32 %v550_v63, %v466_v43 }
 0x24e   :  { %563 = vst.msk [vmem:[#allocation3 + $0x10] sm:$0xff] %vm21_vm0, %v558_v0 }
 0x253   :  { %v555_v33 = vpop.xlane.xlu2 %554 }
 0x254   :  { %v559_v6 = vadd.f32 %v555_v33, %v467_v30 }
 0x255   :  { %v578_v45 = vld [vmem:[#allocation3 + $0x10] sm:$0xff] }
 0x256   :  { %564 = vst.msk [vmem:[#allocation3 + $0x18] sm:$0xff] %vm21_vm0, %v559_v6  ;;  %846 = vlog2.f32 %v578_v45 }
 0x25b   :  { %v53_v36 = vpop.xlane.xlu2 %52 }
 0x25c   :  { %59 = vst.msk [vmem:[#allocation4 + $0x8] sm:$0xff] %vm21_vm0, %v53_v36  ;;  %v847_v51 = vpop.eup %846 }
 0x25d   :  { %v579_v37 = vld [vmem:[#allocation3 + $0x18] sm:$0xff]  ;;  %v585_v10 = vmul.f32 0.6931472, %v847_v51 }
 0x25e   :  { %848 = vlog2.f32 %v579_v37 }
 0x25f   :  { %v590_v59 = vadd.f32 %v585_v10, %v574_v57 }
 0x263   :  { %v593_v54 = vld [vmem:[#allocation4 + $0x8] sm:$0xff]  ;;  %v55_v55 = vpop.xlane.xlu2 %54 }
 0x264   :  { %v849_v39 = vpop.eup %848  ;;  %v597_v40 = vsub.f32 %v589_v50, %v593_v54  ;;  %60 = vst.msk [vmem:[#allocation4 + $0x10] sm:$0xff] %vm21_vm0, %v55_v55 }
 0x265   :  { %v587_v47 = vmul.f32 0.6931472, %v849_v39 }
 0x266   :  { %601 = vst.msk [vmem:[%s1155_s4 + $0x8] sm:$0xff] %vm21_vm0, %v597_v40 }
 0x267   :  { %v591_v11 = vadd.f32 %v587_v47, %v575_v56 }
 0x269   :  { %v599_v16 = vsub.f32 %v591_v11, %v595_v48 }
 0x26b   :  { %603 = vst.msk [vmem:[%s1155_s4 + $0x18] sm:$0xff] %vm21_vm0, %v599_v16  ;;  %v594_v18 = vld [vmem:[#allocation4 + $0x10] sm:$0xff] }
 0x26c   :  { %v598_v60 = vsub.f32 %v590_v59, %v594_v18 }
 0x26e   :  { %602 = vst.msk [vmem:[%s1155_s4 + $0x10] sm:$0xff] %vm21_vm0, %v598_v60 }

</bundles_post_ra>
